<compile_context>
chip_gen: v7x
topology: tpu7x:2x2x1
jax: 0.10.0
libtpu: 0.0.40
codegen_flags: <defaults>
</compile_context>

<pallas_src>
import jax
import jax.numpy as jnp
import numpy as np
from jax.experimental import pallas as pl
from jax.experimental.pallas import tpu as pltpu

POOL_SIZE = 10
TOP_K = 4
PROMPT_LEN = 16
EMBED_DIM = 512
C1 = 56
C2 = 56
EPS = 1e-12


# ----------------------------------------------------------------------------
# Kernel 1: l2-normalize keys + embeddings and compute similarity (MXU matmul)
# ----------------------------------------------------------------------------
def _similarity_kernel(x_ref, k_ref, xn_ref, kn_ref, sim_ref):
    x = x_ref[...]          # (B, D)
    k = k_ref[...]          # (P, D)
    xn = x * jax.lax.rsqrt(jnp.maximum(jnp.sum(x * x, axis=1, keepdims=True), EPS))
    kn = k * jax.lax.rsqrt(jnp.maximum(jnp.sum(k * k, axis=1, keepdims=True), EPS))
    xn_ref[...] = xn
    kn_ref[...] = kn
    # Contract dim 1 of both operands: keeps the 512-contraction lane-aligned
    # and avoids an explicit cross-lane transpose of the key tile.
    sim_ref[...] = jax.lax.dot_general(
        xn, kn,
        dimension_numbers=(((1,), (1,)), ((), ())),
        preferred_element_type=jnp.float32,
    )


def compute_similarity(x_embed, prompt_key):
    B, D = x_embed.shape
    P, _ = prompt_key.shape
    return pl.pallas_call(
        _similarity_kernel,
        grid=(1,),
        in_specs=[
            pl.BlockSpec((B, D), lambda i: (0, 0)),
            pl.BlockSpec((P, D), lambda i: (0, 0)),
        ],
        out_specs=(
            pl.BlockSpec((B, D), lambda i: (0, 0)),
            pl.BlockSpec((P, D), lambda i: (0, 0)),
            pl.BlockSpec((B, P), lambda i: (0, 0)),
        ),
        out_shape=(
            jax.ShapeDtypeStruct((B, D), jnp.float32),   # x_embed_norm
            jax.ShapeDtypeStruct((P, D), jnp.float32),   # prompt_norm
            jax.ShapeDtypeStruct((B, P), jnp.float32),   # similarity
        ),
    )(x_embed, prompt_key)


# ----------------------------------------------------------------------------
# Kernel 2: batch-invariant inverse L2 norm of the selected prompt stack.
# Reads the selected prompts directly from the pool via scalar prefetch and
# accumulates sum-of-squares over the K grid steps (output stays resident).
# ----------------------------------------------------------------------------
def _prompt_inv_norm_kernel(ids_ref, p_ref, inv_ref):
    del ids_ref                                    # used only in index_maps
    k = pl.program_id(0)
    p = p_ref[0]                                   # (L, 56, 56)
    ssq = jnp.sum(p * p, axis=0)                   # (56, 56)

    @pl.when(k == 0)
    def _():
        inv_ref[...] = jnp.zeros_like(inv_ref)

    inv_ref[...] = inv_ref[...] + ssq

    @pl.when(k == pl.num_programs(0) - 1)
    def _():
        inv_ref[...] = jax.lax.rsqrt(jnp.maximum(inv_ref[...], EPS))


def compute_prompt_inv_norm(prompt, major_ids):
    P, L, c1, c2 = prompt.shape
    K = major_ids.shape[0]
    return pl.pallas_call(
        _prompt_inv_norm_kernel,
        grid_spec=pltpu.PrefetchScalarGridSpec(
            num_scalar_prefetch=1,
            grid=(K,),
            in_specs=[
                pl.BlockSpec((1, L, c1, c2), lambda k, ids: (ids[k], 0, 0, 0)),
            ],
            out_specs=pl.BlockSpec((c1, c2), lambda k, ids: (0, 0)),
        ),
        out_shape=jax.ShapeDtypeStruct((c1, c2), jnp.float32),
        compiler_params=pltpu.CompilerParams(
            dimension_semantics=("arbitrary",)),
    )(major_ids, prompt)


# ----------------------------------------------------------------------------
# Kernel 3: normalized prompt (folded multiply) x data, batched 56x56 matmuls.
# Prompt blocks come straight from the (P, L, 56, 56) pool via scalar-prefetch
# ids (no HBM gather, no per-batch duplication).  Grid (K, B) with k outer so
# the prompt block index repeats across consecutive b steps (re-DMA skipped).
# ----------------------------------------------------------------------------
def _prompt_bmm_kernel(ids_ref, p_ref, inv_ref, d_ref, o_ref):
    del ids_ref
    p = p_ref[0]                                   # (L, 56, 56)
    d = d_ref[0]                                   # (L, 56, 56)
    pn = p * inv_ref[...]                          # batch-invariant normalization
    o_ref[0] = jax.lax.dot_general(
        pn, d,
        dimension_numbers=(((2,), (1,)), ((0,), (0,))),
        preferred_element_type=jnp.float32,
    )


def prompted_bmm(prompt, inv_norm, data4, major_ids):
    _, L, c1, c2 = prompt.shape
    B, KL, _, _ = data4.shape
    K = major_ids.shape[0]
    assert KL == K * L
    return pl.pallas_call(
        _prompt_bmm_kernel,
        grid_spec=pltpu.PrefetchScalarGridSpec(
            num_scalar_prefetch=1,
            grid=(K, B),
            in_specs=[
                pl.BlockSpec((1, L, c1, c2), lambda k, b, ids: (ids[k], 0, 0, 0)),
                pl.BlockSpec((c1, c2), lambda k, b, ids: (0, 0)),
                pl.BlockSpec((1, L, c1, c2), lambda k, b, ids: (b, k, 0, 0)),
            ],
            out_specs=pl.BlockSpec((1, L, c1, c2), lambda k, b, ids: (b, k, 0, 0)),
        ),
        out_shape=jax.ShapeDtypeStruct((B, KL, c1, c2), jnp.float32),
        compiler_params=pltpu.CompilerParams(
            dimension_semantics=("parallel", "parallel")),
    )(major_ids, prompt, inv_norm, data4)


# ----------------------------------------------------------------------------
# Full forward pass
# ----------------------------------------------------------------------------
def prompt_forward(params, x_embed, data):
    prompt = params["prompt"]          # (P, L, 56, 56)
    prompt_key = params["prompt_key"]  # (P, 512)
    B = x_embed.shape[0]
    _, L, c1, c2 = prompt.shape

    x_embed_norm, prompt_norm, similarity = compute_similarity(x_embed, prompt_key)

    # torch.topk over similarity (per-row top_k prompt indices)
    _, idx = jax.lax.top_k(similarity, TOP_K)                 # (B, TOP_K) int32

    # torch.unique(idx, return_counts=True, sorted=True) + padding, fixed-shape
    counts = jnp.bincount(idx.reshape(-1), length=POOL_SIZE)  # (P,)
    mask = counts > 0
    num_unique = jnp.sum(mask.astype(jnp.int32))
    ids = jnp.arange(POOL_SIZE, dtype=jnp.int32)
    order = jnp.argsort(jnp.where(mask, ids, ids + POOL_SIZE))  # present ids first, ascending
    prompt_id_sorted = ids[order]
    id_counts_sorted = counts[order]                          # absent ids contribute 0 (= torch padding)
    min_idx = jnp.min(idx)
    prompt_id_full = jnp.where(jnp.arange(POOL_SIZE) < num_unique, prompt_id_sorted, min_idx)

    # torch.topk(id_counts, k=top_k) -> majority-voted prompt ids
    _, major_idx = jax.lax.top_k(id_counts_sorted, TOP_K)
    major_prompt_id = prompt_id_full[major_idx].astype(jnp.int32)      # (TOP_K,)
    idx_b = jnp.broadcast_to(major_prompt_id[None, :], (B, TOP_K))     # (B, TOP_K)

    # selected_key output (tiny gather); reduce_sim via similarity gather:
    # prompt_norm[idx_b[b,k]] . x_embed_norm[b] == similarity[b, idx_b[b,k]]
    batched_key_norm = prompt_norm[idx_b]                     # (B, TOP_K, 512)
    reduce_sim = jnp.sum(similarity[:, major_prompt_id]) / B

    data4 = data.reshape(B, TOP_K * L, c1, c2)
    inv_norm = compute_prompt_inv_norm(prompt, major_prompt_id)        # (56, 56)
    prompted_data = prompted_bmm(prompt, inv_norm, data4, major_prompt_id)

    out = {
        "prompt_idx": idx_b,
        "prompt_norm": prompt_norm,
        "x_embed_norm": x_embed_norm,
        "similarity": similarity,
        "selected_key": batched_key_norm,
        "reduce_sim": reduce_sim,
        "total_prompt_len": TOP_K * L,
        "prompted_data": prompted_data,
    }
    return out


# ----------------------------------------------------------------------------
# Pure-JAX reference (for a light numerical sanity check)
# ----------------------------------------------------------------------------
def _l2_normalize_ref(x, axis):
    ss = jnp.sum(x * x, axis=axis, keepdims=True)
    return x * jax.lax.rsqrt(jnp.maximum(ss, EPS))


def _reference(params, x_embed, data, idx_b):
    prompt = params["prompt"]
    prompt_key = params["prompt_key"]
    pn = _l2_normalize_ref(prompt_key, 1)
    xn = _l2_normalize_ref(x_embed, 1)
    sim = jnp.matmul(xn, pn.T, precision=jax.lax.Precision.HIGHEST)
    bp = prompt[idx_b].reshape(x_embed.shape[0], TOP_K * PROMPT_LEN, C1, C2)
    npn = _l2_normalize_ref(bp, 1)
    d4 = data.reshape(bp.shape)
    res = jnp.einsum("blik,blkj->blij", npn, d4, precision=jax.lax.Precision.HIGHEST)
    red = jnp.sum(pn[idx_b] * xn[:, None, :]) / x_embed.shape[0]
    return sim, res, red


if __name__ == "__main__":
    B = 2
    key = jax.random.PRNGKey(0)
    kp, kk, kx, kd = jax.random.split(key, 4)

    params = {
        "prompt": jax.random.uniform(
            kp, (POOL_SIZE, PROMPT_LEN, C1, C2), jnp.float32, minval=-1.0, maxval=1.0
        ),
        "prompt_key": jax.random.uniform(
            kk, (POOL_SIZE, EMBED_DIM), jnp.float32, minval=-1.0, maxval=1.0
        ),
    }
    x_embed = jax.random.normal(kx, (B, EMBED_DIM), jnp.float32)
    data = jax.random.normal(kd, (B, TOP_K * PROMPT_LEN, C1, C2), jnp.float32)

    forward = jax.jit(prompt_forward)
    out = forward(params, x_embed, data)
    jax.block_until_ready(out["prompted_data"])
    jax.block_until_ready(out["reduce_sim"])

    # light numerical sanity check against a pure-JAX reference
    sim_ref, res_ref, red_ref = _reference(params, x_embed, data, out["prompt_idx"])
    np.testing.assert_allclose(np.asarray(out["similarity"]), np.asarray(sim_ref),
                               rtol=1e-2, atol=1e-2)
    np.testing.assert_allclose(np.asarray(out["prompted_data"]), np.asarray(res_ref),
                               rtol=1e-2, atol=1e-2)
    np.testing.assert_allclose(float(out["reduce_sim"]), float(red_ref),
                               rtol=1e-2, atol=1e-2)
    assert int(out["total_prompt_len"]) == TOP_K * PROMPT_LEN

    print("KERNEL_OK")
</pallas_src>

<mosaic_0001>
module attributes {stable_mosaic.version = 11 : i64} {
  func.func @_similarity_kernel(%arg0: i32, %arg1: memref<2x512xf32, #tpu.memory_space<vmem>>, %arg2: memref<10x512xf32, #tpu.memory_space<vmem>>, %arg3: memref<2x512xf32, #tpu.memory_space<vmem>>, %arg4: memref<10x512xf32, #tpu.memory_space<vmem>>, %arg5: memref<2x10xf32, #tpu.memory_space<vmem>>) attributes {dimension_semantics = [#tpu.dimension_semantics<arbitrary>], iteration_bounds = array<i64: 1>, scalar_prefetch = 0 : i64, scratch_operands = 0 : i64, tpu.core_type = #tpu.core_type<tc>, window_params = [{pipeline_mode = #tpu.pipeline_mode<synchronous>, transform_indices = @transform_0, window_bounds = array<i64: 2, 512>}, {pipeline_mode = #tpu.pipeline_mode<synchronous>, transform_indices = @transform_1, window_bounds = array<i64: 10, 512>}, {pipeline_mode = #tpu.pipeline_mode<synchronous>, transform_indices = @transform_2, window_bounds = array<i64: 2, 512>}, {pipeline_mode = #tpu.pipeline_mode<synchronous>, transform_indices = @transform_3, window_bounds = array<i64: 10, 512>}, {pipeline_mode = #tpu.pipeline_mode<synchronous>, transform_indices = @transform_4, window_bounds = array<i64: 2, 10>}]} {
    %c0 = arith.constant 0 : index
    %c0_0 = arith.constant 0 : index
    %0 = vector.load %arg1[%c0, %c0_0] : memref<2x512xf32, #tpu.memory_space<vmem>>, vector<2x512xf32>
    %c0_1 = arith.constant 0 : index
    %c0_2 = arith.constant 0 : index
    %1 = vector.load %arg2[%c0_1, %c0_2] : memref<10x512xf32, #tpu.memory_space<vmem>>, vector<10x512xf32>
    %2 = arith.mulf %0, %0 : vector<2x512xf32>
    %cst = arith.constant dense<0.000000e+00> : vector<2xf32>
    %3 = vector.multi_reduction <add>, %2, %cst [1] : vector<2x512xf32> to vector<2xf32>
    %4 = vector.shape_cast %3 : vector<2xf32> to vector<2x1xf32>
    %cst_3 = arith.constant 9.99999996E-13 : f32
    %5 = vector.broadcast %cst_3 : f32 to vector<2x1xf32>
    %6 = arith.maximumf %4, %5 : vector<2x1xf32>
    %7 = math.rsqrt %6 : vector<2x1xf32>
    %8 = vector.broadcast %7 : vector<2x1xf32> to vector<2x512xf32>
    %9 = arith.mulf %0, %8 : vector<2x512xf32>
    %10 = arith.mulf %1, %1 : vector<10x512xf32>
    %cst_4 = arith.constant dense<0.000000e+00> : vector<10xf32>
    %11 = vector.multi_reduction <add>, %10, %cst_4 [1] : vector<10x512xf32> to vector<10xf32>
    %12 = vector.shape_cast %11 : vector<10xf32> to vector<10x1xf32>
    %cst_5 = arith.constant 9.99999996E-13 : f32
    %13 = vector.broadcast %cst_5 : f32 to vector<10x1xf32>
    %14 = arith.maximumf %12, %13 : vector<10x1xf32>
    %15 = math.rsqrt %14 : vector<10x1xf32>
    %16 = vector.broadcast %15 : vector<10x1xf32> to vector<10x512xf32>
    %17 = arith.mulf %1, %16 : vector<10x512xf32>
    %c0_6 = arith.constant 0 : index
    %c0_7 = arith.constant 0 : index
    %18 = vector.load %arg3[%c0_6, %c0_7] : memref<2x512xf32, #tpu.memory_space<vmem>>, vector<2x512xf32>
    tpu.vector_store %arg3[%c0_6, %c0_7], %9 {strides = array<i32>} : memref<2x512xf32, #tpu.memory_space<vmem>>, vector<2x512xf32>,
    %c0_8 = arith.constant 0 : index
    %c0_9 = arith.constant 0 : index
    %19 = vector.load %arg4[%c0_8, %c0_9] : memref<10x512xf32, #tpu.memory_space<vmem>>, vector<10x512xf32>
    tpu.vector_store %arg4[%c0_8, %c0_9], %17 {strides = array<i32>} : memref<10x512xf32, #tpu.memory_space<vmem>>, vector<10x512xf32>,
    %cst_10 = arith.constant dense<0.000000e+00> : vector<2x10xf32>
    %20 = tpu.matmul %9, %17, %cst_10 {dimension_numbers = #tpu.dot_dimension_numbers<[1], [1], [0], [0], [0, 0, 1, 0], [], []>} : vector<2x512xf32>, vector<10x512xf32>, vector<2x10xf32> -> vector<2x10xf32>
    %c0_11 = arith.constant 0 : index
    %c0_12 = arith.constant 0 : index
    %21 = vector.load %arg5[%c0_11, %c0_12] : memref<2x10xf32, #tpu.memory_space<vmem>>, vector<2x10xf32>
    tpu.vector_store %arg5[%c0_11, %c0_12], %20 {strides = array<i32>} : memref<2x10xf32, #tpu.memory_space<vmem>>, vector<2x10xf32>,
    return
  }
  func.func @transform_0(%arg0: i32) -> (i32, i32) {
    %c0_i32 = arith.constant 0 : i32
    %c0_i32_0 = arith.constant 0 : i32
    %c0_i32_1 = arith.constant 0 : i32
    return %c0_i32, %c0_i32_0 : i32, i32
  }
  func.func @transform_1(%arg0: i32) -> (i32, i32) {
    %c0_i32 = arith.constant 0 : i32
    %c0_i32_0 = arith.constant 0 : i32
    %c0_i32_1 = arith.constant 0 : i32
    return %c0_i32, %c0_i32_0 : i32, i32
  }
  func.func @transform_2(%arg0: i32) -> (i32, i32) {
    %c0_i32 = arith.constant 0 : i32
    %c0_i32_0 = arith.constant 0 : i32
    %c0_i32_1 = arith.constant 0 : i32
    return %c0_i32, %c0_i32_0 : i32, i32
  }
  func.func @transform_3(%arg0: i32) -> (i32, i32) {
    %c0_i32 = arith.constant 0 : i32
    %c0_i32_0 = arith.constant 0 : i32
    %c0_i32_1 = arith.constant 0 : i32
    return %c0_i32, %c0_i32_0 : i32, i32
  }
  func.func @transform_4(%arg0: i32) -> (i32, i32) {
    %c0_i32 = arith.constant 0 : i32
    %c0_i32_0 = arith.constant 0 : i32
    %c0_i32_1 = arith.constant 0 : i32
    return %c0_i32, %c0_i32_0 : i32, i32
  }
}

module attributes {stable_mosaic.version = 11 : i64} {
  func.func @_prompt_inv_norm_kernel(%arg0: i32, %arg1: memref<4xi32, #tpu.memory_space<smem>>, %arg2: memref<1x16x56x56xf32, #tpu.memory_space<vmem>>, %arg3: memref<56x56xf32, #tpu.memory_space<vmem>>) attributes {dimension_semantics = [#tpu.dimension_semantics<arbitrary>], iteration_bounds = array<i64: 4>, scalar_prefetch = 1 : i64, scratch_operands = 0 : i64, tpu.core_type = #tpu.core_type<tc>, window_params = [{transform_indices = @transform_0, window_bounds = array<i64: 1, 16, 56, 56>}, {pipeline_mode = #tpu.pipeline_mode<synchronous>, transform_indices = @transform_1, window_bounds = array<i64: 56, 56>}]} {
    %c0 = arith.constant 0 : index
    %c0_0 = arith.constant 0 : index
    %c0_1 = arith.constant 0 : index
    %c0_2 = arith.constant 0 : index
    %0 = vector.load %arg2[%c0, %c0_0, %c0_1, %c0_2] : memref<1x16x56x56xf32, #tpu.memory_space<vmem>>, vector<1x16x56x56xf32>
    %1 = vector.shape_cast %0 : vector<1x16x56x56xf32> to vector<16x56x56xf32>
    %2 = arith.mulf %1, %1 : vector<16x56x56xf32>
    %cst = arith.constant dense<0.000000e+00> : vector<56x56xf32>
    %3 = vector.multi_reduction <add>, %2, %cst [0] : vector<16x56x56xf32> to vector<56x56xf32>
    %c0_i32 = arith.constant 0 : i32
    %4 = arith.cmpi eq, %arg0, %c0_i32 : i32
    %5 = arith.extui %4 : i1 to i32
    %c0_i32_3 = arith.constant 0 : i32
    %6 = arith.cmpi ne, %5, %c0_i32_3 : i32
    scf.if %6 {
      %cst_9 = arith.constant 0.000000e+00 : f32
      %13 = vector.broadcast %cst_9 : f32 to vector<56x56xf32>
      %c0_10 = arith.constant 0 : index
      %c0_11 = arith.constant 0 : index
      %14 = vector.load %arg3[%c0_10, %c0_11] : memref<56x56xf32, #tpu.memory_space<vmem>>, vector<56x56xf32>
      tpu.vector_store %arg3[%c0_10, %c0_11], %13 {strides = array<i32>} : memref<56x56xf32, #tpu.memory_space<vmem>>, vector<56x56xf32>,
    } else {
    }
    %c0_4 = arith.constant 0 : index
    %c0_5 = arith.constant 0 : index
    %7 = vector.load %arg3[%c0_4, %c0_5] : memref<56x56xf32, #tpu.memory_space<vmem>>, vector<56x56xf32>
    %8 = arith.addf %7, %3 : vector<56x56xf32>
    %c0_6 = arith.constant 0 : index
    %c0_7 = arith.constant 0 : index
    %9 = vector.load %arg3[%c0_6, %c0_7] : memref<56x56xf32, #tpu.memory_space<vmem>>, vector<56x56xf32>
    tpu.vector_store %arg3[%c0_6, %c0_7], %8 {strides = array<i32>} : memref<56x56xf32, #tpu.memory_space<vmem>>, vector<56x56xf32>,
    %c3_i32 = arith.constant 3 : i32
    %10 = arith.cmpi eq, %arg0, %c3_i32 : i32
    %11 = arith.extui %10 : i1 to i32
    %c0_i32_8 = arith.constant 0 : i32
    %12 = arith.cmpi ne, %11, %c0_i32_8 : i32
    scf.if %12 {
      %c0_9 = arith.constant 0 : index
      %c0_10 = arith.constant 0 : index
      %13 = vector.load %arg3[%c0_9, %c0_10] : memref<56x56xf32, #tpu.memory_space<vmem>>, vector<56x56xf32>
      %cst_11 = arith.constant 9.99999996E-13 : f32
      %14 = vector.broadcast %cst_11 : f32 to vector<56x56xf32>
      %15 = arith.maximumf %13, %14 : vector<56x56xf32>
      %16 = math.rsqrt %15 : vector<56x56xf32>
      %c0_12 = arith.constant 0 : index
      %c0_13 = arith.constant 0 : index
      %17 = vector.load %arg3[%c0_12, %c0_13] : memref<56x56xf32, #tpu.memory_space<vmem>>, vector<56x56xf32>
      tpu.vector_store %arg3[%c0_12, %c0_13], %16 {strides = array<i32>} : memref<56x56xf32, #tpu.memory_space<vmem>>, vector<56x56xf32>,
    } else {
    }
    return
  }
  func.func @transform_0(%arg0: i32, %arg1: memref<4xi32, #tpu.memory_space<smem>>) -> (i32, i32, i32, i32) {
    %0 = arith.index_cast %arg0 : i32 to index
    %1 = memref.load %arg1[%0] : memref<4xi32, #tpu.memory_space<smem>>
    %c0_i32 = arith.constant 0 : i32
    %c0_i32_0 = arith.constant 0 : i32
    %c0_i32_1 = arith.constant 0 : i32
    %c0_i32_2 = arith.constant 0 : i32
    return %1, %c0_i32, %c0_i32_0, %c0_i32_1 : i32, i32, i32, i32
  }
  func.func @transform_1(%arg0: i32, %arg1: memref<4xi32, #tpu.memory_space<smem>>) -> (i32, i32) {
    %c0_i32 = arith.constant 0 : i32
    %c0_i32_0 = arith.constant 0 : i32
    %c0_i32_1 = arith.constant 0 : i32
    return %c0_i32, %c0_i32_0 : i32, i32
  }
}

module attributes {stable_mosaic.version = 11 : i64} {
  func.func @_prompt_bmm_kernel(%arg0: i32, %arg1: i32, %arg2: memref<4xi32, #tpu.memory_space<smem>>, %arg3: memref<1x16x56x56xf32, #tpu.memory_space<vmem>>, %arg4: memref<56x56xf32, #tpu.memory_space<vmem>>, %arg5: memref<1x16x56x56xf32, #tpu.memory_space<vmem>>, %arg6: memref<1x16x56x56xf32, #tpu.memory_space<vmem>>) attributes {dimension_semantics = [#tpu.dimension_semantics<parallel>, #tpu.dimension_semantics<parallel>], iteration_bounds = array<i64: 4, 2>, scalar_prefetch = 1 : i64, scratch_operands = 0 : i64, tpu.core_type = #tpu.core_type<tc>, window_params = [{transform_indices = @transform_0, window_bounds = array<i64: 1, 16, 56, 56>}, {pipeline_mode = #tpu.pipeline_mode<synchronous>, transform_indices = @transform_1, window_bounds = array<i64: 56, 56>}, {transform_indices = @transform_2, window_bounds = array<i64: 1, 16, 56, 56>}, {transform_indices = @transform_3, window_bounds = array<i64: 1, 16, 56, 56>}]} {
    %c0 = arith.constant 0 : index
    %c0_0 = arith.constant 0 : index
    %c0_1 = arith.constant 0 : index
    %c0_2 = arith.constant 0 : index
    %0 = vector.load %arg3[%c0, %c0_0, %c0_1, %c0_2] : memref<1x16x56x56xf32, #tpu.memory_space<vmem>>, vector<1x16x56x56xf32>
    %1 = vector.shape_cast %0 : vector<1x16x56x56xf32> to vector<16x56x56xf32>
    %c0_3 = arith.constant 0 : index
    %c0_4 = arith.constant 0 : index
    %c0_5 = arith.constant 0 : index
    %c0_6 = arith.constant 0 : index
    %2 = vector.load %arg5[%c0_3, %c0_4, %c0_5, %c0_6] : memref<1x16x56x56xf32, #tpu.memory_space<vmem>>, vector<1x16x56x56xf32>
    %3 = vector.shape_cast %2 : vector<1x16x56x56xf32> to vector<16x56x56xf32>
    %c0_7 = arith.constant 0 : index
    %c0_8 = arith.constant 0 : index
    %4 = vector.load %arg4[%c0_7, %c0_8] : memref<56x56xf32, #tpu.memory_space<vmem>>, vector<56x56xf32>
    %5 = vector.shape_cast %4 : vector<56x56xf32> to vector<1x56x56xf32>
    %6 = vector.broadcast %5 : vector<1x56x56xf32> to vector<16x56x56xf32>
    %7 = arith.mulf %1, %6 : vector<16x56x56xf32>
    %cst = arith.constant dense<0.000000e+00> : vector<16x56x56xf32>
    %8 = tpu.matmul %7, %3, %cst {dimension_numbers = #tpu.dot_dimension_numbers<[2], [1], [1], [2], [0, 0, 0, 1, 1, 2], [0], [0]>} : vector<16x56x56xf32>, vector<16x56x56xf32>, vector<16x56x56xf32> -> vector<16x56x56xf32>
    %c0_9 = arith.constant 0 : index
    %c0_10 = arith.constant 0 : index
    %c0_11 = arith.constant 0 : index
    %c0_12 = arith.constant 0 : index
    %9 = vector.load %arg6[%c0_9, %c0_10, %c0_11, %c0_12] : memref<1x16x56x56xf32, #tpu.memory_space<vmem>>, vector<1x16x56x56xf32>
    %10 = vector.shape_cast %9 : vector<1x16x56x56xf32> to vector<16x56x56xf32>
    %11 = vector.shape_cast %8 : vector<16x56x56xf32> to vector<1x16x56x56xf32>
    tpu.vector_store %arg6[%c0_9, %c0_10, %c0_11, %c0_12], %11 {strides = array<i32>} : memref<1x16x56x56xf32, #tpu.memory_space<vmem>>, vector<1x16x56x56xf32>,
    return
  }
  func.func @transform_0(%arg0: i32, %arg1: i32, %arg2: memref<4xi32, #tpu.memory_space<smem>>) -> (i32, i32, i32, i32) {
    %0 = arith.index_cast %arg0 : i32 to index
    %1 = memref.load %arg2[%0] : memref<4xi32, #tpu.memory_space<smem>>
    %c0_i32 = arith.constant 0 : i32
    %c0_i32_0 = arith.constant 0 : i32
    %c0_i32_1 = arith.constant 0 : i32
    %c0_i32_2 = arith.constant 0 : i32
    return %1, %c0_i32, %c0_i32_0, %c0_i32_1 : i32, i32, i32, i32
  }
  func.func @transform_1(%arg0: i32, %arg1: i32, %arg2: memref<4xi32, #tpu.memory_space<smem>>) -> (i32, i32) {
    %c0_i32 = arith.constant 0 : i32
    %c0_i32_0 = arith.constant 0 : i32
    %c0_i32_1 = arith.constant 0 : i32
    return %c0_i32, %c0_i32_0 : i32, i32
  }
  func.func @transform_2(%arg0: i32, %arg1: i32, %arg2: memref<4xi32, #tpu.memory_space<smem>>) -> (i32, i32, i32, i32) {
    %c0_i32 = arith.constant 0 : i32
    %c0_i32_0 = arith.constant 0 : i32
    %c0_i32_1 = arith.constant 0 : i32
    return %arg1, %arg0, %c0_i32, %c0_i32_0 : i32, i32, i32, i32
  }
  func.func @transform_3(%arg0: i32, %arg1: i32, %arg2: memref<4xi32, #tpu.memory_space<smem>>) -> (i32, i32, i32, i32) {
    %c0_i32 = arith.constant 0 : i32
    %c0_i32_0 = arith.constant 0 : i32
    %c0_i32_1 = arith.constant 0 : i32
    return %arg1, %arg0, %c0_i32, %c0_i32_0 : i32, i32, i32, i32
  }
}

</mosaic_0001>

<bundles_post_ra>
// kernel: prompt_forward.3
= control target key start
LH: loop header
LB: loop body
LE: loop exit
PB: predicated region body
PF: predicated region fallthrough
CT: control target
= control target key end

     0   :  { %10 = vsyncpa [#allocation3], 0  ;;  %s550_s0 = inlined_call_operand.hbm [shape: f32[2,512], index: 0, kind: input, shape index: {}]   ;;  %s551_s1 = inlined_call_operand.hbm [shape: f32[10,512], index: 1, kind: input, shape index: {}]   ;;  %s552_s2 = inlined_call_operand.hbm [shape: f32[2,512], index: 2, kind: output, shape index: {0}]   ;;  %s553_s3 = inlined_call_operand.vmem [shape: f32[10,512], index: 3, kind: output, shape index: {1}]   ;;  %s554_s4 = inlined_call_operand.vmem [shape: f32[2,10], index: 4, kind: output, shape index: {2}]  }
   0x1   :  { %11 = vsyncpa [#allocation6], 0 }
   0x2   :  { %12 = vsyncpa [#allocation4], 0  ;;  %s420_s15 = smov [#allocation2]   ;;  %s421_s17 = smov [#allocation5]  }
   0x3   :  { %s19_s16 = sshll.u32 %s420_s15, 4  ;;  %s28_s18 = sshll.u32 %s421_s17, 4  ;;  %s20_s16 = int_to_ptr.vmem [resolvable:$true] %s19_s16  ;;  %s452_s18 = int_to_ptr.vmem [resolvable:$true] %s28_s18 }
   0x4   :  { %s348_s21 = scalar_lea.hbm %s550_s0, 128 }
   0x5   :  { %p349_p0 = scmp.ne.s32.totalorder %s550_s0, %s348_s21  ;;  %p352_p1 = scmp.lt.u32.totalorder %s348_s21, %s550_s0 }
   0x7   :  { %p354_p2 = pnand %p352_p1, %p349_p0 }
   0x9   :  { %357 = shalt.err (!%p354_p2)
}
   0xa   :  { %s358_s26 = scalar_lea.vmem %s20_s16, 128  ;;  %p363_p4 = scmp.lt.s32.totalorder %s20_s16, %s20_s16 }
   0xb   :  { %p359_p3 = scmp.ne.s32.totalorder %s20_s16, %s358_s26  ;;  %p364_p5 = scmp.lt.s32.totalorder %s358_s26, %s358_s26 }
   0xd   :  { %p365_p6 = por %p364_p5, %p363_p4 }
   0xf   :  { %p366_p7 = pnand %p365_p6, %p359_p3 }
  0x11   :  { %369 = shalt.err (!%p366_p7)
}
  0x12   :  { %22 = dma.hbm_to_vmem [thread:$0]  %s550_s0, 128, %s20_s16, [#allocation3]  }
  0x13   :  { %s370_s5 = scalar_lea.hbm %s551_s1, 1024 }
  0x14   :  { %p371_p8 = scmp.ne.s32.totalorder %s551_s1, %s370_s5  ;;  %p374_p9 = scmp.lt.u32.totalorder %s370_s5, %s551_s1 }
  0x16   :  { %p376_p10 = pnand %p374_p9, %p371_p8 }
  0x18   :  { %379 = shalt.err (!%p376_p10)
}
  0x19   :  { %s380_s10 = scalar_lea.vmem %s452_s18, 1024  ;;  %p385_p12 = scmp.lt.s32.totalorder %s452_s18, %s452_s18 }
  0x1a   :  { %p381_p11 = scmp.ne.s32.totalorder %s452_s18, %s380_s10  ;;  %p386_p13 = scmp.lt.s32.totalorder %s380_s10, %s380_s10 }
  0x1c   :  { %p387_p0 = por %p386_p13, %p385_p12 }
  0x1e   :  { %p388_p1 = pnand %p387_p0, %p381_p11 }
  0x20   :  { %391 = shalt.err (!%p388_p1)
}
  0x21   :  { %s422_s0 = smov 512   ;;  %s423_s11 = smov 32  }
  0x22   :  { %34 = dma.hbm_to_vmem [thread:$0]  %s551_s1, 1024, %s452_s18, [#allocation6], %s422_s0, %s422_s0, %s423_s11  }
  0x23   :  { %414 = dma.done.wait [#allocation3], 128  }
  0x24   :  { %415 = vsyncadd [#allocation3], 4294967168 }
  0x25   :  { %416 = dma.done.wait [#allocation6], 1024  }
  0x26   :  { %417 = vsyncadd [#allocation6], 4294966272  ;;  %v424_v0 = vmov 1983009808   ;;  %v56_v2 = vlaneseq  ;;  %v42_v5 = vld [vmem:[#allocation5] sm:$0xff]  ;;  %v43_v6 = vld [vmem:[#allocation5 + $0x8] sm:$0xff] }
  0x27   :  { %v54_v1 = vunpack.c.l.s4 %v424_v0  ;;  %v44_v7 = vld [vmem:[#allocation5 + $0x10] sm:$0xff]  ;;  %v45_v8 = vld [vmem:[#allocation5 + $0x18] sm:$0xff]  ;;  %v95_v9 = vmul.f32 %v42_v5, %v42_v5  ;;  %v96_v10 = vmul.f32 %v43_v6, %v43_v6  ;;  %v485_v12 = vld [vmem:[#allocation5 + $0x20] sm:$0x3]  ;;  %vm73_vm0 = vcmask 1041408  }
  0x28   :  { %v483_v4 = vshrl.u32 %v56_v2, 7  ;;  %v97_v11 = vmul.f32 %v44_v7, %v44_v7  ;;  %v47_v13 = vld [vmem:[#allocation5 + $0x28] sm:$0x3]  ;;  %v98_v14 = vmul.f32 %v45_v8, %v45_v8  ;;  %v48_v15 = vld [vmem:[#allocation5 + $0x30] sm:$0x3]  ;;  %v99_v17 = vmul.f32 %v485_v12, %v485_v12  ;;  %v489_v19 = vld [vmem:[#allocation2] sm:$0xff] }
  0x29   :  { %v55_v3 = vunpack.c.0.s8 %v54_v1  ;;  %v49_v16 = vld [vmem:[#allocation5 + $0x38] sm:$0x3]  ;;  %v100_v18 = vmul.f32 %v47_v13, %v47_v13  ;;  %v103_v21 = vadd.f32 %v96_v10, %v95_v9  ;;  %v101_v22 = vmul.f32 %v48_v15, %v48_v15 }
  0x2a   :  { %v102_v23 = vmul.f32 %v49_v16, %v49_v16  ;;  %v50_v24 = vmul.f32 %v489_v19, %v489_v19  ;;  %v108_v25 = vsel %vm73_vm0, %v99_v17, 0.0  ;;  %v425_v52 = vmov 269488144  }
  0x2b   :  { %v492_v20 = vsub.s32 %v55_v3, %v483_v4  ;;  %v109_v26 = vsel %vm73_vm0, %v100_v18, 0.0  ;;  %v104_v27 = vadd.f32 %v103_v21, %v97_v11  ;;  %v111_v29 = vsel %vm73_vm0, %v101_v22, 0.0 }
  0x2c   :  { %v110_v28 = vadd.f32 %v109_v26, %v108_v25  ;;  %v113_v30 = vsel %vm73_vm0, %v102_v23, 0.0  ;;  %v52_v31 = vcombine.high %v50_v24, %v50_v24  ;;  %v87_v53 = vunpack.c.l.s4 %v425_v52 }
  0x2d   :  { %v59_v32 = vrot.slane %v50_v24, %v492_v20  ;;  %v105_v33 = vadd.f32 %v104_v27, %v98_v14 }
  0x2e   :  { %v112_v34 = vadd.f32 %v111_v29, %v110_v28  ;;  %v66_v35 = vrot.slane %v52_v31, %v492_v20  ;;  %v88_v55 = vunpack.c.0.s8 %v87_v53 }
  0x2f   :  { %v67_v36 = vcombine.high %v59_v32, %v59_v32  ;;  %v74_v37 = vsel %vm73_vm0, %v59_v32, 0.0  ;;  %106 = vadd.xlane.f32.xlu0 %v105_v33 }
  0x30   :  { %v114_v38 = vadd.f32 %v113_v30, %v112_v34  ;;  %v68_v39 = vcombine.high %v66_v35, %v66_v35  ;;  %v77_v41 = vsel %vm73_vm0, %v66_v35, 0.0  ;;  %v91_v61 = vsub.s32 %v88_v55, %v483_v4 }
  0x31   :  { %v75_v40 = vsel %vm73_vm0, %v67_v36, 0.0 }
  0x32   :  { %v76_v42 = vadd.f32 %v75_v40, %v74_v37  ;;  %v79_v43 = vsel %vm73_vm0, %v68_v39, 0.0 }
  0x33   :  { %115 = vadd.xlane.f32.xlu0 %v114_v38 }
  0x34   :  { %v78_v44 = vadd.f32 %v77_v41, %v76_v42 }
  0x36   :  { %v80_v45 = vadd.f32 %v79_v43, %v78_v44 }
  0x38   :  { %81 = vadd.xlane.f32.xlu1 %v80_v45 }
  0xbc   :  { %v107_v46 = vpop.xlane.xlu0 %106 }
  0xbd   :  { %v117_v47 = vmax.f32 %v107_v46, 1e-12 }
  0xbf   :  { %342 = vrsqrt.f32 %v117_v47 }
  0xc0   :  { %v116_v48 = vpop.xlane.xlu0 %115 }
  0xc1   :  { %v118_v49 = vmax.f32 %v116_v48, 1e-12 }
  0xc3   :  { %344 = vrsqrt.f32 %v118_v49 }
  0xc5   :  { %v82_v50 = vpop.xlane.xlu1 %81 }
  0xc6   :  { %v83_v51 = vmax.f32 %v82_v50, 1e-12 }
  0xc8   :  { %346 = vrsqrt.f32 %v83_v51 }
  0xc9   :  { %v343_v54 = vpop.eup %342 }
  0xca   :  { %v122_v56 = vmul.f32 %v343_v54, %v43_v6  ;;  %v124_v57 = vmul.f32 %v343_v54, %v45_v8  ;;  %v121_v58 = vmul.f32 %v343_v54, %v42_v5  ;;  %v123_v59 = vmul.f32 %v343_v54, %v44_v7 }
  0xcc   :  { %131 = vst [vmem:[%s553_s3 + $0x8] sm:$0xff] %v122_v56  ;;  %133 = vst [vmem:[%s553_s3 + $0x18] sm:$0xff] %v124_v57 }
  0xcd   :  { %130 = vst [vmem:[%s553_s3] sm:$0xff] %v121_v58  ;;  %132 = vst [vmem:[%s553_s3 + $0x10] sm:$0xff] %v123_v59  ;;  %v345_v60 = vpop.eup %344 }
  0xce   :  { %v126_v62 = vmul.f32 %v345_v60, %v47_v13  ;;  %v128_v63 = vmul.f32 %v345_v60, %v49_v16  ;;  %v125_v0 = vmul.f32 %v345_v60, %v485_v12  ;;  %v127_v1 = vmul.f32 %v345_v60, %v48_v15 }
  0xd0   :  { %135 = vst [vmem:[%s553_s3 + $0x28] sm:$0x3] %v126_v62  ;;  %v326_v2 = vpack.c.bf16 %v126_v62, %v122_v56  ;;  %137 = vst [vmem:[%s553_s3 + $0x38] sm:$0x3] %v128_v63  ;;  %v330_v3 = vpack.c.bf16 %v128_v63, %v124_v57  ;;  %v328_v4 = vpack.c.bf16 %v125_v0, %v121_v58 }
  0xd1   :  { %134 = vst [vmem:[%s553_s3 + $0x20] sm:$0x3] %v125_v0  ;;  %136 = vst [vmem:[%s553_s3 + $0x30] sm:$0x3] %v127_v1  ;;  %v332_v5 = vpack.c.bf16 %v127_v1, %v123_v59  ;;  %s426_s3 = smov [#allocation7]  }
  0xd2   :  { %v347_v6 = vpop.eup %346  ;;  %327 = vmatprep.subr.bf16.mxu1 %v326_v2  ;;  %331 = vmatprep.subr.bf16.mxu0 %v330_v3  ;;  %s308_s29 = sshll.u32 %s426_s3, 4  ;;  %s309_s29 = int_to_ptr.vmem [resolvable:$true] %s308_s29 }
  0xd3   :  { %v92_v7 = vrot.slane %v347_v6, %v91_v61  ;;  %329 = vmatpush1.bf16.xpose.msra.mxu1 %v328_v4  ;;  %333 = vmatpush1.bf16.xpose.msra.mxu0 %v332_v5  ;;  %s392_s30 = scalar_lea.vmem %s309_s29, 128  ;;  %p397_p3 = scmp.lt.s32.totalorder %s309_s29, %s309_s29 }
  0xd4   :  { %p393_p2 = scmp.ne.s32.totalorder %s309_s29, %s392_s30  ;;  %p398_p4 = scmp.lt.s32.totalorder %s392_s30, %s392_s30 }
  0xd5   :  { %v94_v8 = vmul.f32 %v92_v7, %v489_v19 }
  0xd6   :  { %p399_p5 = por %p398_p4, %p397_p3 }
  0xd7   :  { %v146_v9 = vrot.slane %v94_v8, %v492_v20  ;;  %129 = vst [vmem:[#allocation7] sm:$0xff] %v94_v8  ;;  %v139_v10 = vcombine.high %v94_v8, %v94_v8 }
  0xd8   :  { %p400_p6 = pnand %p399_p5, %p393_p2 }
  0xd9   :  { %v154_v11 = vcombine.high %v146_v9, %v146_v9  ;;  %v153_v12 = vrot.slane %v139_v10, %v492_v20 }
  0xdb   :  { %224 = vmatprep.mubr.f32.mxu1 %v154_v11  ;;  %v155_v13 = vcombine.high %v153_v12, %v153_v12 }
  0xdc   :  { %225 = vmatmul.mubr.f32.vlgmr.msra.gmra.mrb[0].mxu1 %v146_v9 }
  0xdd   :  { %294 = vmatprep.mubr.f32.mxu0 %v155_v13 }
  0xde   :  { %295 = vmatmul.mubr.f32.vlgmr.msra.gmra.mrb[0].mxu0 %v153_v12 }
  0xdf   :  { %403 = shalt.err (!%p400_p6)
}
  0xe0   :  { %s404_s7 = scalar_lea.hbm %s552_s2, 128 }
  0xe1   :  { %p405_p7 = scmp.ne.s32.totalorder %s552_s2, %s404_s7  ;;  %p408_p8 = scmp.lt.u32.totalorder %s404_s7, %s552_s2 }
  0xe3   :  { %p410_p9 = pnand %p408_p8, %p405_p7 }
  0xe5   :  { %413 = shalt.err (!%p410_p9)
}
  0xe6   :  { %311 = dma.vmem_to_hbm [thread:$0]  %s309_s29, 128, %s552_s2, [#allocation4]   ;;  %vm300_vm1 = vcmask 74752  }
 0x1af   :  { %v226_v14 = vpop.f32.mrb[0].mxu1 }
 0x1b0   :  { %v228_v15 = vpop.f32.mrb[1].mxu1 }
 0x1b1   :  { %v296_v16 = vpop.f32.mrb[0].mxu0 }
 0x1b2   :  { %v297_v17 = vadd.f32 %v296_v16, %v226_v14  ;;  %v298_v18 = vpop.f32.mrb[1].mxu0 }
 0x1b4   :  { %301 = vst.msk [vmem:[%s554_s4] sm:$0x3] %vm300_vm1, %v297_v17 }
 0x1b5   :  { %418 = dma.done.wait [#allocation4], 128  }
 0x1b6   :  { %419 = vsyncadd [#allocation4], 4294967168 }
 0x1b7   :  { %323 = vsyncpa [#allocation3], 1 }
 0x1b8   :  { %324 = vsyncpa [#allocation6], 1 }
 0x1b9   :  { %325 = vsyncpa [#allocation4], 1 }

// kernel: prompt_forward.4
= control target key start
LH: loop header
LB: loop body
LE: loop exit
PB: predicated region body
PF: predicated region fallthrough
CT: control target
= control target key end

     0   :  { %s1545_s0 = inlined_call_operand.vmem [shape: s32[4], index: 0, kind: input, shape index: {}]   ;;  %s1546_s1 = inlined_call_operand.hbm [shape: f32[10,16,56,56], index: 1, kind: input, shape index: {}]   ;;  %s1547_s2 = inlined_call_operand.vmem [shape: f32[56,56], index: 2, kind: output, shape index: {}]  }
   0x1   :  { %s7_s11 = sshll.u32 %s1545_s0, 4  ;;  %s8_s11 = int_to_ptr.vmem [resolvable:$true] %s7_s11 }
   0x2   :  { %s751_s12 = scalar_lea.vmem %s8_s11, 16  ;;  %p756_p1 = scmp.lt.s32.totalorder %s8_s11, %s8_s11 }
   0x3   :  { %p752_p0 = scmp.ne.s32.totalorder %s8_s11, %s751_s12  ;;  %p757_p2 = scmp.lt.s32.totalorder %s751_s12, %s751_s12 }
   0x5   :  { %p758_p3 = por %p757_p2, %p756_p1 }
   0x7   :  { %p759_p4 = pnand %p758_p3, %p752_p0 }
   0x9   :  { %762 = shalt.err (!%p759_p4)  }
   0xa   :  { %s831_s13 = smov [#allocation3]  }
   0xb   :  { %10 = dma.vmem_to_smem %s8_s11, 16, %s831_s13, [#allocation2] }
   0xc   :  { %809 = dma.done.wait [#allocation2], 16 }
   0xd   :  { %810 = vsyncadd [#allocation2], 4294967280 }
   0xe   :  { %12 = sfence }
   0xf   :  { %13 = vsyncpa [#allocation5], 0 }
  0x10   :  { %15 = vsyncpa [#allocation5 + $0x1], 0  ;;  %s854_s14 = smov 0   ;;  %s856_s15 = smov 0  }
  0x11   :  { %s858_s0 = smov 0   ;;  %s860_s16 = smov 0  }
  0x12 LB: > { %s870_s17 = sadd.s32 4294967295, %s829_s16   ;;  %s872_s18 = sadd.s32 1, %s829_s16   ;;  %s829_s16 = sphi %s860_s16, %s1610_s16   ;;  %s825_s0 = sphi %s858_s0, %s1609_s0   ;;  %s821_s15 = sphi %s856_s15, %s1608_s15   ;;  %s817_s14 = sphi %s854_s14, %s1607_s14  }
  0x13   : > { %s25_s19 = sld [smem:[#allocation3 + %s829_s16]]  ;;  %p37_p5 = scmp.ne.s32.totalorder %s825_s0, %s821_s15 }
  0x14   : > { %s26_s20 = sld [smem:[#allocation3 + %s872_s18]]  ;;  %p38_p6 = scmp.eq.s32.totalorder %s829_s16, 0 }
  0x15   : > { %p43_p7 = scmp.ne.s32.totalorder %s821_s15, %s817_s14  ;;  %p44_p8 = scmp.eq.s32.totalorder %s870_s17, 0 }
  0x16   : > { %s30_s21 = sadd.s32 1, %s825_s0  ;;  %p39_p9 = por %p38_p6, %p37_p5 }
  0x17   : > { %p880_p10 = por %p44_p8, %p43_p7  ;;  %s88_s23 = sand.u32 1, %s825_s0  }
  0x18   : > { %p700_p11 = scmp.lt.s32.totalorder %s829_s16, 4  ;;  %s687_s25 = smul.u32 896, %s88_s23 }
  0x19   : > { %s1549_s22 = scalar_select %p880_p10, 1, 0 }
  0x1a   : > { %s27_s24 = ssub.s32 %s25_s19, %s26_s20  ;;  %p888_p13 = pnand %p700_p11, %p39_p9 }
  0x1b   : > { %p28_p12 = scmp.eq.s32.totalorder %s27_s24, 0  ;;  %s92_s3 = scalar_lea.vmem [#allocation4], %s687_s25 }
  0x1c   : > { %s690_s26 = scalar_select %p39_p9, [#allocation3], [#allocation6] }
  0x1d   : > { %s886_s27 = scalar_select %p28_p12, %s825_s0, %s30_s21  }
  0x1e   : > { %s691_s29 = scalar_select %p39_p9, %s829_s16, 0 }
  0x1f   : > { %s1612_s26 = smov (!%p700_p11, %s690_s26), [#allocation7]  ;;  %s100_s4 = sshll.u32 %s92_s3, 4  ;;  %s896_s4 = int_to_ptr.vmem [resolvable:$true] %s100_s4 }
  0x20   : > { %s1614_s29 = smov (!%p700_p11, %s691_s29), 0  ;;  %p682_p0 = scmp.ge.s32.totalorder %s829_s16, 1 }
  0x21   : > { %s93_s30 = sld [smem:[%s1612_s26 + %s1614_s29]]  ;;  %p108_p1 = scmp.lt.s32.totalorder %s829_s16, 5 }
  0x22   : > { %s903_s10 = scalar_lea.sflag [#allocation5], %s88_s23  ;;  %p765_p4 = pneg %p888_p13 }
  0x23   : > { %p892_p2 = pnand %p682_p0, %p108_p1  ;;  %s768_s14 = scalar_lea.hbm %s1546_s1, 143360 }
  0x27   : > { %s688_s6 = smul.u32 14336, %s93_s30 }
  0x29   : > { %s901_s9 = scalar_lea.hbm %s1546_s1, %s688_s6 }
  0x2a   : > { %s763_s11 = scalar_lea.hbm %s901_s9, 14336  ;;  %p769_p7 = scmp.lt.u32.totalorder %s901_s9, %s1546_s1 }
  0x2b   : > { %p764_p3 = scmp.ne.s32.totalorder %s901_s9, %s763_s11  ;;  %p770_p8 = scmp.lt.u32.totalorder %s768_s14, %s763_s11 }
  0x2c   : > { %p772_p11 = scmp.lt.u32.totalorder %s763_s11, %s901_s9 }
  0x2d   : > { %p766_p5 = pnand %p765_p4, %p764_p3  ;;  %p771_p9 = por %p770_p8, %p769_p7 }
  0x2f   : > { %p767_p6 = pneg %p766_p5  ;;  %p773_p12 = por %p772_p11, %p771_p9 }
  0x31   : > { %p774_p0 = pnand %p773_p12, %p767_p6 }
  0x33   : > { %777 = shalt.err (!%p774_p0)
}
  0x34   : > { %s778_s20 = scalar_lea.vmem %s896_s4, 14336  ;;  %s832_s21 = smov [#allocation4]  }
  0x35   : > { %p779_p1 = scmp.ne.s32.totalorder %s896_s4, %s778_s20  ;;  %s783_s23 = sshll.u32 %s832_s21, 4  ;;  %s784_s23 = int_to_ptr.vmem [resolvable:$false] %s783_s23 }
  0x36   : > { %s785_s24 = scalar_lea.vmem %s784_s23, 28672  ;;  %p786_p10 = scmp.lt.s32.totalorder %s896_s4, %s784_s23 }
  0x37   : > { %p781_p3 = pnand %p779_p1, %p765_p4  ;;  %p787_p7 = scmp.lt.s32.totalorder %s785_s24, %s778_s20 }
  0x39   : > { %p782_p5 = pneg %p781_p3  ;;  %p788_p8 = por %p787_p7, %p786_p10 }
  0x3b   : > { %p789_p9 = pnand %p788_p8, %p782_p5 }
  0x3d   : > { %792 = shalt.err (!%p789_p9)
}
  0x3e   : > { %s833_s25 = smov 128   ;;  %s834_s26 = smov 8  }
  0x3f   : > { %699 = dma.hbm_to_vmem [thread:$0]  (!%p888_p13), %s901_s9, 14336, %s896_s4, %s903_s10, %s833_s25, %s833_s25, %s834_s26  }
  0x40   : > { %112 = sbr.rel (%p892_p2) target bundleno = 203 (0xcb), region = 24 }
  0x47   : > { %s114_s29 = sand.u32 1, %s821_s15   ;;  %p1552_p10 = scmp.ne.s32.totalorder %s1549_s22, 0 }
  0x48   : > { %s689_s30 = smul.u32 896, %s114_s29  ;;  %s115_s3 = scalar_lea.sflag [#allocation5], %s114_s29 }
  0x4a   : > { %s934_s6 = scalar_lea.vmem [#allocation4], %s689_s30 }
  0x4b   : > { %812 = dma.done.wait (%p1552_p10), %s115_s3, 14336  }
  0x4c   : > { %814 = vsyncadd (%p1552_p10), %s115_s3, 4294952960  ;;  %v133_v0 = vld [vmem:[%s934_s6] sm:$0xff]  ;;  %vm357_vm0 = vcmask 457728   ;;  %v140_v2 = vld [vmem:[%s934_s6 + $0x38] sm:$0xff]  ;;  %p683_p13 = scmp.ne.s32.totalorder %s870_s17, 0 }
  0x4d   : > { %v245_v1 = vmul.f32 %v133_v0, %v133_v0  ;;  %v252_v3 = vmul.f32 %v140_v2, %v140_v2  ;;  %v147_v5 = vld [vmem:[%s934_s6 + $0x70] sm:$0xff]  ;;  %v154_v9 = vld [vmem:[%s934_s6 + $0xa8] sm:$0xff]  ;;  %v136_v15 = vld [vmem:[%s934_s6 + $0x18] sm:$0xff] }
  0x4e   : > { %v259_v6 = vmul.f32 %v147_v5, %v147_v5  ;;  %v134_v11 = vld [vmem:[%s934_s6 + $0x8] sm:$0xff]  ;;  %v135_v12 = vld [vmem:[%s934_s6 + $0x10] sm:$0xff]  ;;  %v266_v13 = vmul.f32 %v154_v9, %v154_v9  ;;  %v137_v16 = vld [vmem:[%s934_s6 + $0x20] sm:$0xff]  ;;  %v963_v31 = vmul.f32 %v136_v15, %v136_v15 }
  0x4f   : > { %v358_v4 = vsel %vm357_vm0, %v245_v1, 0.0  ;;  %v359_v7 = vsel %vm357_vm0, %v252_v3, 0.0  ;;  %v161_v17 = vld [vmem:[%s934_s6 + $0xe0] sm:$0xff]  ;;  %v138_v18 = vld [vmem:[%s934_s6 + $0x28] sm:$0xff]  ;;  %v139_v19 = vld [vmem:[%s934_s6 + $0x30] sm:$0xff]  ;;  %v246_v26 = vmul.f32 %v134_v11, %v134_v11  ;;  %v961_v30 = vmul.f32 %v135_v12, %v135_v12 }
  0x50   : > { %v360_v8 = vadd.f32 %v359_v7, %v358_v4  ;;  %v361_v10 = vsel %vm357_vm0, %v259_v6, 0.0  ;;  %v141_v20 = vld [vmem:[%s934_s6 + $0x40] sm:$0xff]  ;;  %v273_v21 = vmul.f32 %v161_v17, %v161_v17  ;;  %v363_v22 = vsel %vm357_vm0, %v266_v13, 0.0  ;;  %v142_v23 = vld [vmem:[%s934_s6 + $0x48] sm:$0xff]  ;;  %v143_v24 = vld [vmem:[%s934_s6 + $0x50] sm:$0xff] }
  0x51   : > { %v168_v25 = vld [vmem:[%s934_s6 + $0x118] sm:$0xff]  ;;  %v145_v29 = vld [vmem:[%s934_s6 + $0x60] sm:$0xff]  ;;  %v146_v34 = vld [vmem:[%s934_s6 + $0x68] sm:$0xff]  ;;  %v969_v37 = vmul.f32 %v137_v16, %v137_v16  ;;  %v971_v38 = vmul.f32 %v138_v18, %v138_v18  ;;  %v973_v39 = vmul.f32 %v139_v19, %v139_v19  ;;  %v253_v44 = vmul.f32 %v141_v20, %v141_v20 }
  0x52   : > { %v362_v14 = vadd.f32 %v361_v10, %v360_v8  ;;  %v144_v28 = vld [vmem:[%s934_s6 + $0x58] sm:$0xff]  ;;  %v280_v32 = vmul.f32 %v168_v25, %v168_v25  ;;  %v365_v33 = vsel %vm357_vm0, %v273_v21, 0.0  ;;  %v149_v36 = vld [vmem:[%s934_s6 + $0x80] sm:$0xff]  ;;  %v150_v41 = vld [vmem:[%s934_s6 + $0x88] sm:$0xff]  ;;  %v978_v45 = vmul.f32 %v142_v23, %v142_v23 }
  0x53   : > { %v148_v35 = vld [vmem:[%s934_s6 + $0x78] sm:$0xff]  ;;  %1553 = vst [vmem:[#allocation10_spill] sm:$0xff] %v973_v39  ;;  %v151_v42 = vld [vmem:[%s934_s6 + $0x90] sm:$0xff]  ;;  %v980_v46 = vmul.f32 %v143_v24, %v143_v24  ;;  %v153_v49 = vld [vmem:[%s934_s6 + $0xa0] sm:$0xff]  ;;  %v986_v51 = vmul.f32 %v144_v28, %v144_v28  ;;  %v989_v54 = vsel %vm357_vm0, %v246_v26, 0.0  ;;  %v994_v58 = vmul.f32 %v145_v29, %v145_v29 }
  0x54   : > { %v364_v27 = vadd.f32 %v363_v22, %v362_v14  ;;  %v175_v43 = vld [vmem:[%s934_s6 + $0x150] sm:$0xff]  ;;  %v367_v47 = vsel %vm357_vm0, %v280_v32, 0.0  ;;  %v152_v48 = vld [vmem:[%s934_s6 + $0x98] sm:$0xff]  ;;  %v157_v56 = vld [vmem:[%s934_s6 + $0xc0] sm:$0xff]  ;;  %v996_v59 = vmul.f32 %v146_v34, %v146_v34  ;;  %v998_v60 = vmul.f32 %v148_v35, %v148_v35 }
  0x55   : > { %v155_v50 = vld [vmem:[%s934_s6 + $0xb0] sm:$0xff]  ;;  %v287_v52 = vmul.f32 %v175_v43, %v175_v43  ;;  %v156_v55 = vld [vmem:[%s934_s6 + $0xb8] sm:$0xff]  ;;  %v182_v57 = vld [vmem:[%s934_s6 + $0x188] sm:$0xff]  ;;  %v1000_v61 = vmul.f32 %v149_v36, %v149_v36  ;;  %v1005_v1 = vmul.f32 %v150_v41, %v150_v41  ;;  %v1007_v2 = vmul.f32 %v151_v42, %v151_v42 }
  0x56   : > { %v366_v40 = vadd.f32 %v365_v33, %v364_v27  ;;  %1554 = vst [vmem:[#allocation11_spill] sm:$0xff] %v996_v59  ;;  %v158_v62 = vld [vmem:[%s934_s6 + $0xc8] sm:$0xff]  ;;  %v159_v63 = vld [vmem:[%s934_s6 + $0xd0] sm:$0xff]  ;;  %v160_v0 = vld [vmem:[%s934_s6 + $0xd8] sm:$0xff]  ;;  %v294_v3 = vmul.f32 %v182_v57, %v182_v57  ;;  %v1013_v8 = vmul.f32 %v152_v48, %v152_v48  ;;  %v1015_v9 = vmul.f32 %v153_v49, %v153_v49 }
  0x57   : > { %v369_v4 = vsel %vm357_vm0, %v287_v52, 0.0  ;;  %v162_v5 = vld [vmem:[%s934_s6 + $0xe8] sm:$0xff]  ;;  %v163_v6 = vld [vmem:[%s934_s6 + $0xf0] sm:$0xff]  ;;  %v189_v7 = vld [vmem:[%s934_s6 + $0x1c0] sm:$0xff]  ;;  %v1017_v10 = vmul.f32 %v155_v50, %v155_v50  ;;  %v1022_v15 = vmul.f32 %v156_v55, %v156_v55  ;;  %v1024_v16 = vmul.f32 %v157_v56, %v157_v56 }
  0x58   : > { %v368_v53 = vadd.f32 %v367_v47, %v366_v40  ;;  %1555 = vst [vmem:[#allocation12_spill] sm:$0xff] %v1015_v9  ;;  %v164_v12 = vld [vmem:[%s934_s6 + $0xf8] sm:$0xff]  ;;  %v165_v13 = vld [vmem:[%s934_s6 + $0x100] sm:$0xff]  ;;  %v166_v14 = vld [vmem:[%s934_s6 + $0x108] sm:$0xff]  ;;  %v301_v17 = vmul.f32 %v189_v7, %v189_v7  ;;  %v371_v18 = vsel %vm357_vm0, %v294_v3, 0.0  ;;  %v1030_v22 = vmul.f32 %v158_v62, %v158_v62 }
  0x59   : > { %v167_v19 = vld [vmem:[%s934_s6 + $0x110] sm:$0xff]  ;;  %v169_v20 = vld [vmem:[%s934_s6 + $0x120] sm:$0xff]  ;;  %v170_v21 = vld [vmem:[%s934_s6 + $0x128] sm:$0xff]  ;;  %v1032_v23 = vmul.f32 %v159_v63, %v159_v63  ;;  %v390_v25 = vsel %vm357_vm0, %v253_v44, 0.0  ;;  %v1038_v29 = vmul.f32 %v160_v0, %v160_v0  ;;  %v1040_v32 = vmul.f32 %v162_v5, %v162_v5 }
  0x5a   : > { %v370_v11 = vadd.f32 %v369_v4, %v368_v53  ;;  %v171_v26 = vld [vmem:[%s934_s6 + $0x130] sm:$0xff]  ;;  %v172_v27 = vld [vmem:[%s934_s6 + $0x138] sm:$0xff]  ;;  %v1042_v33 = vmul.f32 %v163_v6, %v163_v6  ;;  %v373_v34 = vsel %vm357_vm0, %v301_v17, 0.0  ;;  %v173_v35 = vld [vmem:[%s934_s6 + $0x140] sm:$0xff]  ;;  %v1048_v41 = vmul.f32 %v164_v12, %v164_v12 }
  0x5b   : > { %1556 = vst [vmem:[#allocation13_spill] sm:$0xff] %v1032_v23  ;;  %v196_v28 = vld [vmem:[%s934_s6 + $0x1f8] sm:$0xff]  ;;  %1557 = vst [vmem:[#allocation14_spill] sm:$0xff] %v1038_v29  ;;  %v174_v36 = vld [vmem:[%s934_s6 + $0x148] sm:$0xff]  ;;  %v1050_v42 = vmul.f32 %v165_v13, %v165_v13  ;;  %v1055_v50 = vmul.f32 %v166_v14, %v166_v14  ;;  %v1057_v52 = vmul.f32 %v167_v19, %v167_v19 }
  0x5c   : > { %v372_v24 = vadd.f32 %v371_v18, %v370_v11  ;;  %v176_v40 = vld [vmem:[%s934_s6 + $0x158] sm:$0xff]  ;;  %v308_v43 = vmul.f32 %v196_v28, %v196_v28  ;;  %v177_v47 = vld [vmem:[%s934_s6 + $0x160] sm:$0xff]  ;;  %v178_v48 = vld [vmem:[%s934_s6 + $0x168] sm:$0xff]  ;;  %v1059_v53 = vmul.f32 %v169_v20, %v169_v20  ;;  %v1061_v55 = vmul.f32 %v170_v21, %v170_v21 }
  0x5d   : > { %v203_v49 = vld [vmem:[%s934_s6 + $0x230] sm:$0xff]  ;;  %1558 = vst [vmem:[#allocation15_spill] sm:$0xff] %v1055_v50  ;;  %1559 = vst [vmem:[#allocation16_spill] sm:$0xff] %v1057_v52  ;;  %v180_v57 = vld [vmem:[%s934_s6 + $0x178] sm:$0xff]  ;;  %v1066_v63 = vmul.f32 %v171_v26, %v171_v26  ;;  %v1068_v0 = vmul.f32 %v172_v27, %v172_v27  ;;  %v1074_v11 = vmul.f32 %v173_v35, %v173_v35 }
  0x5e   : > { %v374_v44 = vadd.f32 %v373_v34, %v372_v24  ;;  %v179_v56 = vld [vmem:[%s934_s6 + $0x170] sm:$0xff]  ;;  %v181_v62 = vld [vmem:[%s934_s6 + $0x180] sm:$0xff]  ;;  %v315_v3 = vmul.f32 %v203_v49, %v203_v49  ;;  %v375_v4 = vsel %vm357_vm0, %v308_v43, 0.0  ;;  %v184_v6 = vld [vmem:[%s934_s6 + $0x198] sm:$0xff]  ;;  %v1076_v12 = vmul.f32 %v174_v36, %v174_v36 }
  0x5f   : > { %v183_v5 = vld [vmem:[%s934_s6 + $0x190] sm:$0xff]  ;;  %v210_v7 = vld [vmem:[%s934_s6 + $0x268] sm:$0xff]  ;;  %1560 = vst [vmem:[#allocation17_spill] sm:$0xff] %v1074_v11  ;;  %v1078_v13 = vmul.f32 %v176_v40, %v176_v40  ;;  %v185_v17 = vld [vmem:[%s934_s6 + $0x1a0] sm:$0xff]  ;;  %v1083_v20 = vmul.f32 %v177_v47, %v177_v47  ;;  %v1085_v21 = vmul.f32 %v178_v48, %v178_v48  ;;  %v1091_v35 = vmul.f32 %v179_v56, %v179_v56 }
  0x60   : > { %1561 = vst [vmem:[#allocation18_spill] sm:$0xff] %v1076_v12  ;;  %v376_v14 = vadd.f32 %v375_v4, %v374_v44  ;;  %v186_v18 = vld [vmem:[%s934_s6 + $0x1a8] sm:$0xff]  ;;  %v187_v19 = vld [vmem:[%s934_s6 + $0x1b0] sm:$0xff]  ;;  %v322_v24 = vmul.f32 %v210_v7, %v210_v7  ;;  %v377_v26 = vsel %vm357_vm0, %v315_v3, 0.0  ;;  %v188_v27 = vld [vmem:[%s934_s6 + $0x1b8] sm:$0xff]  ;;  %v1093_v36 = vmul.f32 %v180_v57, %v180_v57 }
  0x61   : > { %v190_v28 = vld [vmem:[%s934_s6 + $0x1c8] sm:$0xff]  ;;  %v191_v34 = vld [vmem:[%s934_s6 + $0x1d0] sm:$0xff]  ;;  %v391_v43 = vadd.f32 %v390_v25, %v989_v54  ;;  %v192_v44 = vld [vmem:[%s934_s6 + $0x1d8] sm:$0xff]  ;;  %v1098_v48 = vmul.f32 %v181_v62, %v181_v62  ;;  %v1100_v49 = vmul.f32 %v183_v5, %v183_v5  ;;  %v1102_v3 = vmul.f32 %v184_v6, %v184_v6 }
  0x62   : > { %1562 = vst [vmem:[#allocation19_spill] sm:$0xff] %v1093_v36  ;;  %v378_v40 = vadd.f32 %v377_v26, %v376_v14  ;;  %v217_v47 = vld [vmem:[%s934_s6 + $0x2a0] sm:$0xff]  ;;  %v379_v56 = vsel %vm357_vm0, %v322_v24, 0.0  ;;  %v194_v4 = vld [vmem:[%s934_s6 + $0x1e8] sm:$0xff]  ;;  %v1108_v14 = vmul.f32 %v185_v17, %v185_v17  ;;  %v1110_v54 = vmul.f32 %v186_v18, %v186_v18  ;;  %v199_v6 = vld [vmem:[%s934_s6 + $0x210] sm:$0xff] }
  0x63   : > { %1563 = vst [vmem:[#allocation20_spill] sm:$0xff] %v1098_v48  ;;  %v193_v57 = vld [vmem:[%s934_s6 + $0x1e0] sm:$0xff]  ;;  %v329_v25 = vmul.f32 %v217_v47, %v217_v47  ;;  %v198_v5 = vld [vmem:[%s934_s6 + $0x208] sm:$0xff]  ;;  %v224_v26 = vld [vmem:[%s934_s6 + $0x2d8] sm:$0xff]  ;;  %v1115_v48 = vmul.f32 %v187_v19, %v187_v19  ;;  %v1117_v24 = vmul.f32 %v188_v27, %v188_v27  ;;  %v1119_v12 = vmul.f32 %v190_v28, %v190_v28 }
  0x64   : > { %v197_v7 = vld [vmem:[%s934_s6 + $0x200] sm:$0xff]  ;;  %1564 = vst [vmem:[#allocation21_spill] sm:$0xff] %v1110_v54  ;;  %v380_v62 = vadd.f32 %v379_v56, %v378_v40  ;;  %v1121_v52 = vmul.f32 %v191_v34, %v191_v34  ;;  %v200_v17 = vld [vmem:[%s934_s6 + $0x218] sm:$0xff]  ;;  %v1126_v29 = vmul.f32 %v192_v44, %v192_v44  ;;  %v336_v40 = vmul.f32 %v224_v26, %v224_v26  ;;  %v206_v28 = vld [vmem:[%s934_s6 + $0x248] sm:$0xff] }
  0x65   : > { %1565 = vst [vmem:[#allocation22_spill] sm:$0xff] %v1115_v48  ;;  %1566 = vst [vmem:[#allocation23_spill] sm:$0xff] %v1117_v24  ;;  %v201_v18 = vld [vmem:[%s934_s6 + $0x220] sm:$0xff]  ;;  %v204_v47 = vld [vmem:[%s934_s6 + $0x238] sm:$0xff]  ;;  %v381_v56 = vsel %vm357_vm0, %v329_v25, 0.0  ;;  %v392_v19 = vsel %vm357_vm0, %v998_v60, 0.0  ;;  %v1134_v34 = vmul.f32 %v193_v57, %v193_v57  ;;  %v1136_v48 = vmul.f32 %v194_v4, %v194_v4 }
  0x66   : > { %v205_v27 = vld [vmem:[%s934_s6 + $0x240] sm:$0xff]  ;;  %v231_v24 = vld [vmem:[%s934_s6 + $0x310] sm:$0xff]  ;;  %v1138_v9 = vmul.f32 %v197_v7, %v197_v7  ;;  %v382_v44 = vadd.f32 %v381_v56, %v380_v62  ;;  %v208_v59 = vld [vmem:[%s934_s6 + $0x258] sm:$0xff]  ;;  %v1142_v25 = vmul.f32 %v198_v5, %v198_v5  ;;  %v1144_v39 = vmul.f32 %v199_v6, %v199_v6 }
  0x67   : > { %1567 = vst [vmem:[#allocation24_spill] sm:$0xff] %v1134_v34  ;;  %1568 = vst [vmem:[#allocation25_spill] sm:$0xff] %v1136_v48  ;;  %v207_v26 = vld [vmem:[%s934_s6 + $0x250] sm:$0xff]  ;;  %v343_v60 = vmul.f32 %v231_v24, %v231_v24  ;;  %v383_v36 = vsel %vm357_vm0, %v336_v40, 0.0  ;;  %v212_v11 = vld [vmem:[%s934_s6 + $0x278] sm:$0xff]  ;;  %v1150_v48 = vmul.f32 %v200_v17, %v200_v17  ;;  %v1152_v7 = vmul.f32 %v201_v18, %v201_v18 }
  0x68   : > { %v211_v57 = vld [vmem:[%s934_s6 + $0x270] sm:$0xff]  ;;  %v213_v4 = vld [vmem:[%s934_s6 + $0x280] sm:$0xff]  ;;  %v384_v62 = vadd.f32 %v383_v36, %v382_v44  ;;  %v393_v5 = vadd.f32 %v392_v19, %v391_v43  ;;  %v214_v56 = vld [vmem:[%s934_s6 + $0x288] sm:$0xff]  ;;  %v1156_v50 = vmul.f32 %v204_v47, %v204_v47  ;;  %v1158_v24 = vmul.f32 %v205_v27, %v205_v27 }
  0x69   : > { %1569 = vst [vmem:[#allocation26_spill] sm:$0xff] %v1150_v48  ;;  %1570 = vst [vmem:[#allocation27_spill] sm:$0xff] %v1152_v7  ;;  %v238_v6 = vld [vmem:[%s934_s6 + $0x348] sm:$0xff]  ;;  %v1160_v40 = vmul.f32 %v206_v28, %v206_v28  ;;  %v385_v17 = vsel %vm357_vm0, %v343_v60, 0.0  ;;  %v215_v48 = vld [vmem:[%s934_s6 + $0x290] sm:$0xff]  ;;  %v1165_v7 = vmul.f32 %v207_v26, %v207_v26  ;;  %v1167_v36 = vmul.f32 %v208_v59, %v208_v59 }
  0x6a   : > { %v218_v18 = vld [vmem:[%s934_s6 + $0x2a8] sm:$0xff]  ;;  %v350_v43 = vmul.f32 %v238_v6, %v238_v6  ;;  %v386_v19 = vadd.f32 %v385_v17, %v384_v62  ;;  %v219_v47 = vld [vmem:[%s934_s6 + $0x2b0] sm:$0xff]  ;;  %v220_v44 = vld [vmem:[%s934_s6 + $0x2b8] sm:$0xff]  ;;  %v323_v34 = vmul.f32 %v211_v57, %v211_v57  ;;  %v1172_v28 = vmul.f32 %v212_v11, %v212_v11 }
  0x6b   : > { %1571 = vst [vmem:[#allocation28_spill] sm:$0xff] %v1165_v7  ;;  %1572 = vst [vmem:[#allocation29_spill] sm:$0xff] %v1167_v36  ;;  %v221_v27 = vld [vmem:[%s934_s6 + $0x2c0] sm:$0xff]  ;;  %v1174_v23 = vmul.f32 %v213_v4, %v213_v4  ;;  %v394_v60 = vsel %vm357_vm0, %v1017_v10, 0.0  ;;  %v226_v26 = vld [vmem:[%s934_s6 + $0x2e8] sm:$0xff]  ;;  %v1181_v6 = vmul.f32 %v214_v56, %v214_v56  ;;  %v396_v57 = vsel %vm357_vm0, %v1040_v32, 0.0 }
  0x6c   : > { %v225_v54 = vld [vmem:[%s934_s6 + $0x2e0] sm:$0xff]  ;;  %v227_v59 = vld [vmem:[%s934_s6 + $0x2f0] sm:$0xff]  ;;  %v387_v62 = vsel %vm357_vm0, %v350_v43, 0.0  ;;  %v395_v17 = vadd.f32 %v394_v60, %v393_v5  ;;  %v228_v11 = vld [vmem:[%s934_s6 + $0x2f8] sm:$0xff]  ;;  %v1187_v4 = vmul.f32 %v215_v48, %v215_v48  ;;  %v330_v36 = vmul.f32 %v218_v18, %v218_v18 }
  0x6d   : > { %1573 = vst [vmem:[#allocation30_spill] sm:$0xff] %v1174_v23  ;;  %1574 = vst [vmem:[#allocation31_spill] sm:$0xff] %v1181_v6  ;;  %v1189_v10 = vadd.f32 %v387_v62, %v386_v19  ;;  %v398_v7 = vsel %vm357_vm0, %v1059_v53, 0.0  ;;  %v232_v23 = vld [vmem:[%s934_s6 + $0x318] sm:$0xff]  ;;  %v1194_v56 = vmul.f32 %v219_v47, %v219_v47  ;;  %v1196_v43 = vmul.f32 %v220_v44, %v220_v44  ;;  %v233_v60 = vld [vmem:[%s934_s6 + $0x320] sm:$0xff] }
  0x6e   : > { %1575 = vst [vmem:[#allocation32_spill] sm:$0xff] %v1187_v4  ;;  %v1198_v5 = vmul.f32 %v221_v27, %v221_v27  ;;  %v397_v32 = vadd.f32 %v396_v57, %v395_v17  ;;  %v234_v48 = vld [vmem:[%s934_s6 + $0x328] sm:$0xff]  ;;  %v337_v4 = vmul.f32 %v225_v54, %v225_v54  ;;  %v1202_v6 = vmul.f32 %v226_v26, %v226_v26  ;;  %v235_v19 = vld [vmem:[%s934_s6 + $0x330] sm:$0xff]  ;;  %v240_v57 = vld [vmem:[%s934_s6 + $0x358] sm:$0xff] }
  0x6f   : > { %1576 = vst [vmem:[#allocation33_spill] sm:$0xff] %v1189_v10  ;;  %v1204_v18 = vmul.f32 %v227_v59, %v227_v59  ;;  %v400_v53 = vsel %vm357_vm0, %v1078_v13, 0.0  ;;  %v239_v47 = vld [vmem:[%s934_s6 + $0x350] sm:$0xff]  ;;  %v1210_v62 = vmul.f32 %v228_v11, %v228_v11  ;;  %v420_v27 = vsel %vm357_vm0, %v961_v30, 0.0  ;;  %v241_v54 = vld [vmem:[%s934_s6 + $0x360] sm:$0xff] }
  0x70   : > { %1577 = vst [vmem:[#allocation34_spill] sm:$0xff] %v1198_v5  ;;  %v399_v44 = vadd.f32 %v398_v7, %v397_v32  ;;  %v421_v17 = vsel %vm357_vm0, %v978_v45, 0.0  ;;  %v344_v26 = vmul.f32 %v232_v23, %v232_v23  ;;  %v402_v59 = vsel %vm357_vm0, %v1100_v49, 0.0 }
  0x71   : > { %1578 = vst [vmem:[#allocation35_spill] sm:$0xff] %v1204_v18  ;;  %1579 = vst [vmem:[#allocation36_spill] sm:$0xff] %v1210_v62  ;;  %v422_v10 = vadd.f32 %v421_v17, %v420_v27  ;;  %v423_v13 = vsel %vm357_vm0, %v1000_v61, 0.0  ;;  %v345_v5 = vmul.f32 %v233_v60, %v233_v60  ;;  %v1222_v11 = vmul.f32 %v234_v48, %v234_v48 }
  0x72   : > { %v401_v7 = vadd.f32 %v400_v53, %v399_v44  ;;  %v425_v30 = vsel %vm357_vm0, %v1022_v15, 0.0  ;;  %v1226_v32 = vmul.f32 %v235_v19, %v235_v19  ;;  %v351_v45 = vmul.f32 %v239_v47, %v239_v47 }
  0x73   : > { %v404_v23 = vsel %vm357_vm0, %v1119_v12, 0.0  ;;  %v424_v62 = vadd.f32 %v423_v13, %v422_v10  ;;  %v1230_v18 = vmul.f32 %v240_v57, %v240_v57  ;;  %v1232_v49 = vmul.f32 %v241_v54, %v241_v54 }
  0x74   : > { %v403_v27 = vadd.f32 %v402_v59, %v401_v7  ;;  %v427_v61 = vsel %vm357_vm0, %v1042_v33, 0.0  ;;  %v406_v60 = vsel %vm357_vm0, %v1138_v9, 0.0  ;;  %v408_v15 = vsel %vm357_vm0, %v1156_v50, 0.0 }
  0x75   : > { %v426_v48 = vadd.f32 %v425_v30, %v424_v62  ;;  %v451_v53 = vsel %vm357_vm0, %v963_v31, 0.0  ;;  %v429_v10 = vsel %vm357_vm0, %v1061_v55, 0.0  ;;  %v452_v19 = vsel %vm357_vm0, %v980_v46, 0.0 }
  0x76   : > { %v405_v12 = vadd.f32 %v404_v23, %v403_v27  ;;  %v454_v33 = vsel %vm357_vm0, %v1005_v1, 0.0  ;;  %v410_v47 = vsel %vm357_vm0, %v323_v34, 0.0  ;;  %v412_v9 = vsel %vm357_vm0, %v330_v36, 0.0 }
  0x77   : > { %v428_v44 = vadd.f32 %v427_v61, %v426_v48  ;;  %v453_v50 = vadd.f32 %v452_v19, %v451_v53  ;;  %v414_v17 = vsel %vm357_vm0, %v337_v4, 0.0  ;;  %v431_v31 = vsel %vm357_vm0, %v1083_v20, 0.0 }
  0x78   : > { %v407_v62 = vadd.f32 %v406_v60, %v405_v12  ;;  %v456_v55 = vsel %vm357_vm0, %v1024_v16, 0.0  ;;  %v416_v46 = vsel %vm357_vm0, %v344_v26, 0.0  ;;  %v418_v57 = vsel %vm357_vm0, %v351_v45, 0.0 }
  0x79   : > { %v430_v1 = vadd.f32 %v429_v10, %v428_v44  ;;  %v455_v54 = vadd.f32 %v454_v33, %v453_v50  ;;  %v433_v36 = vsel %vm357_vm0, %v1102_v3, 0.0  ;;  %v435_v59 = vsel %vm357_vm0, %v1121_v52, 0.0 }
  0x7a   : > { %v409_v34 = vadd.f32 %v408_v15, %v407_v62  ;;  %v458_v4 = vsel %vm357_vm0, %v1048_v41, 0.0  ;;  %v437_v16 = vsel %vm357_vm0, %v1142_v25, 0.0  ;;  %v460_v26 = vsel %vm357_vm0, %v1066_v63, 0.0 }
  0x7b   : > { %v432_v20 = vadd.f32 %v431_v31, %v430_v1  ;;  %v457_v13 = vadd.f32 %v456_v55, %v455_v54  ;;  %v482_v30 = vsel %vm357_vm0, %v969_v37, 0.0  ;;  %v483_v3 = vsel %vm357_vm0, %v986_v51, 0.0  ;;  %v1580_v55 = vld [vmem:[#allocation21_spill] sm:$0xff] }
  0x7c   : > { %v411_v7 = vadd.f32 %v410_v47, %v409_v34  ;;  %v485_v52 = vsel %vm357_vm0, %v1007_v2, 0.0  ;;  %v439_v41 = vsel %vm357_vm0, %v1158_v24, 0.0  ;;  %v484_v25 = vadd.f32 %v483_v3, %v482_v30  ;;  %v1582_v34 = vld [vmem:[#allocation30_spill] sm:$0xff]  ;;  %v1585_v30 = vld [vmem:[#allocation35_spill] sm:$0xff] }
  0x7d   : > { %v434_v45 = vadd.f32 %v433_v36, %v432_v20  ;;  %v459_v23 = vadd.f32 %v458_v4, %v457_v13  ;;  %v441_v63 = vsel %vm357_vm0, %v1172_v28, 0.0  ;;  %v462_v61 = vsel %vm357_vm0, %v1085_v21, 0.0 }
  0x7e   : > { %v413_v27 = vadd.f32 %v412_v9, %v411_v7  ;;  %v487_v37 = vsel %vm357_vm0, %v1030_v22, 0.0  ;;  %v443_v2 = vsel %vm357_vm0, %v1194_v56, 0.0  ;;  %v486_v15 = vadd.f32 %v485_v52, %v484_v25  ;;  %v1586_v52 = vld [vmem:[#allocation26_spill] sm:$0xff] }
  0x7f   : > { %v436_v51 = vadd.f32 %v435_v59, %v434_v45  ;;  %v461_v60 = vadd.f32 %v460_v26, %v459_v23  ;;  %v445_v24 = vsel %vm357_vm0, %v1202_v6, 0.0  ;;  %v464_v53 = vsel %vm357_vm0, %v1108_v14, 0.0 }
  0x80   : > { %v415_v48 = vadd.f32 %v414_v17, %v413_v27  ;;  %v489_v28 = vsel %vm357_vm0, %v1050_v42, 0.0  ;;  %v447_v12 = vsel %vm357_vm0, %v345_v5, 0.0  ;;  %v488_v10 = vadd.f32 %v487_v37, %v486_v15 }
  0x81   : > { %v438_v21 = vadd.f32 %v437_v16, %v436_v51  ;;  %v463_v22 = vadd.f32 %v462_v61, %v461_v60  ;;  %v466_v56 = vsel %vm357_vm0, %v1126_v29, 0.0  ;;  %v468_v33 = vsel %vm357_vm0, %v1144_v39, 0.0  ;;  %v1589_v51 = vld [vmem:[#allocation19_spill] sm:$0xff]  ;;  %v1590_v60 = vld [vmem:[#allocation10_spill] sm:$0xff] }
  0x82   : > { %v417_v19 = vadd.f32 %v416_v46, %v415_v48  ;;  %v491_v6 = vsel %vm357_vm0, %v1068_v0, 0.0  ;;  %v490_v9 = vadd.f32 %v489_v28, %v488_v10  ;;  %v493_v42 = vsel %vm357_vm0, %v1091_v35, 0.0  ;;  %v1591_v48 = vld [vmem:[#allocation11_spill] sm:$0xff] }
  0x83   : > { %v440_v47 = vadd.f32 %v439_v41, %v438_v21  ;;  %v465_v14 = vadd.f32 %v464_v53, %v463_v22  ;;  %v513_v5 = vsel %vm357_vm0, %v971_v38, 0.0  ;;  %v514_v29 = vsel %vm357_vm0, %v994_v58, 0.0  ;;  %v1581_v38 = vld [vmem:[#allocation13_spill] sm:$0xff]  ;;  %v1587_v41 = vld [vmem:[#allocation28_spill] sm:$0xff] }
  0x84   : > { %v1298_v44 = vadd.f32 %v418_v57, %v417_v19  ;;  %v516_v39 = vsel %vm357_vm0, %v1013_v8, 0.0  ;;  %v492_v0 = vadd.f32 %v491_v6, %v490_v9  ;;  %v515_v17 = vadd.f32 %v514_v29, %v513_v5  ;;  %v1592_v53 = vld [vmem:[#allocation12_spill] sm:$0xff]  ;;  %v1594_v6 = vld [vmem:[#allocation22_spill] sm:$0xff]  ;;  %v242_v9 = vld [vmem:[%s934_s6 + $0x368] sm:$0xff] }
  0x85   : > { %v442_v50 = vadd.f32 %v441_v63, %v440_v47  ;;  %v467_v62 = vadd.f32 %v466_v56, %v465_v14  ;;  %v449_v31 = vsel %vm357_vm0, %v1230_v18, 0.0  ;;  %v470_v35 = vsel %vm357_vm0, %v1160_v40, 0.0  ;;  %v1583_v18 = vld [vmem:[#allocation24_spill] sm:$0xff]  ;;  %v1584_v40 = vld [vmem:[#allocation15_spill] sm:$0xff] }
  0x86   : > { %v495_v46 = vsel %vm357_vm0, %v1580_v55, 0.0  ;;  %v518_v57 = vsel %vm357_vm0, %v1581_v38, 0.0  ;;  %v494_v54 = vadd.f32 %v493_v42, %v492_v0  ;;  %v517_v8 = vadd.f32 %v516_v39, %v515_v17  ;;  %v1593_v56 = vld [vmem:[#allocation31_spill] sm:$0xff]  ;;  %v1595_v39 = vld [vmem:[#allocation14_spill] sm:$0xff]  ;;  %v1597_v17 = vld [vmem:[#allocation25_spill] sm:$0xff] }
  0x87   : > { %v444_v58 = vadd.f32 %v443_v2, %v442_v50  ;;  %v469_v1 = vadd.f32 %v468_v33, %v467_v62  ;;  %v472_v36 = vsel %vm357_vm0, %v1582_v34, 0.0  ;;  %v474_v59 = vsel %vm357_vm0, %v1196_v43, 0.0  ;;  %v1588_v43 = vld [vmem:[#allocation17_spill] sm:$0xff]  ;;  %v222_v55 = vld [vmem:[%s934_s6 + $0x2c8] sm:$0xff]  ;;  %v1599_v34 = vld [vmem:[#allocation36_spill] sm:$0xff] }
  0x88   : > { %v497_v4 = vsel %vm357_vm0, %v1583_v18, 0.0  ;;  %v520_v20 = vsel %vm357_vm0, %v1584_v40, 0.0  ;;  %v496_v26 = vadd.f32 %v495_v46, %v494_v54  ;;  %v519_v7 = vadd.f32 %v518_v57, %v517_v8  ;;  %v195_v54 = vld [vmem:[%s934_s6 + $0x1f0] sm:$0xff] }
  0x89   : > { %v446_v16 = vadd.f32 %v445_v24, %v444_v58  ;;  %v471_v13 = vadd.f32 %v470_v35, %v469_v1  ;;  %v476_v3 = vsel %vm357_vm0, %v1585_v30, 0.0  ;;  %v499_v45 = vsel %vm357_vm0, %v1586_v52, 0.0  ;;  %v1598_v58 = vld [vmem:[#allocation16_spill] sm:$0xff]  ;;  %v1602_v52 = vld [vmem:[#allocation29_spill] sm:$0xff] }
  0x8a   : > { %v501_v23 = vsel %vm357_vm0, %v1587_v41, 0.0  ;;  %v522_v25 = vsel %vm357_vm0, %v1588_v43, 0.0  ;;  %v498_v61 = vadd.f32 %v497_v4, %v496_v26  ;;  %v521_v37 = vadd.f32 %v520_v20, %v519_v7  ;;  %v229_v4 = vld [vmem:[%s934_s6 + $0x300] sm:$0xff]  ;;  %v202_v7 = vld [vmem:[%s934_s6 + $0x228] sm:$0xff] }
  0x8b   : > { %v448_v27 = vadd.f32 %v447_v12, %v446_v16  ;;  %v473_v63 = vadd.f32 %v472_v36, %v471_v13  ;;  %v524_v2 = vsel %vm357_vm0, %v1589_v51, 0.0  ;;  %v544_v15 = vsel %vm357_vm0, %v1590_v60, 0.0  ;;  %v1600_v36 = vld [vmem:[#allocation27_spill] sm:$0xff]  ;;  %v1601_v13 = vld [vmem:[#allocation18_spill] sm:$0xff]  ;;  %v1604_v60 = vld [vmem:[#allocation32_spill] sm:$0xff] }
  0x8c   : > { %v545_v24 = vsel %vm357_vm0, %v1591_v48, 0.0  ;;  %v547_v28 = vsel %vm357_vm0, %v1592_v53, 0.0  ;;  %v500_v12 = vadd.f32 %v499_v45, %v498_v61  ;;  %v523_v10 = vadd.f32 %v522_v25, %v521_v37  ;;  %v209_v37 = vld [vmem:[%s934_s6 + $0x260] sm:$0xff]  ;;  %v243_v48 = vld [vmem:[%s934_s6 + $0x370] sm:$0xff] }
  0x8d   : > { %v1338_v21 = vadd.f32 %v449_v31, %v448_v27  ;;  %v475_v22 = vadd.f32 %v474_v59, %v473_v63  ;;  %v478_v19 = vsel %vm357_vm0, %v1222_v11, 0.0  ;;  %v503_v33 = vsel %vm357_vm0, %v1593_v56, 0.0  ;;  %v1596_v11 = vld [vmem:[#allocation34_spill] sm:$0xff]  ;;  %v1603_v63 = vld [vmem:[#allocation20_spill] sm:$0xff] }
  0x8e   : > { %v526_v47 = vsel %vm357_vm0, %v1594_v6, 0.0  ;;  %v546_v14 = vadd.f32 %v545_v24, %v544_v15  ;;  %v502_v5 = vadd.f32 %v501_v23, %v500_v12  ;;  %v525_v29 = vadd.f32 %v524_v2, %v523_v10  ;;  %v236_v23 = vld [vmem:[%s934_s6 + $0x338] sm:$0xff] }
  0x8f   : > { %v477_v42 = vadd.f32 %v476_v3, %v475_v22  ;;  %v549_v50 = vsel %vm357_vm0, %v1595_v39, 0.0  ;;  %v480_v62 = vsel %vm357_vm0, %v1232_v49, 0.0  ;;  %v505_v0 = vsel %vm357_vm0, %v1596_v11, 0.0  ;;  %v1605_v22 = vld [vmem:[#allocation23_spill] sm:$0xff]  ;;  %v216_v10 = vld [vmem:[%s934_s6 + $0x298] sm:$0xff] }
  0x90   : > { %v528_v31 = vsel %vm357_vm0, %v1597_v17, 0.0  ;;  %v548_v35 = vadd.f32 %v547_v28, %v546_v14  ;;  %v504_v38 = vadd.f32 %v503_v33, %v502_v5  ;;  %v527_v57 = vadd.f32 %v526_v47, %v525_v29 }
  0x91   : > { %v479_v46 = vadd.f32 %v478_v19, %v477_v42  ;;  %v551_v1 = vsel %vm357_vm0, %v1598_v58, 0.0  ;;  %v354_v8 = vmul.f32 %v242_v9, %v242_v9  ;;  %v507_v49 = vsel %vm357_vm0, %v1599_v34, 0.0  ;;  %v223_v42 = vld [vmem:[%s934_s6 + $0x2d0] sm:$0xff]  ;;  %v244_v34 = vld [vmem:[%s934_s6 + $0x378] sm:$0xff] }
  0x92   : > { %v530_v59 = vsel %vm357_vm0, %v1600_v36, 0.0  ;;  %v550_v18 = vadd.f32 %v549_v50, %v548_v35  ;;  %v506_v20 = vadd.f32 %v505_v0, %v504_v38  ;;  %v529_v16 = vadd.f32 %v528_v31, %v527_v57  ;;  %v230_v0 = vld [vmem:[%s934_s6 + $0x308] sm:$0xff]  ;;  %v237_v38 = vld [vmem:[%s934_s6 + $0x340] sm:$0xff] }
  0x93   : > { %v1364_v40 = vadd.f32 %v480_v62, %v479_v46  ;;  %v553_v26 = vsel %vm357_vm0, %v1601_v13, 0.0  ;;  %v334_v30 = vmul.f32 %v222_v55, %v222_v55  ;;  %v509_v3 = vsel %vm357_vm0, %v1226_v32, 0.0 }
  0x94   : > { %v532_v45 = vsel %vm357_vm0, %v1602_v52, 0.0  ;;  %v552_v41 = vadd.f32 %v551_v1, %v550_v18  ;;  %v307_v43 = vmul.f32 %v195_v54, %v195_v54  ;;  %v508_v25 = vadd.f32 %v507_v49, %v506_v20 }
  0x95   : > { %v531_v27 = vadd.f32 %v530_v59, %v529_v16  ;;  %v555_v61 = vsel %vm357_vm0, %v1603_v63, 0.0  ;;  %v341_v51 = vmul.f32 %v229_v4, %v229_v4  ;;  %v511_v2 = vsel %vm357_vm0, %v354_v8, 0.0 }
  0x96   : > { %v534_v32 = vsel %vm357_vm0, %v1604_v60, 0.0  ;;  %v554_v15 = vadd.f32 %v553_v26, %v552_v41  ;;  %v314_v24 = vmul.f32 %v202_v7, %v202_v7  ;;  %v510_v53 = vadd.f32 %v509_v3, %v508_v25 }
  0x97   : > { %v533_v28 = vadd.f32 %v532_v45, %v531_v27  ;;  %v557_v12 = vsel %vm357_vm0, %v1605_v22, 0.0  ;;  %v348_v19 = vmul.f32 %v236_v23, %v236_v23  ;;  %v536_v56 = vsel %vm357_vm0, %v334_v30, 0.0 }
  0x98   : > { %v556_v33 = vadd.f32 %v555_v61, %v554_v15  ;;  %v321_v6 = vmul.f32 %v209_v37, %v209_v37  ;;  %v512_v47 = vadd.f32 %v511_v2, %v510_v53  ;;  %v559_v9 = vsel %vm357_vm0, %v307_v43, 0.0 }
  0x99   : > { %v535_v14 = vadd.f32 %v534_v32, %v533_v28  ;;  %v355_v5 = vmul.f32 %v243_v48, %v243_v48  ;;  %v538_v29 = vsel %vm357_vm0, %v341_v51, 0.0  ;;  %v328_v50 = vmul.f32 %v216_v10, %v216_v10 }
  0x9a   : > { %v558_v39 = vadd.f32 %v557_v12, %v556_v33  ;;  %v561_v11 = vsel %vm357_vm0, %v314_v24, 0.0  ;;  %v540_v17 = vsel %vm357_vm0, %v348_v19, 0.0  ;;  %v335_v35 = vmul.f32 %v223_v42, %v223_v42 }
  0x9b   : > { %v537_v62 = vadd.f32 %v536_v56, %v535_v14  ;;  %v563_v46 = vsel %vm357_vm0, %v321_v6, 0.0  ;;  %v542_v57 = vsel %vm357_vm0, %v355_v5, 0.0  ;;  %v342_v1 = vmul.f32 %v230_v0, %v230_v0 }
  0x9c   : > { %v560_v31 = vadd.f32 %v559_v9, %v558_v39  ;;  %v565_v8 = vsel %vm357_vm0, %v328_v50, 0.0  ;;  %v349_v36 = vmul.f32 %v237_v38, %v237_v38  ;;  %v567_v18 = vsel %vm357_vm0, %v335_v35, 0.0 }
  0x9d   : > { %v539_v55 = vadd.f32 %v538_v29, %v537_v62  ;;  %v356_v20 = vmul.f32 %v244_v34, %v244_v34  ;;  %v569_v16 = vsel %vm357_vm0, %v342_v1, 0.0  ;;  %v835_v45 = vmov (!%p683_p13), 0.0  }
  0x9e   : > { %v562_v58 = vadd.f32 %v561_v11, %v560_v31  ;;  %v571_v26 = vsel %vm357_vm0, %v349_v36, 0.0  ;;  %579 = vst.msk [vmem:[%s1547_s2] sm:$0xff] (!%p683_p13), %vm357_vm0, %v835_v45  ;;  %580 = vst.msk [vmem:[%s1547_s2 + $0x8] sm:$0xff] (!%p683_p13), %vm357_vm0, %v835_v45 }
  0x9f   : > { %v541_v54 = vadd.f32 %v540_v17, %v539_v55  ;;  %v573_v30 = vsel %vm357_vm0, %v356_v20, 0.0  ;;  %581 = vst.msk [vmem:[%s1547_s2 + $0x10] sm:$0xff] (!%p683_p13), %vm357_vm0, %v835_v45  ;;  %582 = vst.msk [vmem:[%s1547_s2 + $0x18] sm:$0xff] (!%p683_p13), %vm357_vm0, %v835_v45 }
  0xa0   : > { %v564_v49 = vadd.f32 %v563_v46, %v562_v58  ;;  %583 = vst.msk [vmem:[%s1547_s2 + $0x20] sm:$0xff] (!%p683_p13), %vm357_vm0, %v835_v45  ;;  %584 = vst.msk [vmem:[%s1547_s2 + $0x28] sm:$0xff] (!%p683_p13), %vm357_vm0, %v835_v45 }
  0xa1   : > { %v543_v59 = vadd.f32 %v542_v57, %v541_v54  ;;  %585 = vst.msk [vmem:[%s1547_s2 + $0x30] sm:$0xff] (!%p683_p13), %vm357_vm0, %v835_v45 }
  0xa2   : > { %v566_v4 = vadd.f32 %v565_v8, %v564_v49 }
  0xa4   : > { %v568_v13 = vadd.f32 %v567_v18, %v566_v4  ;;  %578 = sbr.rel (%p683_p13) target bundleno = 171 (0xab), region = 32 }
  0xa6   : > { %v570_v7 = vadd.f32 %v569_v16, %v568_v13 }
  0xa8   : > { %v572_v3 = vadd.f32 %v571_v26, %v570_v7 }
  0xaa   : > { %v574_v52 = vadd.f32 %v573_v30, %v572_v3 }
  0xab PF: > { %v586_v41 = vld [vmem:[%s1547_s2] sm:$0xff]  ;;  %v587_v23 = vld [vmem:[%s1547_s2 + $0x8] sm:$0xff]  ;;  %v588_v43 = vld [vmem:[%s1547_s2 + $0x10] sm:$0xff]  ;;  %p684_p2 = scmp.ne.s32.totalorder %s870_s17, 3 }
  0xac   : > { %v1606_v25 = vld [vmem:[#allocation33_spill] sm:$0xff]  ;;  %v594_v63 = vadd.f32 %v587_v23, %v1298_v44  ;;  %v595_v61 = vadd.f32 %v588_v43, %v1338_v21  ;;  %v590_v51 = vld [vmem:[%s1547_s2 + $0x20] sm:$0xff]  ;;  %v591_v2 = vld [vmem:[%s1547_s2 + $0x28] sm:$0xff] }
  0xad   : > { %v593_v27 = vadd.f32 %v586_v41, %v1606_v25  ;;  %v589_v37 = vld [vmem:[%s1547_s2 + $0x18] sm:$0xff]  ;;  %v597_v32 = vadd.f32 %v590_v51, %v512_v47  ;;  %v598_v15 = vadd.f32 %v591_v2, %v543_v59  ;;  %v592_v44 = vld [vmem:[%s1547_s2 + $0x30] sm:$0xff]  ;;  %610 = sbr.rel (%p684_p2) target bundleno = 203 (0xcb), region = 36 }
  0xae   : > { %v596_v60 = vadd.f32 %v589_v37, %v1364_v40  ;;  %601 = vst.msk [vmem:[%s1547_s2 + $0x8] sm:$0xff] %vm357_vm0, %v594_v63  ;;  %602 = vst.msk [vmem:[%s1547_s2 + $0x10] sm:$0xff] %vm357_vm0, %v595_v61  ;;  %v599_v21 = vadd.f32 %v592_v44, %v574_v52 }
  0xaf   : > { %600 = vst.msk [vmem:[%s1547_s2] sm:$0xff] %vm357_vm0, %v593_v27  ;;  %604 = vst.msk [vmem:[%s1547_s2 + $0x20] sm:$0xff] %vm357_vm0, %v597_v32 }
  0xb0   : > { %603 = vst.msk [vmem:[%s1547_s2 + $0x18] sm:$0xff] %vm357_vm0, %v596_v60  ;;  %605 = vst.msk [vmem:[%s1547_s2 + $0x28] sm:$0xff] %vm357_vm0, %v598_v15 }
  0xb1   : > { %606 = vst.msk [vmem:[%s1547_s2 + $0x30] sm:$0xff] %vm357_vm0, %v599_v21 }
  0xb5   : > { %v612_v48 = vld [vmem:[%s1547_s2 + $0x8] sm:$0xff]  ;;  %v613_v24 = vld [vmem:[%s1547_s2 + $0x10] sm:$0xff] }
  0xb6   : > { %v611_v40 = vld [vmem:[%s1547_s2] sm:$0xff]  ;;  %v619_v28 = vmax.f32 %v612_v48, 1e-12  ;;  %v620_v22 = vmax.f32 %v613_v24, 1e-12 }
  0xb7   : > { %v618_v53 = vmax.f32 %v611_v40, 1e-12  ;;  %v614_v12 = vld [vmem:[%s1547_s2 + $0x18] sm:$0xff]  ;;  %v615_v10 = vld [vmem:[%s1547_s2 + $0x20] sm:$0xff]  ;;  %v616_v19 = vld [vmem:[%s1547_s2 + $0x28] sm:$0xff] }
  0xb8   : > { %v621_v56 = vmax.f32 %v614_v12, 1e-12  ;;  %v622_v33 = vmax.f32 %v615_v10, 1e-12  ;;  %v623_v6 = vmax.f32 %v616_v19, 1e-12 }
  0xb9   : > { %737 = vrsqrt.f32 %v618_v53  ;;  %v617_v47 = vld [vmem:[%s1547_s2 + $0x30] sm:$0xff] }
  0xba   : > { %739 = vrsqrt.f32 %v619_v28  ;;  %v624_v14 = vmax.f32 %v617_v47, 1e-12 }
  0xbb   : > { %741 = vrsqrt.f32 %v620_v22 }
  0xbc   : > { %743 = vrsqrt.f32 %v621_v56 }
  0xbd   : > { %745 = vrsqrt.f32 %v622_v33 }
  0xbe   : > { %747 = vrsqrt.f32 %v623_v6 }
  0xbf   : > { %749 = vrsqrt.f32 %v624_v14 }
  0xc3   : > { %v738_v9 = vpop.eup %737 }
  0xc4   : > { %v740_v42 = vpop.eup %739  ;;  %632 = vst.msk [vmem:[%s1547_s2] sm:$0xff] %vm357_vm0, %v738_v9 }
  0xc5   : > { %v742_v5 = vpop.eup %741  ;;  %633 = vst.msk [vmem:[%s1547_s2 + $0x8] sm:$0xff] %vm357_vm0, %v740_v42 }
  0xc6   : > { %v744_v29 = vpop.eup %743  ;;  %634 = vst.msk [vmem:[%s1547_s2 + $0x10] sm:$0xff] %vm357_vm0, %v742_v5 }
  0xc7   : > { %v746_v39 = vpop.eup %745  ;;  %635 = vst.msk [vmem:[%s1547_s2 + $0x18] sm:$0xff] %vm357_vm0, %v744_v29 }
  0xc8   : > { %v748_v50 = vpop.eup %747  ;;  %636 = vst.msk [vmem:[%s1547_s2 + $0x20] sm:$0xff] %vm357_vm0, %v746_v39 }
  0xc9   : > { %v750_v62 = vpop.eup %749  ;;  %637 = vst.msk [vmem:[%s1547_s2 + $0x28] sm:$0xff] %vm357_vm0, %v748_v50 }
  0xca   : > { %638 = vst.msk [vmem:[%s1547_s2 + $0x30] sm:$0xff] %vm357_vm0, %v750_v62 }
  0xcb PF: > { %p18_p4 = scmp.ge.s32.totalorder %s872_s18, 6   ;;  %s1607_s14 = smov %s821_s15 }
  0xcc   : > { %s1608_s15 = smov %s825_s0  ;;  %s1609_s0 = smov %s886_s27 }
  0xcd   : > { %s1610_s16 = smov %s872_s18  ;;  %20 = sbr.rel (!%p18_p4) target bundleno = 18 (0x12), region = 68 }
  0xd4   :  { %650 = vsyncpa [#allocation5], 1 }
  0xd5   :  { %652 = vsyncpa [#allocation5 + $0x1], 1 }

// kernel: prompt_forward.5
= control target key start
LH: loop header
LB: loop body
LE: loop exit
PB: predicated region body
PF: predicated region fallthrough
CT: control target
= control target key end

     0   :  { %s5041_s0 = inlined_call_operand.vmem [shape: s32[4], index: 0, kind: input, shape index: {}]   ;;  %s5042_s1 = inlined_call_operand.vmem [shape: f32[10,16,56,56], index: 1, kind: input, shape index: {}]   ;;  %s5043_s2 = inlined_call_operand.vmem [shape: f32[56,56], index: 2, kind: input, shape index: {}]   ;;  %s5044_s3 = inlined_call_operand.vmem [shape: f32[2,64,56,56], index: 3, kind: input, shape index: {}]   ;;  %s5045_s4 = inlined_call_operand.vmem [shape: f32[2,64,56,56], index: 4, kind: output, shape index: {}]  }
   0x1   :  { %s9_s17 = sshll.u32 %s5041_s0, 4  ;;  %s10_s17 = int_to_ptr.vmem [resolvable:$true] %s9_s17 }
   0x2   :  { %s3858_s18 = scalar_lea.vmem %s10_s17, 16  ;;  %p3863_p1 = scmp.lt.s32.totalorder %s10_s17, %s10_s17 }
   0x3   :  { %p3859_p0 = scmp.ne.s32.totalorder %s10_s17, %s3858_s18  ;;  %p3864_p2 = scmp.lt.s32.totalorder %s3858_s18, %s3858_s18 }
   0x5   :  { %p3865_p3 = por %p3864_p2, %p3863_p1 }
   0x7   :  { %p3866_p4 = pnand %p3865_p3, %p3859_p0 }
   0x9   :  { %3869 = shalt.err (!%p3866_p4)  }
   0xa   :  { %s3912_s19 = smov [#allocation3]  }
   0xb   :  { %12 = dma.vmem_to_smem %s10_s17, 16, %s3912_s19, [#allocation2] }
   0xc   :  { %3890 = dma.done.wait [#allocation2], 16 }
   0xd   :  { %3891 = vsyncadd [#allocation2], 4294967280 }
   0xe   :  { %14 = sfence }
   0xf   :  { %s3944_s20 = smov 0   ;;  %s3946_s21 = smov 0  }
  0x10   :  { %s3948_s22 = smov 0   ;;  %s3950_s0 = smov 0  }
  0x11   :  { %s3952_s23 = smov 0  }
  0x12 LB: > { %s29_s24 = sadd.s32 1, %s3902_s22  ;;  %s32_s25 = sadd.s32 1, %s3906_s0  ;;  %s3910_s23 = sphi %s3952_s23, %s20_s23   ;;  %s3906_s0 = sphi %s3950_s0, %s5049_s0   ;;  %s3902_s22 = sphi %s3948_s22, %s5048_s22   ;;  %s3898_s21 = sphi %s3946_s21, %s5047_s21   ;;  %s3894_s20 = sphi %s3944_s20, %s5046_s20  }
  0x13   : > { %p30_p5 = scmp.ge.s32.totalorder %s29_s24, 2  ;;  %p2756_p6 = scmp.ge.s32.totalorder %s3910_s23, 1 }
  0x14   : > { %p180_p7 = scmp.lt.s32.totalorder %s3910_s23, 9 }
  0x15   : > { %s5051_s24 = smov (%p30_p5, %s29_s24), 0  ;;  %s5053_s25 = smov (!%p30_p5, %s32_s25), %s3906_s0 }
  0x16   : > { %p181_p8 = pnand %p2756_p6, %p180_p7  ;;  %p34_p9 = scmp.ge.s32.totalorder %s5053_s25, 4 }
  0x17   : > { %s2758_s26 = sshll.u32 (!%p181_p8), %s3898_s21, 4  ;;  %p228_p10 = scmp.lt.s32.totalorder (!%p181_p8), %s3894_s20, 1  ;;  %v3913_v0 = vmov (!%p181_p8), 0.0|0.0   ;;  %vm3914_vm0 = vmmov (!%p181_p8), 0   ;;  %v3915_v1 = vmov (!%p181_p8), 0.0   ;;  %v4015_v21 = vld [vmem:[%s5043_s2] sm:$0xff] (!%p181_p8) }
  0x18   : > { %s5055_s25 = smov (%p34_p9, %s5053_s25), 0  ;;  %184 = sbr.rel (%p181_p8) target bundleno = 488 (0x1e8), region = 32 }
  0x19   : > { %3660 = vmatprep.subr.bf16.mxu0 (!%p181_p8), %v3913_v0  ;;  %3669 = vmatprep.subr.bf16.mxu1 (!%p181_p8), %v3913_v0  ;;  %p230_p11 = scmp.lt.s32.totalorder (!%p181_p8), %s2758_s26, 63  ;;  %s220_s27 = sld [smem:[#allocation3 + %s3898_s21]] (!%p181_p8)  ;;  %vm592_vm1 = vcmask (!%p181_p8), 457728   ;;  %v4032_v32 = vld [vmem:[%s5043_s2 + $0x8] sm:$0xff] (!%p181_p8)  ;;  %v4040_v37 = vld [vmem:[%s5043_s2 + $0x10] sm:$0xff] (!%p181_p8)  ;;  %v4061_v48 = vld [vmem:[%s5043_s2 + $0x18] sm:$0xff] (!%p181_p8) }
  0x1a   : > { %3114 = vmatprep.mubr.msk.f32.mxu0 (!%p181_p8), %vm3914_vm0, %v3915_v1  ;;  %3149 = vmatprep.mubr.msk.f32.mxu1 (!%p181_p8), %vm3914_vm0, %v3915_v1  ;;  %v4087_v61 = vld [vmem:[%s5043_s2 + $0x20] sm:$0xff] (!%p181_p8) }
  0x1f   : > { %s5057_s20 = smov (!%p228_p10, %s3894_s20), 1  ;;  %s5059_s26 = smov (!%p230_p11, %s2758_s26), 63 }
  0x20   : > { %s3806_s28 = smul.u32 448, %s5057_s20  ;;  %p221_p12 = scmp.lt.s32.totalorder %s220_s27, 9 }
  0x21   : > { %s3805_s29 = smul.u32 7, %s5059_s26 }
  0x22   : > { %s5061_s27 = smov (!%p221_p12, %s220_s27), 9 }
  0x23   : > { %s3980_s30 = sadd.s32 %s3806_s28, %s3805_s29  ;;  %s3804_s9 = smul.u32 896, %s5061_s27 }
  0x24   : > { %s2759_s5 = sshll.u32 %s3980_s30, 3 }
  0x25   : > { %s3988_s8 = scalar_lea.vmem %s5044_s3, %s2759_s5  ;;  %s4007_s12 = scalar_lea.vmem %s5042_s1, %s3804_s9 }
  0x26   : > { %v361_v2 = vld [vmem:[%s3988_s8] sm:$0xff]  ;;  %v362_v3 = vld [vmem:[%s3988_s8 + $0x8] sm:$0xff]  ;;  %v368_v4 = vld [vmem:[%s3988_s8 + $0x38] sm:$0xff]  ;;  %s4773_s28 = scalar_lea.vmem %s5045_s4, %s2759_s5 }
  0x27   : > { %v3661_v5 = vpack.c.bf16 %v362_v3, %v361_v2  ;;  %v369_v6 = vld [vmem:[%s3988_s8 + $0x40] sm:$0xff]  ;;  %v363_v7 = vld [vmem:[%s3988_s8 + $0x10] sm:$0xff]  ;;  %v364_v8 = vld [vmem:[%s3988_s8 + $0x18] sm:$0xff] }
  0x28   : > { %v3670_v9 = vpack.c.bf16 %v369_v6, %v368_v4  ;;  %v370_v10 = vld [vmem:[%s3988_s8 + $0x48] sm:$0xff]  ;;  %v371_v11 = vld [vmem:[%s3988_s8 + $0x50] sm:$0xff]  ;;  %v3664_v12 = vpack.c.bf16 %v364_v8, %v363_v7  ;;  %v365_v14 = vld [vmem:[%s3988_s8 + $0x20] sm:$0xff] }
  0x29   : > { %3662 = vmatpush3.bf16.msra.mxu0 %v3661_v5  ;;  %v3673_v13 = vpack.c.bf16 %v371_v11, %v370_v10  ;;  %v366_v15 = vld [vmem:[%s3988_s8 + $0x28] sm:$0xff]  ;;  %v372_v16 = vld [vmem:[%s3988_s8 + $0x58] sm:$0xff]  ;;  %v373_v17 = vld [vmem:[%s3988_s8 + $0x60] sm:$0xff] }
  0x2a   : > { %3671 = vmatpush3.bf16.msra.mxu1 %v3670_v9  ;;  %3663 = vmatprep.subr.bf16.mxu0 %v3913_v0  ;;  %v3667_v18 = vpack.c.bf16 %v366_v15, %v365_v14  ;;  %v3676_v19 = vpack.c.bf16 %v373_v17, %v372_v16  ;;  %v249_v20 = vld [vmem:[%s4007_s12] sm:$0xff]  ;;  %v256_v22 = vld [vmem:[%s4007_s12 + $0x38] sm:$0xff]  ;;  %v375_v23 = vld [vmem:[%s3988_s8 + $0x70] sm:$0xff] }
  0x2b   : > { %3672 = vmatprep.subr.bf16.mxu1 %v3913_v0  ;;  %v376_v24 = vld [vmem:[%s3988_s8 + $0x78] sm:$0xff]  ;;  %v367_v25 = vld [vmem:[%s3988_s8 + $0x30] sm:$0xff]  ;;  %v480_v26 = vmul.f32 %v4015_v21, %v249_v20  ;;  %v382_v27 = vld [vmem:[%s3988_s8 + $0xa8] sm:$0xff]  ;;  %v487_v30 = vmul.f32 %v4015_v21, %v256_v22 }
  0x2c   : > { %v383_v28 = vld [vmem:[%s3988_s8 + $0xb0] sm:$0xff]  ;;  %v374_v29 = vld [vmem:[%s3988_s8 + $0x68] sm:$0xff]  ;;  %v3679_v33 = vpack.c.bf16 %v376_v24, %v375_v23  ;;  %v257_v34 = vld [vmem:[%s4007_s12 + $0x40] sm:$0xff] }
  0x2d   : > { %3665 = vmatpush3.bf16.msra.mxu0 %v3664_v12  ;;  %v250_v31 = vld [vmem:[%s4007_s12 + $0x8] sm:$0xff]  ;;  %v3688_v35 = vpack.c.bf16 %v383_v28, %v382_v27  ;;  %v377_v38 = vld [vmem:[%s3988_s8 + $0x80] sm:$0xff]  ;;  %v488_v40 = vmul.f32 %v4032_v32, %v257_v34  ;;  %v251_v41 = vld [vmem:[%s4007_s12 + $0x10] sm:$0xff] }
  0x2e   : > { %3674 = vmatpush3.bf16.msra.mxu1 %v3673_v13  ;;  %3666 = vmatprep.subr.bf16.mxu0 %v3913_v0  ;;  %v481_v36 = vmul.f32 %v4032_v32, %v250_v31  ;;  %v378_v39 = vld [vmem:[%s3988_s8 + $0x88] sm:$0xff]  ;;  %v384_v42 = vld [vmem:[%s3988_s8 + $0xb8] sm:$0xff]  ;;  %v385_v43 = vld [vmem:[%s3988_s8 + $0xc0] sm:$0xff]  ;;  %v482_v46 = vmul.f32 %v4040_v37, %v251_v41 }
  0x2f   : > { %3675 = vmatprep.subr.bf16.mxu1 %v3913_v0  ;;  %v258_v44 = vld [vmem:[%s4007_s12 + $0x48] sm:$0xff]  ;;  %v3682_v45 = vpack.c.bf16 %v378_v39, %v377_v38  ;;  %v3691_v47 = vpack.c.bf16 %v385_v43, %v384_v42  ;;  %v379_v49 = vld [vmem:[%s3988_s8 + $0x90] sm:$0xff]  ;;  %v380_v50 = vld [vmem:[%s3988_s8 + $0x98] sm:$0xff] }
  0x30   : > { %v489_v51 = vmul.f32 %v4040_v37, %v258_v44  ;;  %v252_v52 = vld [vmem:[%s4007_s12 + $0x18] sm:$0xff]  ;;  %v386_v53 = vld [vmem:[%s3988_s8 + $0xc8] sm:$0xff]  ;;  %v387_v54 = vld [vmem:[%s3988_s8 + $0xd0] sm:$0xff]  ;;  %v3685_v56 = vpack.c.bf16 %v380_v50, %v379_v49 }
  0x31   : > { %3668 = vmatpush3.bf16.msra.mxu0 %v3667_v18  ;;  %v259_v55 = vld [vmem:[%s4007_s12 + $0x50] sm:$0xff]  ;;  %v483_v57 = vmul.f32 %v4061_v48, %v252_v52  ;;  %v3694_v58 = vpack.c.bf16 %v387_v54, %v386_v53  ;;  %v253_v60 = vld [vmem:[%s4007_s12 + $0x20] sm:$0xff]  ;;  %v260_v62 = vld [vmem:[%s4007_s12 + $0x58] sm:$0xff] }
  0x32   : > { %3677 = vmatpush3.bf16.msra.mxu1 %v3676_v19  ;;  %3112 = vmatprep.subr.mxu0 %v3915_v1  ;;  %v490_v59 = vmul.f32 %v4061_v48, %v259_v55  ;;  %v484_v63 = vmul.f32 %v4087_v61, %v253_v60  ;;  %v381_v2 = vld [vmem:[%s3988_s8 + $0xa0] sm:$0xff]  ;;  %v491_v3 = vmul.f32 %v4087_v61, %v260_v62  ;;  %v254_v4 = vld [vmem:[%s4007_s12 + $0x28] sm:$0xff]  ;;  %v388_v6 = vld [vmem:[%s3988_s8 + $0xd8] sm:$0xff] }
  0x33   : > { %3147 = vmatprep.subr.mxu1 %v3915_v1  ;;  %v4105_v5 = vld [vmem:[%s5043_s2 + $0x28] sm:$0xff]  ;;  %v261_v7 = vld [vmem:[%s4007_s12 + $0x60] sm:$0xff]  ;;  %v255_v10 = vld [vmem:[%s4007_s12 + $0x30] sm:$0xff] }
  0x34   : > { %v485_v8 = vmul.f32 %v4105_v5, %v254_v4  ;;  %v492_v9 = vmul.f32 %v4105_v5, %v261_v7  ;;  %v4123_v11 = vld [vmem:[%s5043_s2 + $0x30] sm:$0xff]  ;;  %v262_v12 = vld [vmem:[%s4007_s12 + $0x68] sm:$0xff]  ;;  %v389_v17 = vld [vmem:[%s3988_s8 + $0xe0] sm:$0xff] }
  0x35   : > { %3113 = vmatpush3.msra.mxu0 %v367_v25  ;;  %v486_v13 = vmul.f32 %v4123_v11, %v255_v10  ;;  %v493_v14 = vmul.f32 %v4123_v11, %v262_v12  ;;  %v263_v15 = vld [vmem:[%s4007_s12 + $0x70] sm:$0xff]  ;;  %v270_v16 = vld [vmem:[%s4007_s12 + $0xa8] sm:$0xff]  ;;  %v396_v19 = vld [vmem:[%s3988_s8 + $0x118] sm:$0xff] }
  0x36   : > { %3148 = vmatpush3.msra.mxu1 %v374_v29  ;;  %3115 = vmatmul.mubr.msk.f32.vlgmr.msra.gmra.mrb[0].mxu0 %vm592_vm1, %v480_v26  ;;  %v390_v18 = vld [vmem:[%s3988_s8 + $0xe8] sm:$0xff]  ;;  %v397_v20 = vld [vmem:[%s3988_s8 + $0x120] sm:$0xff]  ;;  %v494_v22 = vmul.f32 %v4015_v21, %v263_v15  ;;  %v501_v23 = vmul.f32 %v4015_v21, %v270_v16  ;;  %v264_v25 = vld [vmem:[%s4007_s12 + $0x78] sm:$0xff] }
  0x37   : > { %3150 = vmatmul.mubr.msk.f32.vlgmr.msra.gmra.mrb[0].mxu1 %vm592_vm1, %v487_v30  ;;  %3678 = vmatprep.subr.bf16.mxu0 %v3913_v0  ;;  %v3697_v24 = vpack.c.bf16 %v390_v18, %v389_v17  ;;  %v3706_v26 = vpack.c.bf16 %v397_v20, %v396_v19  ;;  %v271_v27 = vld [vmem:[%s4007_s12 + $0xb0] sm:$0xff]  ;;  %v392_v29 = vld [vmem:[%s3988_s8 + $0xf8] sm:$0xff]  ;;  %v495_v30 = vmul.f32 %v4032_v32, %v264_v25  ;;  %v398_v31 = vld [vmem:[%s3988_s8 + $0x128] sm:$0xff] }
  0x38   : > { %3687 = vmatprep.subr.bf16.mxu1 %v3913_v0  ;;  %3680 = vmatpush3.bf16.msra.mxu0 %v3679_v33  ;;  %v391_v28 = vld [vmem:[%s3988_s8 + $0xf0] sm:$0xff]  ;;  %v502_v34 = vmul.f32 %v4032_v32, %v271_v27  ;;  %v394_v41 = vld [vmem:[%s3988_s8 + $0x108] sm:$0xff]  ;;  %v400_v43 = vld [vmem:[%s3988_s8 + $0x138] sm:$0xff] }
  0x39   : > { %3689 = vmatpush3.bf16.msra.mxu1 %v3688_v35  ;;  %3117 = vmatprep.mubr.msk.f32.mxu0 %vm3914_vm0, %v3915_v1  ;;  %v399_v33 = vld [vmem:[%s3988_s8 + $0x130] sm:$0xff]  ;;  %v265_v35 = vld [vmem:[%s4007_s12 + $0x80] sm:$0xff]  ;;  %v3700_v38 = vpack.c.bf16 %v392_v29, %v391_v28  ;;  %v274_v54 = vld [vmem:[%s4007_s12 + $0xc8] sm:$0xff] }
  0x3a   : > { %3152 = vmatprep.mubr.msk.f32.mxu1 %vm3914_vm0, %v3915_v1  ;;  %3118 = vmatmul.mubr.msk.f32.gmra.mrb[2].mxu0 %vm592_vm1, %v481_v36  ;;  %v272_v36 = vld [vmem:[%s4007_s12 + $0xb8] sm:$0xff]  ;;  %v3709_v39 = vpack.c.bf16 %v399_v33, %v398_v31  ;;  %v496_v42 = vmul.f32 %v4040_v37, %v265_v35  ;;  %v401_v44 = vld [vmem:[%s3988_s8 + $0x140] sm:$0xff]  ;;  %v267_v53 = vld [vmem:[%s4007_s12 + $0x90] sm:$0xff] }
  0x3b   : > { %3153 = vmatmul.mubr.msk.f32.gmra.mrb[2].mxu1 %vm592_vm1, %v488_v40  ;;  %3120 = vmatprep.mubr.msk.f32.mxu0 %vm3914_vm0, %v3915_v1  ;;  %v393_v40 = vld [vmem:[%s3988_s8 + $0x100] sm:$0xff]  ;;  %v3712_v50 = vpack.c.bf16 %v401_v44, %v400_v43  ;;  %v395_v55 = vld [vmem:[%s3988_s8 + $0x110] sm:$0xff]  ;;  %v404_v10 = vld [vmem:[%s3988_s8 + $0x158] sm:$0xff] }
  0x3c   : > { %3155 = vmatprep.mubr.msk.f32.mxu1 %vm3914_vm0, %v3915_v1  ;;  %3681 = vmatprep.subr.bf16.mxu0 %v3913_v0  ;;  %v3703_v49 = vpack.c.bf16 %v394_v41, %v393_v40  ;;  %v275_v60 = vld [vmem:[%s4007_s12 + $0xd0] sm:$0xff]  ;;  %v277_v7 = vld [vmem:[%s4007_s12 + $0xe0] sm:$0xff]  ;;  %v410_v12 = vld [vmem:[%s3988_s8 + $0x188] sm:$0xff] }
  0x3d   : > { %3690 = vmatprep.subr.bf16.mxu1 %v3913_v0  ;;  %3683 = vmatpush3.bf16.msra.mxu0 %v3682_v45  ;;  %v503_v45 = vmul.f32 %v4040_v37, %v272_v36  ;;  %v278_v17 = vld [vmem:[%s4007_s12 + $0xe8] sm:$0xff]  ;;  %v285_v19 = vld [vmem:[%s4007_s12 + $0x120] sm:$0xff]  ;;  %v279_v27 = vld [vmem:[%s4007_s12 + $0xf0] sm:$0xff] }
  0x3e   : > { %3121 = vmatmul.mubr.msk.f32.gmra.mrb[4].mxu0 %vm592_vm1, %v482_v46  ;;  %3692 = vmatpush3.bf16.msra.mxu1 %v3691_v47  ;;  %v266_v46 = vld [vmem:[%s4007_s12 + $0x88] sm:$0xff]  ;;  %v273_v47 = vld [vmem:[%s4007_s12 + $0xc0] sm:$0xff]  ;;  %v407_v31 = vld [vmem:[%s3988_s8 + $0x170] sm:$0xff] }
  0x3f   : > { %3156 = vmatmul.mubr.msk.f32.gmra.mrb[4].mxu1 %vm592_vm1, %v489_v51  ;;  %3123 = vmatprep.mubr.msk.f32.mxu0 %vm3914_vm0, %v3915_v1  ;;  %v497_v51 = vmul.f32 %v4061_v48, %v266_v46  ;;  %v504_v52 = vmul.f32 %v4061_v48, %v273_v47  ;;  %v405_v20 = vld [vmem:[%s3988_s8 + $0x160] sm:$0xff]  ;;  %v286_v28 = vld [vmem:[%s4007_s12 + $0x128] sm:$0xff]  ;;  %v408_v33 = vld [vmem:[%s3988_s8 + $0x178] sm:$0xff] }
  0x40   : > { %3158 = vmatprep.mubr.msk.f32.mxu1 %vm3914_vm0, %v3915_v1  ;;  %3684 = vmatprep.subr.bf16.mxu0 %v3913_v0  ;;  %v413_v25 = vld [vmem:[%s3988_s8 + $0x1a0] sm:$0xff]  ;;  %v414_v35 = vld [vmem:[%s3988_s8 + $0x1a8] sm:$0xff]  ;;  %v415_v36 = vld [vmem:[%s3988_s8 + $0x1b0] sm:$0xff]  ;;  %v3721_v41 = vpack.c.bf16 %v408_v33, %v407_v31 }
  0x41   : > { %3693 = vmatprep.subr.bf16.mxu1 %v3913_v0  ;;  %3686 = vmatpush3.bf16.msra.mxu0 %v3685_v56  ;;  %v498_v56 = vmul.f32 %v4087_v61, %v267_v53  ;;  %v287_v40 = vld [vmem:[%s4007_s12 + $0x130] sm:$0xff]  ;;  %v288_v46 = vld [vmem:[%s4007_s12 + $0x138] sm:$0xff]  ;;  %v409_v47 = vld [vmem:[%s3988_s8 + $0x180] sm:$0xff] }
  0x42   : > { %3124 = vmatmul.mubr.msk.f32.gmra.mrb[6].mxu0 %vm592_vm1, %v483_v57  ;;  %3695 = vmatpush3.bf16.msra.mxu1 %v3694_v58  ;;  %v402_v57 = vld [vmem:[%s3988_s8 + $0x148] sm:$0xff]  ;;  %v505_v58 = vmul.f32 %v4087_v61, %v274_v54  ;;  %v518_v44 = vmul.f32 %v4061_v48, %v287_v40  ;;  %v289_v53 = vld [vmem:[%s4007_s12 + $0x140] sm:$0xff]  ;;  %v423_v40 = vld [vmem:[%s3988_s8 + $0x1f0] sm:$0xff] }
  0x43   : > { %3159 = vmatmul.mubr.msk.f32.gmra.mrb[6].mxu1 %vm592_vm1, %v490_v59  ;;  %3126 = vmatprep.mubr.msk.f32.mxu0 %vm3914_vm0, %v3915_v1  ;;  %v268_v59 = vld [vmem:[%s4007_s12 + $0x98] sm:$0xff]  ;;  %v301_v31 = vld [vmem:[%s4007_s12 + $0x1a0] sm:$0xff] }
  0x44   : > { %3161 = vmatprep.mubr.msk.f32.mxu1 %vm3914_vm0, %v3915_v1  ;;  %3182 = vmatprep.subr.mxu0 %v3915_v1  ;;  %v499_v62 = vmul.f32 %v4105_v5, %v268_v59 }
  0x45   : > { %3217 = vmatprep.subr.mxu1 %v3915_v1  ;;  %3183 = vmatpush3.msra.mxu0 %v381_v2  ;;  %v269_v2 = vld [vmem:[%s4007_s12 + $0xa0] sm:$0xff] }
  0x46   : > { %3127 = vmatmul.mubr.msk.f32.gmra.mrb[8].mxu0 %vm592_vm1, %v484_v63  ;;  %3218 = vmatpush3.msra.mxu1 %v388_v6  ;;  %v506_v63 = vmul.f32 %v4105_v5, %v275_v60  ;;  %v500_v4 = vmul.f32 %v4123_v11, %v269_v2  ;;  %v291_v60 = vld [vmem:[%s4007_s12 + $0x150] sm:$0xff]  ;;  %v418_v2 = vld [vmem:[%s3988_s8 + $0x1c8] sm:$0xff] }
  0x47   : > { %3162 = vmatmul.mubr.msk.f32.gmra.mrb[8].mxu1 %vm592_vm1, %v491_v3  ;;  %3129 = vmatprep.mubr.msk.f32.mxu0 %vm3914_vm0, %v3915_v1  ;;  %v276_v3 = vld [vmem:[%s4007_s12 + $0xd8] sm:$0xff] }
  0x48   : > { %3164 = vmatprep.mubr.msk.f32.mxu1 %vm3914_vm0, %v3915_v1  ;;  %3696 = vmatprep.subr.bf16.mxu0 %v3913_v0  ;;  %v507_v6 = vmul.f32 %v4123_v11, %v276_v3  ;;  %v424_v3 = vld [vmem:[%s3988_s8 + $0x1f8] sm:$0xff] }
  0x49   : > { %3705 = vmatprep.subr.bf16.mxu1 %v3913_v0 }
  0x4a   : > { %3130 = vmatmul.mubr.msk.f32.gmra.mrb[10].mxu0 %vm592_vm1, %v485_v8  ;;  %v284_v8 = vld [vmem:[%s4007_s12 + $0x118] sm:$0xff] }
  0x4b   : > { %3165 = vmatmul.mubr.msk.f32.gmra.mrb[10].mxu1 %vm592_vm1, %v492_v9  ;;  %3132 = vmatprep.mubr.msk.f32.mxu0 %vm3914_vm0, %v3915_v1  ;;  %v403_v9 = vld [vmem:[%s3988_s8 + $0x150] sm:$0xff]  ;;  %v515_v15 = vmul.f32 %v4015_v21, %v284_v8 }
  0x4c   : > { %3167 = vmatprep.mubr.msk.f32.mxu1 %vm3914_vm0, %v3915_v1  ;;  %v3715_v16 = vpack.c.bf16 %v404_v10, %v403_v9  ;;  %v292_v9 = vld [vmem:[%s4007_s12 + $0x158] sm:$0xff] }
  0x4e   : > { %3133 = vmatmul.mubr.msk.f32.gmra.mrb[12].mxu0 %vm592_vm1, %v486_v13  ;;  %v411_v13 = vld [vmem:[%s3988_s8 + $0x190] sm:$0xff] }
  0x4f   : > { %3168 = vmatmul.mubr.msk.f32.gmra.mrb[12].mxu1 %vm592_vm1, %v493_v14  ;;  %3184 = vmatprep.mubr.msk.f32.mxu0 %vm3914_vm0, %v3915_v1  ;;  %v508_v14 = vmul.f32 %v4015_v21, %v277_v7  ;;  %v3724_v18 = vpack.c.bf16 %v411_v13, %v410_v12  ;;  %v299_v12 = vld [vmem:[%s4007_s12 + $0x190] sm:$0xff] }
  0x50   : > { %3219 = vmatprep.mubr.msk.f32.mxu1 %vm3914_vm0, %v3915_v1  ;;  %v419_v13 = vld [vmem:[%s3988_s8 + $0x1d0] sm:$0xff] }
  0x52   : > { %3185 = vmatmul.mubr.msk.f32.vlgmr.msra.gmra.mrb[14].mxu0 %vm592_vm1, %v494_v22  ;;  %v406_v22 = vld [vmem:[%s3988_s8 + $0x168] sm:$0xff] }
  0x53   : > { %3220 = vmatmul.mubr.msk.f32.vlgmr.msra.gmra.mrb[14].mxu1 %vm592_vm1, %v501_v23  ;;  %3698 = vmatpush3.bf16.msra.mxu0 %v3697_v24  ;;  %v509_v23 = vmul.f32 %v4032_v32, %v278_v17  ;;  %v412_v24 = vld [vmem:[%s3988_s8 + $0x198] sm:$0xff]  ;;  %v3718_v29 = vpack.c.bf16 %v406_v22, %v405_v20  ;;  %v427_v17 = vld [vmem:[%s3988_s8 + $0x210] sm:$0xff] }
  0x54   : > { %3707 = vmatpush3.bf16.msra.mxu1 %v3706_v26  ;;  %3187 = vmatprep.mubr.msk.f32.mxu0 %vm3914_vm0, %v3915_v1  ;;  %v516_v26 = vmul.f32 %v4032_v32, %v285_v19  ;;  %v293_v19 = vld [vmem:[%s4007_s12 + $0x160] sm:$0xff]  ;;  %v300_v20 = vld [vmem:[%s4007_s12 + $0x198] sm:$0xff] }
  0x55   : > { %3222 = vmatprep.mubr.msk.f32.mxu1 %vm3914_vm0, %v3915_v1  ;;  %3699 = vmatprep.subr.bf16.mxu0 %v3913_v0 }
  0x56   : > { %3188 = vmatmul.mubr.msk.f32.gmra.mrb[16].mxu0 %vm592_vm1, %v495_v30  ;;  %3708 = vmatprep.subr.bf16.mxu1 %v3913_v0  ;;  %v3727_v30 = vpack.c.bf16 %v413_v25, %v412_v24  ;;  %v421_v24 = vld [vmem:[%s3988_s8 + $0x1e0] sm:$0xff]  ;;  %v422_v25 = vld [vmem:[%s3988_s8 + $0x1e8] sm:$0xff] }
  0x57   : > { %3223 = vmatmul.mubr.msk.f32.gmra.mrb[16].mxu1 %vm592_vm1, %v502_v34  ;;  %3190 = vmatprep.mubr.msk.f32.mxu0 %vm3914_vm0, %v3915_v1  ;;  %v510_v34 = vmul.f32 %v4040_v37, %v279_v27  ;;  %v428_v27 = vld [vmem:[%s3988_s8 + $0x218] sm:$0xff]  ;;  %v3739_v33 = vpack.c.bf16 %v422_v25, %v421_v24  ;;  %v315_v24 = vld [vmem:[%s4007_s12 + $0x210] sm:$0xff] }
  0x58   : > { %3225 = vmatprep.mubr.msk.f32.mxu1 %vm3914_vm0, %v3915_v1  ;;  %3701 = vmatpush3.bf16.msra.mxu0 %v3700_v38  ;;  %v517_v38 = vmul.f32 %v4040_v37, %v286_v28  ;;  %v429_v28 = vld [vmem:[%s3988_s8 + $0x220] sm:$0xff] }
  0x59   : > { %3710 = vmatpush3.bf16.msra.mxu1 %v3709_v39  ;;  %3702 = vmatprep.subr.bf16.mxu0 %v3913_v0  ;;  %v280_v39 = vld [vmem:[%s4007_s12 + $0xf8] sm:$0xff] }
  0x5a   : > { %3191 = vmatmul.mubr.msk.f32.gmra.mrb[18].mxu0 %vm592_vm1, %v496_v42  ;;  %3711 = vmatprep.subr.bf16.mxu1 %v3913_v0  ;;  %v3730_v42 = vpack.c.bf16 %v415_v36, %v414_v35  ;;  %v511_v43 = vmul.f32 %v4061_v48, %v280_v39  ;;  %v532_v36 = vmul.f32 %v4061_v48, %v301_v31  ;;  %v302_v39 = vld [vmem:[%s4007_s12 + $0x1a8] sm:$0xff]  ;;  %v437_v31 = vld [vmem:[%s3988_s8 + $0x260] sm:$0xff] }
  0x5b   : > { %3226 = vmatmul.mubr.msk.f32.gmra.mrb[18].mxu1 %vm592_vm1, %v503_v45  ;;  %3193 = vmatprep.mubr.msk.f32.mxu0 %vm3914_vm0, %v3915_v1  ;;  %v281_v45 = vld [vmem:[%s4007_s12 + $0x100] sm:$0xff] }
  0x5c   : > { %3228 = vmatprep.mubr.msk.f32.mxu1 %vm3914_vm0, %v3915_v1  ;;  %3704 = vmatpush3.bf16.msra.mxu0 %v3703_v49  ;;  %v512_v49 = vmul.f32 %v4087_v61, %v281_v45  ;;  %v303_v45 = vld [vmem:[%s4007_s12 + $0x1b0] sm:$0xff] }
  0x5d   : > { %3713 = vmatpush3.bf16.msra.mxu1 %v3712_v50  ;;  %3252 = vmatprep.subr.mxu0 %v3915_v1  ;;  %v416_v50 = vld [vmem:[%s3988_s8 + $0x1b8] sm:$0xff] }
  0x5e   : > { %3194 = vmatmul.mubr.msk.f32.gmra.mrb[20].mxu0 %vm592_vm1, %v497_v51  ;;  %3287 = vmatprep.subr.mxu1 %v3915_v1  ;;  %v519_v51 = vmul.f32 %v4087_v61, %v288_v46 }
  0x5f   : > { %3229 = vmatmul.mubr.msk.f32.gmra.mrb[20].mxu1 %vm592_vm1, %v504_v52  ;;  %3196 = vmatprep.mubr.msk.f32.mxu0 %vm3914_vm0, %v3915_v1  ;;  %v282_v52 = vld [vmem:[%s4007_s12 + $0x108] sm:$0xff] }
  0x60   : > { %3231 = vmatprep.mubr.msk.f32.mxu1 %vm3914_vm0, %v3915_v1  ;;  %3253 = vmatpush3.msra.mxu0 %v395_v55  ;;  %v513_v54 = vmul.f32 %v4105_v5, %v282_v52  ;;  %v520_v55 = vmul.f32 %v4105_v5, %v289_v53  ;;  %v305_v53 = vld [vmem:[%s4007_s12 + $0x1c0] sm:$0xff] }
  0x61   : > { %3288 = vmatpush3.msra.mxu1 %v402_v57  ;;  %3714 = vmatprep.subr.bf16.mxu0 %v3913_v0  ;;  %v290_v57 = vld [vmem:[%s4007_s12 + $0x148] sm:$0xff] }
  0x62   : > { %3197 = vmatmul.mubr.msk.f32.gmra.mrb[22].mxu0 %vm592_vm1, %v498_v56  ;;  %3723 = vmatprep.subr.bf16.mxu1 %v3913_v0  ;;  %v283_v56 = vld [vmem:[%s4007_s12 + $0x110] sm:$0xff]  ;;  %v521_v59 = vmul.f32 %v4123_v11, %v290_v57  ;;  %v438_v57 = vld [vmem:[%s3988_s8 + $0x268] sm:$0xff] }
  0x63   : > { %3232 = vmatmul.mubr.msk.f32.gmra.mrb[22].mxu1 %vm592_vm1, %v505_v58  ;;  %3199 = vmatprep.mubr.msk.f32.mxu0 %vm3914_vm0, %v3915_v1  ;;  %v514_v58 = vmul.f32 %v4123_v11, %v283_v56  ;;  %v432_v56 = vld [vmem:[%s3988_s8 + $0x238] sm:$0xff] }
  0x64   : > { %3234 = vmatprep.mubr.msk.f32.mxu1 %vm3914_vm0, %v3915_v1 }
  0x66   : > { %3200 = vmatmul.mubr.msk.f32.gmra.mrb[24].mxu0 %vm592_vm1, %v499_v62  ;;  %v298_v62 = vld [vmem:[%s4007_s12 + $0x188] sm:$0xff] }
  0x67   : > { %3235 = vmatmul.mubr.msk.f32.gmra.mrb[24].mxu1 %vm592_vm1, %v506_v63  ;;  %3202 = vmatprep.mubr.msk.f32.mxu0 %vm3914_vm0, %v3915_v1  ;;  %v417_v63 = vld [vmem:[%s3988_s8 + $0x1c0] sm:$0xff]  ;;  %v529_v7 = vmul.f32 %v4015_v21, %v298_v62 }
  0x68   : > { %3237 = vmatprep.mubr.msk.f32.mxu1 %vm3914_vm0, %v3915_v1  ;;  %v3733_v8 = vpack.c.bf16 %v418_v2, %v417_v63  ;;  %v306_v63 = vld [vmem:[%s4007_s12 + $0x1c8] sm:$0xff] }
  0x6a   : > { %3203 = vmatmul.mubr.msk.f32.gmra.mrb[26].mxu0 %vm592_vm1, %v500_v4  ;;  %v425_v4 = vld [vmem:[%s3988_s8 + $0x200] sm:$0xff] }
  0x6b   : > { %3238 = vmatmul.mubr.msk.f32.gmra.mrb[26].mxu1 %vm592_vm1, %v507_v6  ;;  %3254 = vmatprep.mubr.msk.f32.mxu0 %vm3914_vm0, %v3915_v1  ;;  %v522_v6 = vmul.f32 %v4015_v21, %v291_v60  ;;  %v3742_v10 = vpack.c.bf16 %v425_v4, %v424_v3  ;;  %v313_v3 = vld [vmem:[%s4007_s12 + $0x200] sm:$0xff] }
  0x6c   : > { %3289 = vmatprep.mubr.msk.f32.mxu1 %vm3914_vm0, %v3915_v1  ;;  %v433_v4 = vld [vmem:[%s3988_s8 + $0x240] sm:$0xff] }
  0x6e   : > { %3255 = vmatmul.mubr.msk.f32.vlgmr.msra.gmra.mrb[28].mxu0 %vm592_vm1, %v508_v14  ;;  %v420_v14 = vld [vmem:[%s3988_s8 + $0x1d8] sm:$0xff] }
  0x6f   : > { %3290 = vmatmul.mubr.msk.f32.vlgmr.msra.gmra.mrb[28].mxu1 %vm592_vm1, %v515_v15  ;;  %3716 = vmatpush3.bf16.msra.mxu0 %v3715_v16  ;;  %v523_v15 = vmul.f32 %v4032_v32, %v292_v9  ;;  %v426_v16 = vld [vmem:[%s3988_s8 + $0x208] sm:$0xff]  ;;  %v3736_v22 = vpack.c.bf16 %v420_v14, %v419_v13  ;;  %v441_v9 = vld [vmem:[%s3988_s8 + $0x280] sm:$0xff] }
  0x70   : > { %3725 = vmatpush3.bf16.msra.mxu1 %v3724_v18  ;;  %3257 = vmatprep.mubr.msk.f32.mxu0 %vm3914_vm0, %v3915_v1  ;;  %v530_v18 = vmul.f32 %v4032_v32, %v299_v12  ;;  %v307_v12 = vld [vmem:[%s4007_s12 + $0x1d0] sm:$0xff]  ;;  %v314_v13 = vld [vmem:[%s4007_s12 + $0x208] sm:$0xff] }
  0x71   : > { %3292 = vmatprep.mubr.msk.f32.mxu1 %vm3914_vm0, %v3915_v1  ;;  %3717 = vmatprep.subr.bf16.mxu0 %v3913_v0 }
  0x72   : > { %3258 = vmatmul.mubr.msk.f32.gmra.mrb[30].mxu0 %vm592_vm1, %v509_v23  ;;  %3726 = vmatprep.subr.bf16.mxu1 %v3913_v0  ;;  %v3745_v23 = vpack.c.bf16 %v427_v17, %v426_v16  ;;  %v435_v16 = vld [vmem:[%s3988_s8 + $0x250] sm:$0xff]  ;;  %v436_v17 = vld [vmem:[%s3988_s8 + $0x258] sm:$0xff] }
  0x73   : > { %3293 = vmatmul.mubr.msk.f32.gmra.mrb[30].mxu1 %vm592_vm1, %v516_v26  ;;  %3260 = vmatprep.mubr.msk.f32.mxu0 %vm3914_vm0, %v3915_v1  ;;  %v524_v26 = vmul.f32 %v4040_v37, %v293_v19  ;;  %v442_v19 = vld [vmem:[%s3988_s8 + $0x288] sm:$0xff]  ;;  %v3757_v25 = vpack.c.bf16 %v436_v17, %v435_v16 }
  0x74   : > { %3295 = vmatprep.mubr.msk.f32.mxu1 %vm3914_vm0, %v3915_v1  ;;  %3719 = vmatpush3.bf16.msra.mxu0 %v3718_v29  ;;  %v531_v29 = vmul.f32 %v4040_v37, %v300_v20  ;;  %v443_v20 = vld [vmem:[%s3988_s8 + $0x290] sm:$0xff] }
  0x75   : > { %3728 = vmatpush3.bf16.msra.mxu1 %v3727_v30  ;;  %3720 = vmatprep.subr.bf16.mxu0 %v3913_v0  ;;  %v294_v30 = vld [vmem:[%s4007_s12 + $0x168] sm:$0xff] }
  0x76   : > { %3261 = vmatmul.mubr.msk.f32.gmra.mrb[32].mxu0 %vm592_vm1, %v510_v34  ;;  %3729 = vmatprep.subr.bf16.mxu1 %v3913_v0  ;;  %v3748_v34 = vpack.c.bf16 %v429_v28, %v428_v27  ;;  %v525_v35 = vmul.f32 %v4061_v48, %v294_v30  ;;  %v546_v28 = vmul.f32 %v4061_v48, %v315_v24  ;;  %v316_v30 = vld [vmem:[%s4007_s12 + $0x218] sm:$0xff] }
  0x77   : > { %3296 = vmatmul.mubr.msk.f32.gmra.mrb[32].mxu1 %vm592_vm1, %v517_v38  ;;  %3263 = vmatprep.mubr.msk.f32.mxu0 %vm3914_vm0, %v3915_v1  ;;  %v295_v38 = vld [vmem:[%s4007_s12 + $0x170] sm:$0xff]  ;;  %v324_v24 = vld [vmem:[%s4007_s12 + $0x258] sm:$0xff] }
  0x78   : > { %3298 = vmatprep.mubr.msk.f32.mxu1 %vm3914_vm0, %v3915_v1  ;;  %3722 = vmatpush3.bf16.msra.mxu0 %v3721_v41  ;;  %v526_v41 = vmul.f32 %v4087_v61, %v295_v38  ;;  %v317_v38 = vld [vmem:[%s4007_s12 + $0x220] sm:$0xff] }
  0x79   : > { %3731 = vmatpush3.bf16.msra.mxu1 %v3730_v42  ;;  %3322 = vmatprep.subr.mxu0 %v3915_v1  ;;  %v430_v42 = vld [vmem:[%s3988_s8 + $0x228] sm:$0xff] }
  0x7a   : > { %3264 = vmatmul.mubr.msk.f32.gmra.mrb[34].mxu0 %vm592_vm1, %v511_v43  ;;  %3357 = vmatprep.subr.mxu1 %v3915_v1  ;;  %v533_v43 = vmul.f32 %v4087_v61, %v302_v39 }
  0x7b   : > { %3299 = vmatmul.mubr.msk.f32.gmra.mrb[34].mxu1 %vm592_vm1, %v518_v44  ;;  %3266 = vmatprep.mubr.msk.f32.mxu0 %vm3914_vm0, %v3915_v1  ;;  %v296_v44 = vld [vmem:[%s4007_s12 + $0x178] sm:$0xff] }
  0x7c   : > { %3301 = vmatprep.mubr.msk.f32.mxu1 %vm3914_vm0, %v3915_v1  ;;  %3323 = vmatpush3.msra.mxu0 %v409_v47  ;;  %v527_v46 = vmul.f32 %v4105_v5, %v296_v44  ;;  %v534_v47 = vmul.f32 %v4105_v5, %v303_v45  ;;  %v319_v45 = vld [vmem:[%s4007_s12 + $0x230] sm:$0xff] }
  0x7d   : > { %3358 = vmatpush3.msra.mxu1 %v416_v50  ;;  %3732 = vmatprep.subr.bf16.mxu0 %v3913_v0  ;;  %v304_v50 = vld [vmem:[%s4007_s12 + $0x1b8] sm:$0xff] }
  0x7e   : > { %3267 = vmatmul.mubr.msk.f32.gmra.mrb[36].mxu0 %vm592_vm1, %v512_v49  ;;  %3741 = vmatprep.subr.bf16.mxu1 %v3913_v0  ;;  %v297_v49 = vld [vmem:[%s4007_s12 + $0x180] sm:$0xff]  ;;  %v535_v52 = vmul.f32 %v4123_v11, %v304_v50  ;;  %v452_v50 = vld [vmem:[%s3988_s8 + $0x2d8] sm:$0xff] }
  0x7f   : > { %3302 = vmatmul.mubr.msk.f32.gmra.mrb[36].mxu1 %vm592_vm1, %v519_v51  ;;  %3269 = vmatprep.mubr.msk.f32.mxu0 %vm3914_vm0, %v3915_v1  ;;  %v528_v51 = vmul.f32 %v4123_v11, %v297_v49  ;;  %v446_v49 = vld [vmem:[%s3988_s8 + $0x2a8] sm:$0xff] }
  0x80   : > { %3304 = vmatprep.mubr.msk.f32.mxu1 %vm3914_vm0, %v3915_v1 }
  0x82   : > { %3270 = vmatmul.mubr.msk.f32.gmra.mrb[38].mxu0 %vm592_vm1, %v513_v54  ;;  %v312_v54 = vld [vmem:[%s4007_s12 + $0x1f8] sm:$0xff] }
  0x83   : > { %3305 = vmatmul.mubr.msk.f32.gmra.mrb[38].mxu1 %vm592_vm1, %v520_v55  ;;  %3272 = vmatprep.mubr.msk.f32.mxu0 %vm3914_vm0, %v3915_v1  ;;  %v431_v55 = vld [vmem:[%s3988_s8 + $0x230] sm:$0xff]  ;;  %v543_v60 = vmul.f32 %v4015_v21, %v312_v54 }
  0x84   : > { %3307 = vmatprep.mubr.msk.f32.mxu1 %vm3914_vm0, %v3915_v1  ;;  %v3751_v62 = vpack.c.bf16 %v432_v56, %v431_v55  ;;  %v320_v55 = vld [vmem:[%s4007_s12 + $0x238] sm:$0xff] }
  0x86   : > { %3273 = vmatmul.mubr.msk.f32.gmra.mrb[40].mxu0 %vm592_vm1, %v514_v58  ;;  %v439_v58 = vld [vmem:[%s3988_s8 + $0x270] sm:$0xff] }
  0x87   : > { %3308 = vmatmul.mubr.msk.f32.gmra.mrb[40].mxu1 %vm592_vm1, %v521_v59  ;;  %3324 = vmatprep.mubr.msk.f32.mxu0 %vm3914_vm0, %v3915_v1  ;;  %v536_v59 = vmul.f32 %v4015_v21, %v305_v53  ;;  %v3760_v2 = vpack.c.bf16 %v439_v58, %v438_v57  ;;  %v327_v57 = vld [vmem:[%s4007_s12 + $0x270] sm:$0xff] }
  0x88   : > { %3359 = vmatprep.mubr.msk.f32.mxu1 %vm3914_vm0, %v3915_v1  ;;  %v447_v58 = vld [vmem:[%s3988_s8 + $0x2b0] sm:$0xff] }
  0x8a   : > { %3325 = vmatmul.mubr.msk.f32.vlgmr.msra.gmra.mrb[42].mxu0 %vm592_vm1, %v522_v6  ;;  %v434_v6 = vld [vmem:[%s3988_s8 + $0x248] sm:$0xff] }
  0x8b   : > { %3360 = vmatmul.mubr.msk.f32.vlgmr.msra.gmra.mrb[42].mxu1 %vm592_vm1, %v529_v7  ;;  %3734 = vmatpush3.bf16.msra.mxu0 %v3733_v8  ;;  %v537_v7 = vmul.f32 %v4032_v32, %v306_v63  ;;  %v440_v8 = vld [vmem:[%s3988_s8 + $0x278] sm:$0xff]  ;;  %v3754_v14 = vpack.c.bf16 %v434_v6, %v433_v4  ;;  %v455_v63 = vld [vmem:[%s3988_s8 + $0x2f0] sm:$0xff] }
  0x8c   : > { %3743 = vmatpush3.bf16.msra.mxu1 %v3742_v10  ;;  %3327 = vmatprep.mubr.msk.f32.mxu0 %vm3914_vm0, %v3915_v1  ;;  %v544_v10 = vmul.f32 %v4032_v32, %v313_v3  ;;  %v328_v3 = vld [vmem:[%s4007_s12 + $0x278] sm:$0xff] }
  0x8d   : > { %3362 = vmatprep.mubr.msk.f32.mxu1 %vm3914_vm0, %v3915_v1  ;;  %3735 = vmatprep.subr.bf16.mxu0 %v3913_v0 }
  0x8e   : > { %3328 = vmatmul.mubr.msk.f32.gmra.mrb[44].mxu0 %vm592_vm1, %v523_v15  ;;  %3744 = vmatprep.subr.bf16.mxu1 %v3913_v0  ;;  %v3763_v15 = vpack.c.bf16 %v441_v9, %v440_v8  ;;  %v450_v8 = vld [vmem:[%s3988_s8 + $0x2c8] sm:$0xff]  ;;  %v456_v9 = vld [vmem:[%s3988_s8 + $0x2f8] sm:$0xff] }
  0x8f   : > { %3363 = vmatmul.mubr.msk.f32.gmra.mrb[44].mxu1 %vm592_vm1, %v530_v18  ;;  %3330 = vmatprep.mubr.msk.f32.mxu0 %vm3914_vm0, %v3915_v1  ;;  %v538_v18 = vmul.f32 %v4040_v37, %v307_v12  ;;  %v559_v12 = vmul.f32 %v4040_v37, %v328_v3 }
  0x90   : > { %3365 = vmatprep.mubr.msk.f32.mxu1 %vm3914_vm0, %v3915_v1  ;;  %3737 = vmatpush3.bf16.msra.mxu0 %v3736_v22  ;;  %v545_v22 = vmul.f32 %v4040_v37, %v314_v13  ;;  %v322_v13 = vld [vmem:[%s4007_s12 + $0x248] sm:$0xff] }
  0x91   : > { %3746 = vmatpush3.bf16.msra.mxu1 %v3745_v23  ;;  %3738 = vmatprep.subr.bf16.mxu0 %v3913_v0  ;;  %v308_v23 = vld [vmem:[%s4007_s12 + $0x1d8] sm:$0xff]  ;;  %v553_v17 = vmul.f32 %v4061_v48, %v322_v13 }
  0x92   : > { %3331 = vmatmul.mubr.msk.f32.gmra.mrb[46].mxu0 %vm592_vm1, %v524_v26  ;;  %3747 = vmatprep.subr.bf16.mxu1 %v3913_v0  ;;  %v3766_v26 = vpack.c.bf16 %v443_v20, %v442_v19  ;;  %v539_v27 = vmul.f32 %v4061_v48, %v308_v23  ;;  %v330_v19 = vld [vmem:[%s4007_s12 + $0x288] sm:$0xff]  ;;  %v451_v20 = vld [vmem:[%s3988_s8 + $0x2d0] sm:$0xff]  ;;  %v472_v13 = vld [vmem:[%s3988_s8 + $0x378] sm:$0xff] }
  0x93   : > { %3366 = vmatmul.mubr.msk.f32.gmra.mrb[46].mxu1 %vm592_vm1, %v531_v29  ;;  %3333 = vmatprep.mubr.msk.f32.mxu0 %vm3914_vm0, %v3915_v1  ;;  %v309_v29 = vld [vmem:[%s4007_s12 + $0x1e0] sm:$0xff]  ;;  %v458_v23 = vld [vmem:[%s3988_s8 + $0x308] sm:$0xff] }
  0x94   : > { %3368 = vmatprep.mubr.msk.f32.mxu1 %vm3914_vm0, %v3915_v1  ;;  %3740 = vmatpush3.bf16.msra.mxu0 %v3739_v33  ;;  %v540_v33 = vmul.f32 %v4087_v61, %v309_v29 }
  0x95   : > { %3749 = vmatpush3.bf16.msra.mxu1 %v3748_v34  ;;  %3392 = vmatprep.subr.mxu0 %v3915_v1  ;;  %v444_v34 = vld [vmem:[%s3988_s8 + $0x298] sm:$0xff] }
  0x96   : > { %3334 = vmatmul.mubr.msk.f32.gmra.mrb[48].mxu0 %vm592_vm1, %v525_v35  ;;  %3427 = vmatprep.subr.mxu1 %v3915_v1  ;;  %v547_v35 = vmul.f32 %v4087_v61, %v316_v30 }
  0x97   : > { %3369 = vmatmul.mubr.msk.f32.gmra.mrb[48].mxu1 %vm592_vm1, %v532_v36  ;;  %3336 = vmatprep.mubr.msk.f32.mxu0 %vm3914_vm0, %v3915_v1  ;;  %v310_v36 = vld [vmem:[%s4007_s12 + $0x1e8] sm:$0xff] }
  0x98   : > { %3371 = vmatprep.mubr.msk.f32.mxu1 %vm3914_vm0, %v3915_v1  ;;  %3393 = vmatpush3.msra.mxu0 %v423_v40  ;;  %v541_v39 = vmul.f32 %v4105_v5, %v310_v36  ;;  %v548_v40 = vmul.f32 %v4105_v5, %v317_v38  ;;  %v467_v36 = vld [vmem:[%s3988_s8 + $0x350] sm:$0xff]  ;;  %v4608_v38 = vld [vmem:[%s5043_s2] sm:$0xff] }
  0x99   : > { %3428 = vmatpush3.msra.mxu1 %v430_v42  ;;  %3750 = vmatprep.subr.bf16.mxu0 %v3913_v0  ;;  %v318_v42 = vld [vmem:[%s4007_s12 + $0x228] sm:$0xff] }
  0x9a   : > { %3337 = vmatmul.mubr.msk.f32.gmra.mrb[50].mxu0 %vm592_vm1, %v526_v41  ;;  %3759 = vmatprep.subr.bf16.mxu1 %v3913_v0  ;;  %v311_v41 = vld [vmem:[%s4007_s12 + $0x1f0] sm:$0xff]  ;;  %v549_v44 = vmul.f32 %v4123_v11, %v318_v42 }
  0x9b   : > { %3372 = vmatmul.mubr.msk.f32.gmra.mrb[50].mxu1 %vm592_vm1, %v533_v43  ;;  %3339 = vmatprep.mubr.msk.f32.mxu0 %vm3914_vm0, %v3915_v1  ;;  %v542_v43 = vmul.f32 %v4123_v11, %v311_v41  ;;  %v334_v41 = vld [vmem:[%s4007_s12 + $0x2a8] sm:$0xff] }
  0x9c   : > { %3374 = vmatprep.mubr.msk.f32.mxu1 %vm3914_vm0, %v3915_v1 }
  0x9e   : > { %3340 = vmatmul.mubr.msk.f32.gmra.mrb[52].mxu0 %vm592_vm1, %v527_v46  ;;  %v326_v46 = vld [vmem:[%s4007_s12 + $0x268] sm:$0xff] }
  0x9f   : > { %3375 = vmatmul.mubr.msk.f32.gmra.mrb[52].mxu1 %vm592_vm1, %v534_v47  ;;  %3342 = vmatprep.mubr.msk.f32.mxu0 %vm3914_vm0, %v3915_v1  ;;  %v445_v47 = vld [vmem:[%s3988_s8 + $0x2a0] sm:$0xff]  ;;  %v557_v53 = vmul.f32 %v4015_v21, %v326_v46  ;;  %v4625_v46 = vld [vmem:[%s5043_s2 + $0x8] sm:$0xff] }
  0xa0   : > { %3377 = vmatprep.mubr.msk.f32.mxu1 %vm3914_vm0, %v3915_v1  ;;  %v3769_v54 = vpack.c.bf16 %v446_v49, %v445_v47  ;;  %v565_v47 = vmul.f32 %v4625_v46, %v334_v41  ;;  %v468_v49 = vld [vmem:[%s3988_s8 + $0x358] sm:$0xff] }
  0xa2   : > { %3343 = vmatmul.mubr.msk.f32.gmra.mrb[54].mxu0 %vm592_vm1, %v528_v51  ;;  %v453_v51 = vld [vmem:[%s3988_s8 + $0x2e0] sm:$0xff] }
  0xa3   : > { %3378 = vmatmul.mubr.msk.f32.gmra.mrb[54].mxu1 %vm592_vm1, %v535_v52  ;;  %3394 = vmatprep.mubr.msk.f32.mxu0 %vm3914_vm0, %v3915_v1  ;;  %v550_v52 = vmul.f32 %v4015_v21, %v319_v45  ;;  %v3778_v56 = vpack.c.bf16 %v453_v51, %v452_v50  ;;  %v558_v21 = vmul.f32 %v4032_v32, %v327_v57  ;;  %v462_v45 = vld [vmem:[%s3988_s8 + $0x328] sm:$0xff]  ;;  %v469_v50 = vld [vmem:[%s3988_s8 + $0x360] sm:$0xff]  ;;  %v464_v57 = vld [vmem:[%s3988_s8 + $0x338] sm:$0xff] }
  0xa4   : > { %3429 = vmatprep.mubr.msk.f32.mxu1 %vm3914_vm0, %v3915_v1 }
  0xa6   : > { %3395 = vmatmul.mubr.msk.f32.vlgmr.msra.gmra.mrb[56].mxu0 %vm592_vm1, %v536_v59  ;;  %v448_v59 = vld [vmem:[%s3988_s8 + $0x2b8] sm:$0xff] }
  0xa7   : > { %3430 = vmatmul.mubr.msk.f32.vlgmr.msra.gmra.mrb[56].mxu1 %vm592_vm1, %v543_v60  ;;  %3752 = vmatpush3.bf16.msra.mxu0 %v3751_v62  ;;  %v551_v60 = vmul.f32 %v4032_v32, %v320_v55  ;;  %v454_v62 = vld [vmem:[%s3988_s8 + $0x2e8] sm:$0xff]  ;;  %v3772_v4 = vpack.c.bf16 %v448_v59, %v447_v58  ;;  %v3799_v55 = vpack.c.bf16 %v469_v50, %v468_v49  ;;  %v4646_v58 = vld [vmem:[%s5043_s2 + $0x10] sm:$0xff] }
  0xa8   : > { %3761 = vmatpush3.bf16.msra.mxu1 %v3760_v2  ;;  %3397 = vmatprep.mubr.msk.f32.mxu0 %vm3914_vm0, %v3915_v1  ;;  %v321_v2 = vld [vmem:[%s4007_s12 + $0x240] sm:$0xff]  ;;  %v3781_v6 = vpack.c.bf16 %v455_v63, %v454_v62  ;;  %v471_v62 = vld [vmem:[%s3988_s8 + $0x370] sm:$0xff] }
  0xa9   : > { %3432 = vmatprep.mubr.msk.f32.mxu1 %vm3914_vm0, %v3915_v1  ;;  %3753 = vmatprep.subr.bf16.mxu0 %v3913_v0  ;;  %v552_v32 = vmul.f32 %v4040_v37, %v321_v2  ;;  %v343_v2 = vld [vmem:[%s4007_s12 + $0x2f0] sm:$0xff] }
  0xaa   : > { %3398 = vmatmul.mubr.msk.f32.gmra.mrb[58].mxu0 %vm592_vm1, %v537_v7  ;;  %3762 = vmatprep.subr.bf16.mxu1 %v3913_v0  ;;  %v449_v7 = vld [vmem:[%s3988_s8 + $0x2c0] sm:$0xff] }
  0xab   : > { %3433 = vmatmul.mubr.msk.f32.gmra.mrb[58].mxu1 %vm592_vm1, %v544_v10  ;;  %3400 = vmatprep.mubr.msk.f32.mxu0 %vm3914_vm0, %v3915_v1  ;;  %v457_v10 = vld [vmem:[%s3988_s8 + $0x300] sm:$0xff] }
  0xac   : > { %3435 = vmatprep.mubr.msk.f32.mxu1 %vm3914_vm0, %v3915_v1  ;;  %3755 = vmatpush3.bf16.msra.mxu0 %v3754_v14  ;;  %v329_v14 = vld [vmem:[%s4007_s12 + $0x280] sm:$0xff]  ;;  %v3784_v16 = vpack.c.bf16 %v457_v10, %v456_v9  ;;  %v344_v9 = vld [vmem:[%s4007_s12 + $0x2f8] sm:$0xff] }
  0xad   : > { %3764 = vmatpush3.bf16.msra.mxu1 %v3763_v15  ;;  %3756 = vmatprep.subr.bf16.mxu0 %v3913_v0  ;;  %v3775_v15 = vpack.c.bf16 %v450_v8, %v449_v7  ;;  %v560_v37 = vmul.f32 %v4061_v48, %v329_v14  ;;  %v561_v48 = vmul.f32 %v4087_v61, %v330_v19  ;;  %v465_v10 = vld [vmem:[%s3988_s8 + $0x340] sm:$0xff]  ;;  %v339_v19 = vld [vmem:[%s4007_s12 + $0x2d0] sm:$0xff] }
  0xae   : > { %3401 = vmatmul.mubr.msk.f32.gmra.mrb[60].mxu0 %vm592_vm1, %v538_v18  ;;  %3765 = vmatprep.subr.bf16.mxu1 %v3913_v0  ;;  %v323_v18 = vld [vmem:[%s4007_s12 + $0x250] sm:$0xff] }
  0xaf   : > { %3436 = vmatmul.mubr.msk.f32.gmra.mrb[60].mxu1 %vm592_vm1, %v545_v22  ;;  %3403 = vmatprep.mubr.msk.f32.mxu0 %vm3914_vm0, %v3915_v1  ;;  %v554_v22 = vmul.f32 %v4087_v61, %v323_v18 }
  0xb0   : > { %3438 = vmatprep.mubr.msk.f32.mxu1 %vm3914_vm0, %v3915_v1  ;;  %3758 = vmatpush3.bf16.msra.mxu0 %v3757_v25  ;;  %v331_v25 = vld [vmem:[%s4007_s12 + $0x290] sm:$0xff] }
  0xb1   : > { %3767 = vmatpush3.bf16.msra.mxu1 %v3766_v26  ;;  %3462 = vmatprep.subr.mxu0 %v3915_v1  ;;  %v555_v26 = vmul.f32 %v4105_v5, %v324_v24  ;;  %v562_v61 = vmul.f32 %v4105_v5, %v331_v25  ;;  %v340_v5 = vld [vmem:[%s4007_s12 + $0x2d8] sm:$0xff]  ;;  %v347_v24 = vld [vmem:[%s4007_s12 + $0x310] sm:$0xff]  ;;  %v354_v25 = vld [vmem:[%s4007_s12 + $0x348] sm:$0xff] }
  0xb2   : > { %3404 = vmatmul.mubr.msk.f32.gmra.mrb[62].mxu0 %vm592_vm1, %v539_v27  ;;  %3497 = vmatprep.subr.mxu1 %v3915_v1  ;;  %v325_v27 = vld [vmem:[%s4007_s12 + $0x260] sm:$0xff] }
  0xb3   : > { %3439 = vmatmul.mubr.msk.f32.gmra.mrb[62].mxu1 %vm592_vm1, %v546_v28  ;;  %3406 = vmatprep.mubr.msk.f32.mxu0 %vm3914_vm0, %v3915_v1  ;;  %v332_v28 = vld [vmem:[%s4007_s12 + $0x298] sm:$0xff]  ;;  %v556_v29 = vmul.f32 %v4123_v11, %v325_v27 }
  0xb4   : > { %3441 = vmatprep.mubr.msk.f32.mxu1 %vm3914_vm0, %v3915_v1  ;;  %3463 = vmatpush3.msra.mxu0 %v437_v31  ;;  %v563_v30 = vmul.f32 %v4123_v11, %v332_v28  ;;  %v333_v31 = vld [vmem:[%s4007_s12 + $0x2a0] sm:$0xff]  ;;  %v348_v27 = vld [vmem:[%s4007_s12 + $0x318] sm:$0xff]  ;;  %v355_v28 = vld [vmem:[%s4007_s12 + $0x350] sm:$0xff] }
  0xb5   : > { %3498 = vmatpush3.msra.mxu1 %v444_v34  ;;  %3768 = vmatprep.subr.bf16.mxu0 %v3913_v0  ;;  %v460_v34 = vld [vmem:[%s3988_s8 + $0x318] sm:$0xff]  ;;  %v564_v11 = vmul.f32 %v4608_v38, %v333_v31  ;;  %v349_v31 = vld [vmem:[%s4007_s12 + $0x320] sm:$0xff] }
  0xb6   : > { %3407 = vmatmul.mubr.msk.f32.gmra.mrb[64].mxu0 %vm592_vm1, %v540_v33  ;;  %3777 = vmatprep.subr.bf16.mxu1 %v3913_v0  ;;  %v459_v33 = vld [vmem:[%s3988_s8 + $0x310] sm:$0xff] }
  0xb7   : > { %3442 = vmatmul.mubr.msk.f32.gmra.mrb[64].mxu1 %vm592_vm1, %v547_v35  ;;  %3409 = vmatprep.mubr.msk.f32.mxu0 %vm3914_vm0, %v3915_v1  ;;  %v466_v35 = vld [vmem:[%s3988_s8 + $0x348] sm:$0xff] }
  0xb8   : > { %3444 = vmatprep.mubr.msk.f32.mxu1 %vm3914_vm0, %v3915_v1  ;;  %v3796_v42 = vpack.c.bf16 %v467_v36, %v466_v35  ;;  %v350_v35 = vld [vmem:[%s4007_s12 + $0x328] sm:$0xff]  ;;  %v357_v36 = vld [vmem:[%s4007_s12 + $0x360] sm:$0xff] }
  0xba   : > { %3410 = vmatmul.mubr.msk.f32.gmra.mrb[66].mxu0 %vm592_vm1, %v541_v39  ;;  %v571_v39 = vmul.f32 %v4608_v38, %v340_v5  ;;  %v356_v5 = vld [vmem:[%s4007_s12 + $0x358] sm:$0xff] }
  0xbb   : > { %3445 = vmatmul.mubr.msk.f32.gmra.mrb[66].mxu1 %vm592_vm1, %v548_v40  ;;  %3412 = vmatprep.mubr.msk.f32.mxu0 %vm3914_vm0, %v3915_v1  ;;  %v3787_v40 = vpack.c.bf16 %v460_v34, %v459_v33  ;;  %v580_v33 = vmul.f32 %v4646_v58, %v349_v31  ;;  %v587_v34 = vmul.f32 %v4646_v58, %v356_v5 }
  0xbc   : > { %3447 = vmatprep.mubr.msk.f32.mxu1 %vm3914_vm0, %v3915_v1 }
  0xbe   : > { %3413 = vmatmul.mubr.msk.f32.gmra.mrb[68].mxu0 %vm592_vm1, %v542_v43  ;;  %v341_v43 = vld [vmem:[%s4007_s12 + $0x2e0] sm:$0xff] }
  0xbf   : > { %3448 = vmatmul.mubr.msk.f32.gmra.mrb[68].mxu1 %vm592_vm1, %v549_v44  ;;  %3464 = vmatprep.mubr.msk.f32.mxu0 %vm3914_vm0, %v3915_v1  ;;  %v461_v44 = vld [vmem:[%s3988_s8 + $0x320] sm:$0xff]  ;;  %v572_v51 = vmul.f32 %v4625_v46, %v341_v43  ;;  %v352_v43 = vld [vmem:[%s4007_s12 + $0x338] sm:$0xff] }
  0xc0   : > { %3499 = vmatprep.mubr.msk.f32.mxu1 %vm3914_vm0, %v3915_v1 }
  0xc2   : > { %3465 = vmatmul.mubr.msk.f32.vlgmr.msra.gmra.mrb[70].mxu0 %vm592_vm1, %v550_v52  ;;  %v335_v52 = vld [vmem:[%s4007_s12 + $0x2b0] sm:$0xff] }
  0xc3   : > { %3500 = vmatmul.mubr.msk.f32.vlgmr.msra.gmra.mrb[70].mxu1 %vm592_vm1, %v557_v53  ;;  %3770 = vmatpush3.bf16.msra.mxu0 %v3769_v54  ;;  %v342_v53 = vld [vmem:[%s4007_s12 + $0x2e8] sm:$0xff]  ;;  %v3790_v54 = vpack.c.bf16 %v462_v45, %v461_v44  ;;  %v566_v59 = vmul.f32 %v4646_v58, %v335_v52  ;;  %v359_v44 = vld [vmem:[%s4007_s12 + $0x370] sm:$0xff]  ;;  %v353_v52 = vld [vmem:[%s4007_s12 + $0x340] sm:$0xff] }
  0xc4   : > { %3779 = vmatpush3.bf16.msra.mxu1 %v3778_v56  ;;  %3467 = vmatprep.mubr.msk.f32.mxu0 %vm3914_vm0, %v3915_v1  ;;  %v463_v56 = vld [vmem:[%s3988_s8 + $0x330] sm:$0xff]  ;;  %v573_v63 = vmul.f32 %v4646_v58, %v342_v53  ;;  %v360_v53 = vld [vmem:[%s4007_s12 + $0x378] sm:$0xff] }
  0xc5   : > { %3502 = vmatprep.mubr.msk.f32.mxu1 %vm3914_vm0, %v3915_v1  ;;  %3771 = vmatprep.subr.bf16.mxu0 %v3913_v0  ;;  %v3793_v3 = vpack.c.bf16 %v464_v57, %v463_v56 }
  0xc6   : > { %3468 = vmatmul.mubr.msk.f32.gmra.mrb[72].mxu0 %vm592_vm1, %v551_v60  ;;  %3780 = vmatprep.subr.bf16.mxu1 %v3913_v0  ;;  %v470_v60 = vld [vmem:[%s3988_s8 + $0x368] sm:$0xff] }
  0xc7   : > { %3503 = vmatmul.mubr.msk.f32.gmra.mrb[72].mxu1 %vm592_vm1, %v558_v21  ;;  %3470 = vmatprep.mubr.msk.f32.mxu0 %vm3914_vm0, %v3915_v1  ;;  %v336_v21 = vld [vmem:[%s4007_s12 + $0x2b8] sm:$0xff] }
  0xc8   : > { %3505 = vmatprep.mubr.msk.f32.mxu1 %vm3914_vm0, %v3915_v1  ;;  %3773 = vmatpush3.bf16.msra.mxu0 %v3772_v4  ;;  %v3802_v4 = vpack.c.bf16 %v471_v62, %v470_v60 }
  0xc9   : > { %3782 = vmatpush3.bf16.msra.mxu1 %v3781_v6  ;;  %3774 = vmatprep.subr.bf16.mxu0 %v3913_v0  ;;  %v4664_v6 = vld [vmem:[%s5043_s2 + $0x18] sm:$0xff] }
  0xca   : > { %3471 = vmatmul.mubr.msk.f32.gmra.mrb[74].mxu0 %vm592_vm1, %v552_v32  ;;  %3783 = vmatprep.subr.bf16.mxu1 %v3913_v0  ;;  %v567_v7 = vmul.f32 %v4664_v6, %v336_v21  ;;  %v574_v8 = vmul.f32 %v4664_v6, %v343_v2  ;;  %v337_v32 = vld [vmem:[%s4007_s12 + $0x2c0] sm:$0xff] }
  0xcb   : > { %3506 = vmatmul.mubr.msk.f32.gmra.mrb[74].mxu1 %vm592_vm1, %v559_v12  ;;  %3473 = vmatprep.mubr.msk.f32.mxu0 %vm3914_vm0, %v3915_v1 }
  0xcc   : > { %3508 = vmatprep.mubr.msk.f32.mxu1 %vm3914_vm0, %v3915_v1  ;;  %3776 = vmatpush3.bf16.msra.mxu0 %v3775_v15  ;;  %v338_v15 = vld [vmem:[%s4007_s12 + $0x2c8] sm:$0xff] }
  0xcd   : > { %3785 = vmatpush3.bf16.msra.mxu1 %v3784_v16  ;;  %3532 = vmatprep.subr.mxu0 %v3915_v1  ;;  %v345_v16 = vld [vmem:[%s4007_s12 + $0x300] sm:$0xff] }
  0xce   : > { %3474 = vmatmul.mubr.msk.f32.gmra.mrb[76].mxu0 %vm592_vm1, %v553_v17  ;;  %3567 = vmatprep.subr.mxu1 %v3915_v1  ;;  %v4699_v17 = vld [vmem:[%s5043_s2 + $0x28] sm:$0xff] }
  0xcf   : > { %3509 = vmatmul.mubr.msk.f32.gmra.mrb[76].mxu1 %vm592_vm1, %v560_v37  ;;  %3476 = vmatprep.mubr.msk.f32.mxu0 %vm3914_vm0, %v3915_v1  ;;  %v569_v37 = vmul.f32 %v4699_v17, %v338_v15  ;;  %v576_v18 = vmul.f32 %v4699_v17, %v345_v16  ;;  %v583_v49 = vmul.f32 %v4699_v17, %v352_v43 }
  0xd0   : > { %3511 = vmatprep.mubr.msk.f32.mxu1 %vm3914_vm0, %v3915_v1  ;;  %3533 = vmatpush3.msra.mxu0 %v451_v20  ;;  %v346_v20 = vld [vmem:[%s4007_s12 + $0x308] sm:$0xff] }
  0xd1   : > { %3568 = vmatpush3.msra.mxu1 %v458_v23  ;;  %3786 = vmatprep.subr.bf16.mxu0 %v3913_v0 }
  0xd2   : > { %3477 = vmatmul.mubr.msk.f32.gmra.mrb[78].mxu0 %vm592_vm1, %v554_v22  ;;  %3795 = vmatprep.subr.bf16.mxu1 %v3913_v0  ;;  %v4714_v22 = vld [vmem:[%s5043_s2 + $0x30] sm:$0xff] }
  0xd3   : > { %3512 = vmatmul.mubr.msk.f32.gmra.mrb[78].mxu1 %vm592_vm1, %v561_v48  ;;  %3479 = vmatprep.mubr.msk.f32.mxu0 %vm3914_vm0, %v3915_v1  ;;  %v570_v23 = vmul.f32 %v4714_v22, %v339_v19  ;;  %v577_v48 = vmul.f32 %v4714_v22, %v346_v20  ;;  %v584_v57 = vmul.f32 %v4714_v22, %v353_v52 }
  0xd4   : > { %3514 = vmatprep.mubr.msk.f32.mxu1 %vm3914_vm0, %v3915_v1 }
  0xd6   : > { %3480 = vmatmul.mubr.msk.f32.gmra.mrb[80].mxu0 %vm592_vm1, %v555_v26  ;;  %v578_v26 = vmul.f32 %v4608_v38, %v347_v24 }
  0xd7   : > { %3515 = vmatmul.mubr.msk.f32.gmra.mrb[80].mxu1 %vm592_vm1, %v562_v61  ;;  %3482 = vmatprep.mubr.msk.f32.mxu0 %vm3914_vm0, %v3915_v1  ;;  %v585_v61 = vmul.f32 %v4608_v38, %v354_v25  ;;  %v581_v38 = vmul.f32 %v4664_v6, %v350_v35 }
  0xd8   : > { %3517 = vmatprep.mubr.msk.f32.mxu1 %vm3914_vm0, %v3915_v1 }
  0xda   : > { %3483 = vmatmul.mubr.msk.f32.gmra.mrb[82].mxu0 %vm592_vm1, %v556_v29  ;;  %v579_v29 = vmul.f32 %v4625_v46, %v348_v27 }
  0xdb   : > { %3518 = vmatmul.mubr.msk.f32.gmra.mrb[82].mxu1 %vm592_vm1, %v563_v30  ;;  %3534 = vmatprep.mubr.msk.f32.mxu0 %vm3914_vm0, %v3915_v1  ;;  %v586_v30 = vmul.f32 %v4625_v46, %v355_v28 }
  0xdc   : > { %3569 = vmatprep.mubr.msk.f32.mxu1 %vm3914_vm0, %v3915_v1 }
  0xde   : > { %3535 = vmatmul.mubr.msk.f32.vlgmr.msra.gmra.mrb[84].mxu0 %vm592_vm1, %v564_v11  ;;  %v588_v11 = vmul.f32 %v4664_v6, %v357_v36 }
  0xdf   : > { %3570 = vmatmul.mubr.msk.f32.vlgmr.msra.gmra.mrb[84].mxu1 %vm592_vm1, %v571_v39  ;;  %3788 = vmatpush3.bf16.msra.mxu0 %v3787_v40  ;;  %v351_v39 = vld [vmem:[%s4007_s12 + $0x330] sm:$0xff]  ;;  %v358_v40 = vld [vmem:[%s4007_s12 + $0x368] sm:$0xff] }
  0xe0   : > { %3797 = vmatpush3.bf16.msra.mxu1 %v3796_v42  ;;  %3537 = vmatprep.mubr.msk.f32.mxu0 %vm3914_vm0, %v3915_v1 }
  0xe1   : > { %3572 = vmatprep.mubr.msk.f32.mxu1 %vm3914_vm0, %v3915_v1  ;;  %3789 = vmatprep.subr.bf16.mxu0 %v3913_v0 }
  0xe2   : > { %3538 = vmatmul.mubr.msk.f32.gmra.mrb[86].mxu0 %vm592_vm1, %v565_v47  ;;  %3798 = vmatprep.subr.bf16.mxu1 %v3913_v0 }
  0xe3   : > { %3573 = vmatmul.mubr.msk.f32.gmra.mrb[86].mxu1 %vm592_vm1, %v572_v51  ;;  %3540 = vmatprep.mubr.msk.f32.mxu0 %vm3914_vm0, %v3915_v1  ;;  %v590_v51 = vmul.f32 %v4699_v17, %v359_v44 }
  0xe4   : > { %3575 = vmatprep.mubr.msk.f32.mxu1 %vm3914_vm0, %v3915_v1  ;;  %3791 = vmatpush3.bf16.msra.mxu0 %v3790_v54 }
  0xe5   : > { %3800 = vmatpush3.bf16.msra.mxu1 %v3799_v55  ;;  %3792 = vmatprep.subr.bf16.mxu0 %v3913_v0 }
  0xe6   : > { %3541 = vmatmul.mubr.msk.f32.gmra.mrb[88].mxu0 %vm592_vm1, %v566_v59  ;;  %3801 = vmatprep.subr.bf16.mxu1 %v3913_v0  ;;  %v4682_v0 = vld [vmem:[%s5043_s2 + $0x20] sm:$0xff]  ;;  %v591_v59 = vmul.f32 %v4714_v22, %v360_v53 }
  0xe7   : > { %3576 = vmatmul.mubr.msk.f32.gmra.mrb[88].mxu1 %vm592_vm1, %v573_v63  ;;  %3543 = vmatprep.mubr.msk.f32.mxu0 %vm3914_vm0, %v3915_v1  ;;  %v568_v12 = vmul.f32 %v4682_v0, %v337_v32  ;;  %v575_v14 = vmul.f32 %v4682_v0, %v344_v9  ;;  %v582_v41 = vmul.f32 %v4682_v0, %v351_v39 }
  0xe8   : > { %3578 = vmatprep.mubr.msk.f32.mxu1 %vm3914_vm0, %v3915_v1  ;;  %3794 = vmatpush3.bf16.msra.mxu0 %v3793_v3  ;;  %v589_v42 = vmul.f32 %v4682_v0, %v358_v40 }
  0xe9   : > { %3803 = vmatpush3.bf16.msra.mxu1 %v3802_v4  ;;  %3602 = vmatprep.subr.mxu0 %v3915_v1 }
  0xea   : > { %3544 = vmatmul.mubr.msk.f32.gmra.mrb[90].mxu0 %vm592_vm1, %v567_v7  ;;  %3637 = vmatprep.subr.mxu1 %v3915_v1 }
  0xeb   : > { %3579 = vmatmul.mubr.msk.f32.gmra.mrb[90].mxu1 %vm592_vm1, %v574_v8  ;;  %3546 = vmatprep.mubr.msk.f32.mxu0 %vm3914_vm0, %v3915_v1 }
  0xec   : > { %3581 = vmatprep.mubr.msk.f32.mxu1 %vm3914_vm0, %v3915_v1  ;;  %3603 = vmatpush3.msra.mxu0 %v465_v10 }
  0xed   : > { %3638 = vmatpush3.msra.mxu1 %v472_v13 }
  0xee   : > { %3547 = vmatmul.mubr.msk.f32.gmra.mrb[92].mxu0 %vm592_vm1, %v568_v12 }
  0xef   : > { %3582 = vmatmul.mubr.msk.f32.gmra.mrb[92].mxu1 %vm592_vm1, %v575_v14  ;;  %3549 = vmatprep.mubr.msk.f32.mxu0 %vm3914_vm0, %v3915_v1 }
  0xf0   : > { %3584 = vmatprep.mubr.msk.f32.mxu1 %vm3914_vm0, %v3915_v1 }
  0xf2   : > { %3550 = vmatmul.mubr.msk.f32.gmra.mrb[94].mxu0 %vm592_vm1, %v569_v37 }
  0xf3   : > { %3585 = vmatmul.mubr.msk.f32.gmra.mrb[94].mxu1 %vm592_vm1, %v576_v18  ;;  %3552 = vmatprep.mubr.msk.f32.mxu0 %vm3914_vm0, %v3915_v1 }
  0xf4   : > { %3587 = vmatprep.mubr.msk.f32.mxu1 %vm3914_vm0, %v3915_v1 }
  0xf6   : > { %3553 = vmatmul.mubr.msk.f32.gmra.mrb[96].mxu0 %vm592_vm1, %v570_v23 }
  0xf7   : > { %3588 = vmatmul.mubr.msk.f32.gmra.mrb[96].mxu1 %vm592_vm1, %v577_v48  ;;  %3604 = vmatprep.mubr.msk.f32.mxu0 %vm3914_vm0, %v3915_v1 }
  0xf8   : > { %3639 = vmatprep.mubr.msk.f32.mxu1 %vm3914_vm0, %v3915_v1 }
  0xfa   : > { %3605 = vmatmul.mubr.msk.f32.vlgmr.msra.gmra.mrb[98].mxu0 %vm592_vm1, %v578_v26 }
  0xfb   : > { %3640 = vmatmul.mubr.msk.f32.vlgmr.msra.gmra.mrb[98].mxu1 %vm592_vm1, %v585_v61  ;;  %3607 = vmatprep.mubr.msk.f32.mxu0 %vm3914_vm0, %v3915_v1 }
  0xfc   : > { %3642 = vmatprep.mubr.msk.f32.mxu1 %vm3914_vm0, %v3915_v1 }
  0xfe   : > { %3608 = vmatmul.mubr.msk.f32.gmra.mrb[100].mxu0 %vm592_vm1, %v579_v29 }
  0xff   : > { %3643 = vmatmul.mubr.msk.f32.gmra.mrb[100].mxu1 %vm592_vm1, %v586_v30  ;;  %3610 = vmatprep.mubr.msk.f32.mxu0 %vm3914_vm0, %v3915_v1 }
 0x100   : > { %3645 = vmatprep.mubr.msk.f32.mxu1 %vm3914_vm0, %v3915_v1 }
 0x102   : > { %3611 = vmatmul.mubr.msk.f32.gmra.mrb[102].mxu0 %vm592_vm1, %v580_v33 }
 0x103   : > { %3646 = vmatmul.mubr.msk.f32.gmra.mrb[102].mxu1 %vm592_vm1, %v587_v34  ;;  %3613 = vmatprep.mubr.msk.f32.mxu0 %vm3914_vm0, %v3915_v1 }
 0x104   : > { %3648 = vmatprep.mubr.msk.f32.mxu1 %vm3914_vm0, %v3915_v1 }
 0x106   : > { %3614 = vmatmul.mubr.msk.f32.gmra.mrb[104].mxu0 %vm592_vm1, %v581_v38 }
 0x107   : > { %3649 = vmatmul.mubr.msk.f32.gmra.mrb[104].mxu1 %vm592_vm1, %v588_v11  ;;  %3616 = vmatprep.mubr.msk.f32.mxu0 %vm3914_vm0, %v3915_v1 }
 0x108   : > { %3651 = vmatprep.mubr.msk.f32.mxu1 %vm3914_vm0, %v3915_v1 }
 0x109   : > { %v680_v45 = vpop.f32.mrb[0].mxu0 }
 0x10a   : > { %2529 = vst.msk [vmem:[%s4773_s28] sm:$0xff] %vm592_vm1, %v680_v45  ;;  %v801_v46 = vpop.f32.mrb[0].mxu1  ;;  %v3116_v47 = vpop.f32.mrb[1].mxu0  ;;  %3617 = vmatmul.mubr.msk.f32.gmra.mrb[106].mxu0 %vm592_vm1, %v582_v41 }
 0x10b   : > { %2536 = vst.msk [vmem:[%s4773_s28 + $0x38] sm:$0xff] %vm592_vm1, %v801_v46  ;;  %v3151_v50 = vpop.f32.mrb[1].mxu1  ;;  %3652 = vmatmul.mubr.msk.f32.gmra.mrb[106].mxu1 %vm592_vm1, %v589_v42  ;;  %3619 = vmatprep.mubr.msk.f32.mxu0 %vm3914_vm0, %v3915_v1 }
 0x10c   : > { %3654 = vmatprep.mubr.msk.f32.mxu1 %vm3914_vm0, %v3915_v1 }
 0x10d   : > { %v685_v54 = vpop.f32.mrb[2].mxu0 }
 0x10e   : > { %2530 = vst.msk [vmem:[%s4773_s28 + $0x8] sm:$0xff] %vm592_vm1, %v685_v54  ;;  %v806_v55 = vpop.f32.mrb[2].mxu1  ;;  %v3119_v56 = vpop.f32.mrb[3].mxu0  ;;  %3620 = vmatmul.mubr.msk.f32.gmra.mrb[108].mxu0 %vm592_vm1, %v583_v49 }
 0x10f   : > { %2537 = vst.msk [vmem:[%s4773_s28 + $0x40] sm:$0xff] %vm592_vm1, %v806_v55  ;;  %v3154_v58 = vpop.f32.mrb[3].mxu1  ;;  %3655 = vmatmul.mubr.msk.f32.gmra.mrb[108].mxu1 %vm592_vm1, %v590_v51  ;;  %3622 = vmatprep.mubr.msk.f32.mxu0 %vm3914_vm0, %v3915_v1 }
 0x110   : > { %3657 = vmatprep.mubr.msk.f32.mxu1 %vm3914_vm0, %v3915_v1 }
 0x111   : > { %v690_v60 = vpop.f32.mrb[4].mxu0 }
 0x112   : > { %2531 = vst.msk [vmem:[%s4773_s28 + $0x10] sm:$0xff] %vm592_vm1, %v690_v60  ;;  %v811_v62 = vpop.f32.mrb[4].mxu1  ;;  %v3122_v63 = vpop.f32.mrb[5].mxu0  ;;  %3623 = vmatmul.mubr.msk.f32.gmra.mrb[110].mxu0 %vm592_vm1, %v584_v57 }
 0x113   : > { %2538 = vst.msk [vmem:[%s4773_s28 + $0x48] sm:$0xff] %vm592_vm1, %v811_v62  ;;  %v3157_v21 = vpop.f32.mrb[5].mxu1  ;;  %3658 = vmatmul.mubr.msk.f32.gmra.mrb[110].mxu1 %vm592_vm1, %v591_v59 }
 0x115   : > { %v695_v2 = vpop.f32.mrb[6].mxu0 }
 0x116   : > { %2532 = vst.msk [vmem:[%s4773_s28 + $0x18] sm:$0xff] %vm592_vm1, %v695_v2  ;;  %v816_v1 = vpop.f32.mrb[6].mxu1  ;;  %v3125_v3 = vpop.f32.mrb[7].mxu0 }
 0x117   : > { %2539 = vst.msk [vmem:[%s4773_s28 + $0x50] sm:$0xff] %vm592_vm1, %v816_v1  ;;  %v3160_v4 = vpop.f32.mrb[7].mxu1 }
 0x119   : > { %v700_v6 = vpop.f32.mrb[8].mxu0 }
 0x11a   : > { %2533 = vst.msk [vmem:[%s4773_s28 + $0x20] sm:$0xff] %vm592_vm1, %v700_v6  ;;  %v821_v7 = vpop.f32.mrb[8].mxu1  ;;  %v3128_v8 = vpop.f32.mrb[9].mxu0 }
 0x11b   : > { %2540 = vst.msk [vmem:[%s4773_s28 + $0x58] sm:$0xff] %vm592_vm1, %v821_v7  ;;  %v3163_v32 = vpop.f32.mrb[9].mxu1 }
 0x11d   : > { %v705_v9 = vpop.f32.mrb[10].mxu0 }
 0x11e   : > { %2534 = vst.msk [vmem:[%s4773_s28 + $0x28] sm:$0xff] %vm592_vm1, %v705_v9  ;;  %v826_v10 = vpop.f32.mrb[10].mxu1  ;;  %v3131_v0 = vpop.f32.mrb[11].mxu0 }
 0x11f   : > { %2541 = vst.msk [vmem:[%s4773_s28 + $0x60] sm:$0xff] %vm592_vm1, %v826_v10  ;;  %v3166_v12 = vpop.f32.mrb[11].mxu1 }
 0x121   : > { %v710_v13 = vpop.f32.mrb[12].mxu0 }
 0x122   : > { %2535 = vst.msk [vmem:[%s4773_s28 + $0x30] sm:$0xff] %vm592_vm1, %v710_v13  ;;  %v831_v14 = vpop.f32.mrb[12].mxu1  ;;  %v3134_v15 = vpop.f32.mrb[13].mxu0 }
 0x123   : > { %2542 = vst.msk [vmem:[%s4773_s28 + $0x68] sm:$0xff] %vm592_vm1, %v831_v14  ;;  %v3169_v16 = vpop.f32.mrb[13].mxu1 }
 0x125   : > { %v922_v17 = vpop.f32.mrb[14].mxu0 }
 0x126   : > { %2543 = vst.msk [vmem:[%s4773_s28 + $0x70] sm:$0xff] %vm592_vm1, %v922_v17  ;;  %v1043_v37 = vpop.f32.mrb[14].mxu1  ;;  %v3186_v18 = vpop.f32.mrb[15].mxu0 }
 0x127   : > { %2550 = vst.msk [vmem:[%s4773_s28 + $0xa8] sm:$0xff] %vm592_vm1, %v1043_v37  ;;  %v3221_v19 = vpop.f32.mrb[15].mxu1 }
 0x129   : > { %v927_v20 = vpop.f32.mrb[16].mxu0 }
 0x12a   : > { %2544 = vst.msk [vmem:[%s4773_s28 + $0x78] sm:$0xff] %vm592_vm1, %v927_v20  ;;  %v1048_v22 = vpop.f32.mrb[16].mxu1  ;;  %v3189_v23 = vpop.f32.mrb[17].mxu0 }
 0x12b   : > { %2551 = vst.msk [vmem:[%s4773_s28 + $0xb0] sm:$0xff] %vm592_vm1, %v1048_v22  ;;  %v3224_v48 = vpop.f32.mrb[17].mxu1 }
 0x12d   : > { %v932_v24 = vpop.f32.mrb[18].mxu0 }
 0x12e   : > { %2545 = vst.msk [vmem:[%s4773_s28 + $0x80] sm:$0xff] %vm592_vm1, %v932_v24  ;;  %v1053_v25 = vpop.f32.mrb[18].mxu1  ;;  %v3192_v26 = vpop.f32.mrb[19].mxu0 }
 0x12f   : > { %2552 = vst.msk [vmem:[%s4773_s28 + $0xb8] sm:$0xff] %vm592_vm1, %v1053_v25  ;;  %v3227_v61 = vpop.f32.mrb[19].mxu1 }
 0x131   : > { %v937_v27 = vpop.f32.mrb[20].mxu0 }
 0x132   : > { %2546 = vst.msk [vmem:[%s4773_s28 + $0x88] sm:$0xff] %vm592_vm1, %v937_v27  ;;  %v1058_v28 = vpop.f32.mrb[20].mxu1  ;;  %v3195_v29 = vpop.f32.mrb[21].mxu0 }
 0x133   : > { %2553 = vst.msk [vmem:[%s4773_s28 + $0xc0] sm:$0xff] %vm592_vm1, %v1058_v28  ;;  %v3230_v30 = vpop.f32.mrb[21].mxu1 }
 0x135   : > { %v942_v31 = vpop.f32.mrb[22].mxu0 }
 0x136   : > { %2547 = vst.msk [vmem:[%s4773_s28 + $0x90] sm:$0xff] %vm592_vm1, %v942_v31  ;;  %v1063_v5 = vpop.f32.mrb[22].mxu1  ;;  %v3198_v33 = vpop.f32.mrb[23].mxu0 }
 0x137   : > { %2554 = vst.msk [vmem:[%s4773_s28 + $0xc8] sm:$0xff] %vm592_vm1, %v1063_v5  ;;  %v3233_v34 = vpop.f32.mrb[23].mxu1 }
 0x139   : > { %v947_v35 = vpop.f32.mrb[24].mxu0 }
 0x13a   : > { %2548 = vst.msk [vmem:[%s4773_s28 + $0x98] sm:$0xff] %vm592_vm1, %v947_v35  ;;  %v1068_v36 = vpop.f32.mrb[24].mxu1  ;;  %v3201_v38 = vpop.f32.mrb[25].mxu0 }
 0x13b   : > { %2555 = vst.msk [vmem:[%s4773_s28 + $0xd0] sm:$0xff] %vm592_vm1, %v1068_v36  ;;  %v3236_v11 = vpop.f32.mrb[25].mxu1 }
 0x13d   : > { %v952_v39 = vpop.f32.mrb[26].mxu0 }
 0x13e   : > { %2549 = vst.msk [vmem:[%s4773_s28 + $0xa0] sm:$0xff] %vm592_vm1, %v952_v39  ;;  %v1073_v40 = vpop.f32.mrb[26].mxu1  ;;  %v3204_v41 = vpop.f32.mrb[27].mxu0 }
 0x13f   : > { %2556 = vst.msk [vmem:[%s4773_s28 + $0xd8] sm:$0xff] %vm592_vm1, %v1073_v40  ;;  %v3239_v42 = vpop.f32.mrb[27].mxu1 }
 0x141   : > { %v1164_v43 = vpop.f32.mrb[28].mxu0 }
 0x142   : > { %2557 = vst.msk [vmem:[%s4773_s28 + $0xe0] sm:$0xff] %vm592_vm1, %v1164_v43  ;;  %v1285_v44 = vpop.f32.mrb[28].mxu1  ;;  %v3256_v45 = vpop.f32.mrb[29].mxu0 }
 0x143   : > { %2564 = vst.msk [vmem:[%s4773_s28 + $0x118] sm:$0xff] %vm592_vm1, %v1285_v44  ;;  %v3291_v46 = vpop.f32.mrb[29].mxu1 }
 0x145   : > { %v1169_v47 = vpop.f32.mrb[30].mxu0 }
 0x146   : > { %2558 = vst.msk [vmem:[%s4773_s28 + $0xe8] sm:$0xff] %vm592_vm1, %v1169_v47  ;;  %v1290_v49 = vpop.f32.mrb[30].mxu1  ;;  %v3259_v50 = vpop.f32.mrb[31].mxu0 }
 0x147   : > { %2565 = vst.msk [vmem:[%s4773_s28 + $0x120] sm:$0xff] %vm592_vm1, %v1290_v49  ;;  %v3294_v51 = vpop.f32.mrb[31].mxu1 }
 0x149   : > { %v1174_v52 = vpop.f32.mrb[32].mxu0 }
 0x14a   : > { %2559 = vst.msk [vmem:[%s4773_s28 + $0xf0] sm:$0xff] %vm592_vm1, %v1174_v52  ;;  %v1295_v53 = vpop.f32.mrb[32].mxu1  ;;  %v3262_v54 = vpop.f32.mrb[33].mxu0 }
 0x14b   : > { %2566 = vst.msk [vmem:[%s4773_s28 + $0x128] sm:$0xff] %vm592_vm1, %v1295_v53  ;;  %v3297_v55 = vpop.f32.mrb[33].mxu1 }
 0x14d   : > { %v1179_v56 = vpop.f32.mrb[34].mxu0 }
 0x14e   : > { %2560 = vst.msk [vmem:[%s4773_s28 + $0xf8] sm:$0xff] %vm592_vm1, %v1179_v56  ;;  %v1300_v57 = vpop.f32.mrb[34].mxu1  ;;  %v3265_v58 = vpop.f32.mrb[35].mxu0 }
 0x14f   : > { %2567 = vst.msk [vmem:[%s4773_s28 + $0x130] sm:$0xff] %vm592_vm1, %v1300_v57  ;;  %v3300_v59 = vpop.f32.mrb[35].mxu1 }
 0x151   : > { %v1184_v60 = vpop.f32.mrb[36].mxu0 }
 0x152   : > { %2561 = vst.msk [vmem:[%s4773_s28 + $0x100] sm:$0xff] %vm592_vm1, %v1184_v60  ;;  %v1305_v62 = vpop.f32.mrb[36].mxu1  ;;  %v3268_v63 = vpop.f32.mrb[37].mxu0 }
 0x153   : > { %2568 = vst.msk [vmem:[%s4773_s28 + $0x138] sm:$0xff] %vm592_vm1, %v1305_v62  ;;  %v3303_v21 = vpop.f32.mrb[37].mxu1 }
 0x155   : > { %v1189_v2 = vpop.f32.mrb[38].mxu0 }
 0x156   : > { %2562 = vst.msk [vmem:[%s4773_s28 + $0x108] sm:$0xff] %vm592_vm1, %v1189_v2  ;;  %v1310_v1 = vpop.f32.mrb[38].mxu1  ;;  %v3271_v3 = vpop.f32.mrb[39].mxu0 }
 0x157   : > { %2569 = vst.msk [vmem:[%s4773_s28 + $0x140] sm:$0xff] %vm592_vm1, %v1310_v1  ;;  %v3306_v4 = vpop.f32.mrb[39].mxu1 }
 0x159   : > { %v1194_v6 = vpop.f32.mrb[40].mxu0 }
 0x15a   : > { %2563 = vst.msk [vmem:[%s4773_s28 + $0x110] sm:$0xff] %vm592_vm1, %v1194_v6  ;;  %v1315_v7 = vpop.f32.mrb[40].mxu1  ;;  %v3274_v8 = vpop.f32.mrb[41].mxu0 }
 0x15b   : > { %2570 = vst.msk [vmem:[%s4773_s28 + $0x148] sm:$0xff] %vm592_vm1, %v1315_v7  ;;  %v3309_v32 = vpop.f32.mrb[41].mxu1 }
 0x15d   : > { %v1406_v9 = vpop.f32.mrb[42].mxu0 }
 0x15e   : > { %2571 = vst.msk [vmem:[%s4773_s28 + $0x150] sm:$0xff] %vm592_vm1, %v1406_v9  ;;  %v1527_v10 = vpop.f32.mrb[42].mxu1  ;;  %v3326_v0 = vpop.f32.mrb[43].mxu0 }
 0x15f   : > { %2578 = vst.msk [vmem:[%s4773_s28 + $0x188] sm:$0xff] %vm592_vm1, %v1527_v10  ;;  %v3361_v12 = vpop.f32.mrb[43].mxu1 }
 0x161   : > { %v1411_v13 = vpop.f32.mrb[44].mxu0 }
 0x162   : > { %2572 = vst.msk [vmem:[%s4773_s28 + $0x158] sm:$0xff] %vm592_vm1, %v1411_v13  ;;  %v1532_v14 = vpop.f32.mrb[44].mxu1  ;;  %v3329_v15 = vpop.f32.mrb[45].mxu0 }
 0x163   : > { %2579 = vst.msk [vmem:[%s4773_s28 + $0x190] sm:$0xff] %vm592_vm1, %v1532_v14  ;;  %v3364_v16 = vpop.f32.mrb[45].mxu1 }
 0x165   : > { %v1416_v17 = vpop.f32.mrb[46].mxu0 }
 0x166   : > { %2573 = vst.msk [vmem:[%s4773_s28 + $0x160] sm:$0xff] %vm592_vm1, %v1416_v17  ;;  %v1537_v37 = vpop.f32.mrb[46].mxu1  ;;  %v3332_v18 = vpop.f32.mrb[47].mxu0 }
 0x167   : > { %2580 = vst.msk [vmem:[%s4773_s28 + $0x198] sm:$0xff] %vm592_vm1, %v1537_v37  ;;  %v3367_v19 = vpop.f32.mrb[47].mxu1 }
 0x169   : > { %v1421_v20 = vpop.f32.mrb[48].mxu0 }
 0x16a   : > { %2574 = vst.msk [vmem:[%s4773_s28 + $0x168] sm:$0xff] %vm592_vm1, %v1421_v20  ;;  %v1542_v22 = vpop.f32.mrb[48].mxu1  ;;  %v3335_v23 = vpop.f32.mrb[49].mxu0 }
 0x16b   : > { %2581 = vst.msk [vmem:[%s4773_s28 + $0x1a0] sm:$0xff] %vm592_vm1, %v1542_v22  ;;  %v3370_v48 = vpop.f32.mrb[49].mxu1 }
 0x16d   : > { %v1426_v24 = vpop.f32.mrb[50].mxu0 }
 0x16e   : > { %2575 = vst.msk [vmem:[%s4773_s28 + $0x170] sm:$0xff] %vm592_vm1, %v1426_v24  ;;  %v1547_v25 = vpop.f32.mrb[50].mxu1  ;;  %v3338_v26 = vpop.f32.mrb[51].mxu0 }
 0x16f   : > { %2582 = vst.msk [vmem:[%s4773_s28 + $0x1a8] sm:$0xff] %vm592_vm1, %v1547_v25  ;;  %v3373_v61 = vpop.f32.mrb[51].mxu1 }
 0x171   : > { %v1431_v27 = vpop.f32.mrb[52].mxu0 }
 0x172   : > { %2576 = vst.msk [vmem:[%s4773_s28 + $0x178] sm:$0xff] %vm592_vm1, %v1431_v27  ;;  %v1552_v28 = vpop.f32.mrb[52].mxu1  ;;  %v3341_v29 = vpop.f32.mrb[53].mxu0 }
 0x173   : > { %2583 = vst.msk [vmem:[%s4773_s28 + $0x1b0] sm:$0xff] %vm592_vm1, %v1552_v28  ;;  %v3376_v30 = vpop.f32.mrb[53].mxu1 }
 0x175   : > { %v1436_v31 = vpop.f32.mrb[54].mxu0 }
 0x176   : > { %2577 = vst.msk [vmem:[%s4773_s28 + $0x180] sm:$0xff] %vm592_vm1, %v1436_v31  ;;  %v1557_v5 = vpop.f32.mrb[54].mxu1  ;;  %v3344_v33 = vpop.f32.mrb[55].mxu0 }
 0x177   : > { %2584 = vst.msk [vmem:[%s4773_s28 + $0x1b8] sm:$0xff] %vm592_vm1, %v1557_v5  ;;  %v3379_v34 = vpop.f32.mrb[55].mxu1 }
 0x179   : > { %v1648_v35 = vpop.f32.mrb[56].mxu0 }
 0x17a   : > { %2585 = vst.msk [vmem:[%s4773_s28 + $0x1c0] sm:$0xff] %vm592_vm1, %v1648_v35  ;;  %v1769_v36 = vpop.f32.mrb[56].mxu1  ;;  %v3396_v38 = vpop.f32.mrb[57].mxu0 }
 0x17b   : > { %2592 = vst.msk [vmem:[%s4773_s28 + $0x1f8] sm:$0xff] %vm592_vm1, %v1769_v36  ;;  %v3431_v11 = vpop.f32.mrb[57].mxu1 }
 0x17d   : > { %v1653_v39 = vpop.f32.mrb[58].mxu0 }
 0x17e   : > { %2586 = vst.msk [vmem:[%s4773_s28 + $0x1c8] sm:$0xff] %vm592_vm1, %v1653_v39  ;;  %v1774_v40 = vpop.f32.mrb[58].mxu1  ;;  %v3399_v41 = vpop.f32.mrb[59].mxu0 }
 0x17f   : > { %2593 = vst.msk [vmem:[%s4773_s28 + $0x200] sm:$0xff] %vm592_vm1, %v1774_v40  ;;  %v3434_v42 = vpop.f32.mrb[59].mxu1 }
 0x181   : > { %v1658_v43 = vpop.f32.mrb[60].mxu0 }
 0x182   : > { %2587 = vst.msk [vmem:[%s4773_s28 + $0x1d0] sm:$0xff] %vm592_vm1, %v1658_v43  ;;  %v1779_v44 = vpop.f32.mrb[60].mxu1  ;;  %v3402_v45 = vpop.f32.mrb[61].mxu0 }
 0x183   : > { %2594 = vst.msk [vmem:[%s4773_s28 + $0x208] sm:$0xff] %vm592_vm1, %v1779_v44  ;;  %v3437_v46 = vpop.f32.mrb[61].mxu1 }
 0x185   : > { %v1663_v47 = vpop.f32.mrb[62].mxu0 }
 0x186   : > { %2588 = vst.msk [vmem:[%s4773_s28 + $0x1d8] sm:$0xff] %vm592_vm1, %v1663_v47  ;;  %v1784_v49 = vpop.f32.mrb[62].mxu1  ;;  %v3405_v50 = vpop.f32.mrb[63].mxu0 }
 0x187   : > { %2595 = vst.msk [vmem:[%s4773_s28 + $0x210] sm:$0xff] %vm592_vm1, %v1784_v49  ;;  %v3440_v51 = vpop.f32.mrb[63].mxu1 }
 0x189   : > { %v1668_v52 = vpop.f32.mrb[64].mxu0 }
 0x18a   : > { %2589 = vst.msk [vmem:[%s4773_s28 + $0x1e0] sm:$0xff] %vm592_vm1, %v1668_v52  ;;  %v1789_v53 = vpop.f32.mrb[64].mxu1  ;;  %v3408_v54 = vpop.f32.mrb[65].mxu0 }
 0x18b   : > { %2596 = vst.msk [vmem:[%s4773_s28 + $0x218] sm:$0xff] %vm592_vm1, %v1789_v53  ;;  %v3443_v55 = vpop.f32.mrb[65].mxu1 }
 0x18d   : > { %v1673_v56 = vpop.f32.mrb[66].mxu0 }
 0x18e   : > { %2590 = vst.msk [vmem:[%s4773_s28 + $0x1e8] sm:$0xff] %vm592_vm1, %v1673_v56  ;;  %v1794_v57 = vpop.f32.mrb[66].mxu1  ;;  %v3411_v58 = vpop.f32.mrb[67].mxu0 }
 0x18f   : > { %2597 = vst.msk [vmem:[%s4773_s28 + $0x220] sm:$0xff] %vm592_vm1, %v1794_v57  ;;  %v3446_v59 = vpop.f32.mrb[67].mxu1 }
 0x191   : > { %v1678_v60 = vpop.f32.mrb[68].mxu0 }
 0x192   : > { %2591 = vst.msk [vmem:[%s4773_s28 + $0x1f0] sm:$0xff] %vm592_vm1, %v1678_v60  ;;  %v1799_v62 = vpop.f32.mrb[68].mxu1  ;;  %v3414_v63 = vpop.f32.mrb[69].mxu0 }
 0x193   : > { %2598 = vst.msk [vmem:[%s4773_s28 + $0x228] sm:$0xff] %vm592_vm1, %v1799_v62  ;;  %v3449_v21 = vpop.f32.mrb[69].mxu1 }
 0x195   : > { %v1890_v2 = vpop.f32.mrb[70].mxu0 }
 0x196   : > { %2599 = vst.msk [vmem:[%s4773_s28 + $0x230] sm:$0xff] %vm592_vm1, %v1890_v2  ;;  %v2011_v1 = vpop.f32.mrb[70].mxu1  ;;  %v3466_v3 = vpop.f32.mrb[71].mxu0 }
 0x197   : > { %2606 = vst.msk [vmem:[%s4773_s28 + $0x268] sm:$0xff] %vm592_vm1, %v2011_v1  ;;  %v3501_v4 = vpop.f32.mrb[71].mxu1 }
 0x199   : > { %v1895_v6 = vpop.f32.mrb[72].mxu0 }
 0x19a   : > { %2600 = vst.msk [vmem:[%s4773_s28 + $0x238] sm:$0xff] %vm592_vm1, %v1895_v6  ;;  %v2016_v7 = vpop.f32.mrb[72].mxu1  ;;  %v3469_v8 = vpop.f32.mrb[73].mxu0 }
 0x19b   : > { %2607 = vst.msk [vmem:[%s4773_s28 + $0x270] sm:$0xff] %vm592_vm1, %v2016_v7  ;;  %v3504_v32 = vpop.f32.mrb[73].mxu1 }
 0x19d   : > { %v1900_v9 = vpop.f32.mrb[74].mxu0 }
 0x19e   : > { %2601 = vst.msk [vmem:[%s4773_s28 + $0x240] sm:$0xff] %vm592_vm1, %v1900_v9  ;;  %v2021_v10 = vpop.f32.mrb[74].mxu1  ;;  %v3472_v0 = vpop.f32.mrb[75].mxu0 }
 0x19f   : > { %2608 = vst.msk [vmem:[%s4773_s28 + $0x278] sm:$0xff] %vm592_vm1, %v2021_v10  ;;  %v3507_v12 = vpop.f32.mrb[75].mxu1 }
 0x1a1   : > { %v1905_v13 = vpop.f32.mrb[76].mxu0 }
 0x1a2   : > { %2602 = vst.msk [vmem:[%s4773_s28 + $0x248] sm:$0xff] %vm592_vm1, %v1905_v13  ;;  %v2026_v14 = vpop.f32.mrb[76].mxu1  ;;  %v3475_v15 = vpop.f32.mrb[77].mxu0 }
 0x1a3   : > { %2609 = vst.msk [vmem:[%s4773_s28 + $0x280] sm:$0xff] %vm592_vm1, %v2026_v14  ;;  %v3510_v16 = vpop.f32.mrb[77].mxu1 }
 0x1a5   : > { %v1910_v17 = vpop.f32.mrb[78].mxu0 }
 0x1a6   : > { %2603 = vst.msk [vmem:[%s4773_s28 + $0x250] sm:$0xff] %vm592_vm1, %v1910_v17  ;;  %v2031_v37 = vpop.f32.mrb[78].mxu1  ;;  %v3478_v18 = vpop.f32.mrb[79].mxu0 }
 0x1a7   : > { %2610 = vst.msk [vmem:[%s4773_s28 + $0x288] sm:$0xff] %vm592_vm1, %v2031_v37  ;;  %v3513_v19 = vpop.f32.mrb[79].mxu1 }
 0x1a9   : > { %v1915_v20 = vpop.f32.mrb[80].mxu0 }
 0x1aa   : > { %2604 = vst.msk [vmem:[%s4773_s28 + $0x258] sm:$0xff] %vm592_vm1, %v1915_v20  ;;  %v2036_v22 = vpop.f32.mrb[80].mxu1  ;;  %v3481_v23 = vpop.f32.mrb[81].mxu0 }
 0x1ab   : > { %2611 = vst.msk [vmem:[%s4773_s28 + $0x290] sm:$0xff] %vm592_vm1, %v2036_v22  ;;  %v3516_v48 = vpop.f32.mrb[81].mxu1 }
 0x1ad   : > { %v1920_v24 = vpop.f32.mrb[82].mxu0 }
 0x1ae   : > { %2605 = vst.msk [vmem:[%s4773_s28 + $0x260] sm:$0xff] %vm592_vm1, %v1920_v24  ;;  %v2041_v25 = vpop.f32.mrb[82].mxu1  ;;  %v3484_v26 = vpop.f32.mrb[83].mxu0 }
 0x1af   : > { %2612 = vst.msk [vmem:[%s4773_s28 + $0x298] sm:$0xff] %vm592_vm1, %v2041_v25  ;;  %v3519_v61 = vpop.f32.mrb[83].mxu1 }
 0x1b1   : > { %v2132_v27 = vpop.f32.mrb[84].mxu0 }
 0x1b2   : > { %2613 = vst.msk [vmem:[%s4773_s28 + $0x2a0] sm:$0xff] %vm592_vm1, %v2132_v27  ;;  %v2253_v28 = vpop.f32.mrb[84].mxu1  ;;  %v3536_v29 = vpop.f32.mrb[85].mxu0 }
 0x1b3   : > { %2620 = vst.msk [vmem:[%s4773_s28 + $0x2d8] sm:$0xff] %vm592_vm1, %v2253_v28  ;;  %v3571_v30 = vpop.f32.mrb[85].mxu1 }
 0x1b5   : > { %v2137_v31 = vpop.f32.mrb[86].mxu0 }
 0x1b6   : > { %2614 = vst.msk [vmem:[%s4773_s28 + $0x2a8] sm:$0xff] %vm592_vm1, %v2137_v31  ;;  %v2258_v5 = vpop.f32.mrb[86].mxu1  ;;  %v3539_v33 = vpop.f32.mrb[87].mxu0 }
 0x1b7   : > { %2621 = vst.msk [vmem:[%s4773_s28 + $0x2e0] sm:$0xff] %vm592_vm1, %v2258_v5  ;;  %v3574_v34 = vpop.f32.mrb[87].mxu1 }
 0x1b9   : > { %v2142_v35 = vpop.f32.mrb[88].mxu0 }
 0x1ba   : > { %2615 = vst.msk [vmem:[%s4773_s28 + $0x2b0] sm:$0xff] %vm592_vm1, %v2142_v35  ;;  %v2263_v36 = vpop.f32.mrb[88].mxu1  ;;  %v3542_v38 = vpop.f32.mrb[89].mxu0 }
 0x1bb   : > { %2622 = vst.msk [vmem:[%s4773_s28 + $0x2e8] sm:$0xff] %vm592_vm1, %v2263_v36  ;;  %v3577_v11 = vpop.f32.mrb[89].mxu1 }
 0x1bd   : > { %v2147_v39 = vpop.f32.mrb[90].mxu0 }
 0x1be   : > { %2616 = vst.msk [vmem:[%s4773_s28 + $0x2b8] sm:$0xff] %vm592_vm1, %v2147_v39  ;;  %v2268_v40 = vpop.f32.mrb[90].mxu1  ;;  %v3545_v41 = vpop.f32.mrb[91].mxu0 }
 0x1bf   : > { %2623 = vst.msk [vmem:[%s4773_s28 + $0x2f0] sm:$0xff] %vm592_vm1, %v2268_v40  ;;  %v3580_v42 = vpop.f32.mrb[91].mxu1 }
 0x1c1   : > { %v2152_v43 = vpop.f32.mrb[92].mxu0 }
 0x1c2   : > { %2617 = vst.msk [vmem:[%s4773_s28 + $0x2c0] sm:$0xff] %vm592_vm1, %v2152_v43  ;;  %v2273_v44 = vpop.f32.mrb[92].mxu1  ;;  %v3548_v45 = vpop.f32.mrb[93].mxu0 }
 0x1c3   : > { %2624 = vst.msk [vmem:[%s4773_s28 + $0x2f8] sm:$0xff] %vm592_vm1, %v2273_v44  ;;  %v3583_v46 = vpop.f32.mrb[93].mxu1 }
 0x1c5   : > { %v2157_v47 = vpop.f32.mrb[94].mxu0 }
 0x1c6   : > { %2618 = vst.msk [vmem:[%s4773_s28 + $0x2c8] sm:$0xff] %vm592_vm1, %v2157_v47  ;;  %v2278_v49 = vpop.f32.mrb[94].mxu1  ;;  %v3551_v50 = vpop.f32.mrb[95].mxu0 }
 0x1c7   : > { %2625 = vst.msk [vmem:[%s4773_s28 + $0x300] sm:$0xff] %vm592_vm1, %v2278_v49  ;;  %v3586_v51 = vpop.f32.mrb[95].mxu1 }
 0x1c9   : > { %v2162_v52 = vpop.f32.mrb[96].mxu0 }
 0x1ca   : > { %2619 = vst.msk [vmem:[%s4773_s28 + $0x2d0] sm:$0xff] %vm592_vm1, %v2162_v52  ;;  %v2283_v53 = vpop.f32.mrb[96].mxu1  ;;  %v3554_v54 = vpop.f32.mrb[97].mxu0 }
 0x1cb   : > { %2626 = vst.msk [vmem:[%s4773_s28 + $0x308] sm:$0xff] %vm592_vm1, %v2283_v53  ;;  %v3589_v55 = vpop.f32.mrb[97].mxu1 }
 0x1cd   : > { %v2374_v56 = vpop.f32.mrb[98].mxu0 }
 0x1ce   : > { %2627 = vst.msk [vmem:[%s4773_s28 + $0x310] sm:$0xff] %vm592_vm1, %v2374_v56  ;;  %v2495_v57 = vpop.f32.mrb[98].mxu1  ;;  %v3606_v58 = vpop.f32.mrb[99].mxu0 }
 0x1cf   : > { %2634 = vst.msk [vmem:[%s4773_s28 + $0x348] sm:$0xff] %vm592_vm1, %v2495_v57  ;;  %v3641_v59 = vpop.f32.mrb[99].mxu1 }
 0x1d1   : > { %v2379_v60 = vpop.f32.mrb[100].mxu0 }
 0x1d2   : > { %2628 = vst.msk [vmem:[%s4773_s28 + $0x318] sm:$0xff] %vm592_vm1, %v2379_v60  ;;  %v2500_v62 = vpop.f32.mrb[100].mxu1  ;;  %v3609_v63 = vpop.f32.mrb[101].mxu0 }
 0x1d3   : > { %2635 = vst.msk [vmem:[%s4773_s28 + $0x350] sm:$0xff] %vm592_vm1, %v2500_v62  ;;  %v3644_v21 = vpop.f32.mrb[101].mxu1 }
 0x1d5   : > { %v2384_v2 = vpop.f32.mrb[102].mxu0 }
 0x1d6   : > { %2629 = vst.msk [vmem:[%s4773_s28 + $0x320] sm:$0xff] %vm592_vm1, %v2384_v2  ;;  %v2505_v1 = vpop.f32.mrb[102].mxu1  ;;  %v3612_v3 = vpop.f32.mrb[103].mxu0 }
 0x1d7   : > { %2636 = vst.msk [vmem:[%s4773_s28 + $0x358] sm:$0xff] %vm592_vm1, %v2505_v1  ;;  %v3647_v4 = vpop.f32.mrb[103].mxu1 }
 0x1d9   : > { %v2389_v6 = vpop.f32.mrb[104].mxu0 }
 0x1da   : > { %2630 = vst.msk [vmem:[%s4773_s28 + $0x328] sm:$0xff] %vm592_vm1, %v2389_v6  ;;  %v2510_v7 = vpop.f32.mrb[104].mxu1  ;;  %v3615_v8 = vpop.f32.mrb[105].mxu0 }
 0x1db   : > { %2637 = vst.msk [vmem:[%s4773_s28 + $0x360] sm:$0xff] %vm592_vm1, %v2510_v7  ;;  %v3650_v32 = vpop.f32.mrb[105].mxu1 }
 0x1dd   : > { %v2394_v9 = vpop.f32.mrb[106].mxu0 }
 0x1de   : > { %2631 = vst.msk [vmem:[%s4773_s28 + $0x330] sm:$0xff] %vm592_vm1, %v2394_v9  ;;  %v2515_v10 = vpop.f32.mrb[106].mxu1  ;;  %v3618_v0 = vpop.f32.mrb[107].mxu0 }
 0x1df   : > { %2638 = vst.msk [vmem:[%s4773_s28 + $0x368] sm:$0xff] %vm592_vm1, %v2515_v10  ;;  %v3653_v12 = vpop.f32.mrb[107].mxu1 }
 0x1e1   : > { %v2399_v13 = vpop.f32.mrb[108].mxu0 }
 0x1e2   : > { %2632 = vst.msk [vmem:[%s4773_s28 + $0x338] sm:$0xff] %vm592_vm1, %v2399_v13  ;;  %v2520_v14 = vpop.f32.mrb[108].mxu1  ;;  %v3621_v15 = vpop.f32.mrb[109].mxu0 }
 0x1e3   : > { %2639 = vst.msk [vmem:[%s4773_s28 + $0x370] sm:$0xff] %vm592_vm1, %v2520_v14  ;;  %v3656_v16 = vpop.f32.mrb[109].mxu1 }
 0x1e5   : > { %v2404_v17 = vpop.f32.mrb[110].mxu0 }
 0x1e6   : > { %2633 = vst.msk [vmem:[%s4773_s28 + $0x340] sm:$0xff] %vm592_vm1, %v2404_v17  ;;  %v2525_v37 = vpop.f32.mrb[110].mxu1  ;;  %v3624_v18 = vpop.f32.mrb[111].mxu0 }
 0x1e7   : > { %2640 = vst.msk [vmem:[%s4773_s28 + $0x378] sm:$0xff] %vm592_vm1, %v2525_v37  ;;  %v3659_v19 = vpop.f32.mrb[111].mxu1 }
 0x1e8 PF: > { %s20_s23 = sadd.s32 1, %s3910_s23   ;;  %s5046_s20 = smov %s3902_s22 }
 0x1e9   : > { %p17_p13 = scmp.ge.s32.totalorder %s20_s23, 10   ;;  %s5047_s21 = smov %s3906_s0 }
 0x1ea   : > { %s5048_s22 = smov %s5051_s24  ;;  %s5049_s0 = smov %s5055_s25 }
 0x1eb   :  { %19 = sbr.rel (!%p17_p13) target bundleno = 18 (0x12), region = 65 }

</bundles_post_ra>
